<compile_context>
chip_gen: v5e
topology: v5e:2x2
jax: 0.10.0
libtpu: 0.0.40
codegen_flags: <defaults>
</compile_context>

<pallas_src>
import functools
import math

import jax
import jax.numpy as jnp
from jax.experimental import pallas as pl
from jax.experimental.pallas import tpu as pltpu

_INV_SQRT2 = 1.0 / math.sqrt(2.0)
_SQRT_2_OVER_PI = math.sqrt(2.0 / math.pi)
_TARGET_BLOCK_BYTES = 2 << 20          # ~2 MiB per activation block (see VMEM note)
_KRON_MAX_LANES = 512                  # max folded lane width for the small-U path


def _gelu_f32(y, approx):
    if approx:
        # tanh approximation -> transcendental goes to the EUP slot (v7x relief)
        return 0.5 * y * (1.0 + jnp.tanh(_SQRT_2_OVER_PI * (y + 0.044715 * y * y * y)))
    # exact GELU (torch.nn.functional.gelu default, erf-based), computed in f32
    return 0.5 * y * (1.0 + jax.lax.erf(y * _INV_SQRT2))


# --------------------------------------------------------------------------- #
# Kernels
# --------------------------------------------------------------------------- #
def _rows_kernel(x_ref, w_ref, b_ref, o_ref, *, precision, approx_gelu):
    # x_ref: (tm, Dp)   w_ref: (Dp, Dp) [in x out]   b_ref: (1, Dp) float32
    y = jnp.dot(x_ref[...], w_ref[...],
                preferred_element_type=jnp.float32, precision=precision)
    o_ref[...] = _gelu_f32(y + b_ref[...], approx_gelu).astype(o_ref.dtype)


def _native3d_kernel(x_ref, w_ref, b_ref, o_ref, *, precision, approx_gelu):
    # x_ref: (gblk, D, tu)   w_ref: (D, D) [out x in]   b_ref: (D, 1) float32
    x = x_ref[...]
    g = x.shape[0]
    w = jnp.broadcast_to(w_ref[...][None], (g,) + w_ref.shape)    # hoisted, once/step
    y = jnp.einsum('god,gdu->gou', w, x,
                   preferred_element_type=jnp.float32, precision=precision)
    o_ref[...] = _gelu_f32(y + b_ref[...], approx_gelu).astype(o_ref.dtype)


# --------------------------------------------------------------------------- #
# pallas_call wrappers
# --------------------------------------------------------------------------- #
def _round_down(n, m):
    return (n // m) * m


def _pick_row_tile(rows, lane_width, itemsize,
                   target_bytes=_TARGET_BLOCK_BYTES, min_steps=4):
    # dtype-aware sublane multiple: 8 (f32) / 16 (bf16) / 32 (int8, fp8)
    sub = max(8, 32 // itemsize)
    cap = max(sub, _round_down(target_bytes // max(lane_width * itemsize, 1), sub))
    tm = max(rows // min_steps, sub)
    tm = max(_round_down(tm, sub), sub)
    tm = min(tm, cap)
    if tm >= rows:
        return rows          # single full block (block dim == array dim: always legal)
    return tm


def _linear_gelu_rows(x2d, w_io, bias_row, *, precision, approx_gelu):
    """x2d: (rows, Dp). w_io: (Dp, Dp) in x2d.dtype (in x out). bias_row: (1, Dp) f32."""
    rows, Dp = x2d.shape
    tm = _pick_row_tile(rows, Dp, x2d.dtype.itemsize)
    kernel = functools.partial(_rows_kernel, precision=precision,
                               approx_gelu=approx_gelu)
    return pl.pallas_call(
        kernel,
        out_shape=jax.ShapeDtypeStruct((rows, Dp), x2d.dtype),
        grid_spec=pltpu.PrefetchScalarGridSpec(
            num_scalar_prefetch=0,
            grid=(pl.cdiv(rows, tm),),          # ragged last block: writeback is clipped
            in_specs=[
                pl.BlockSpec((tm, Dp), lambda i: (i, 0)),   # activations, tiled
                pl.BlockSpec((Dp, Dp), lambda i: (0, 0)),   # shared weight, resident
                pl.BlockSpec((1, Dp), lambda i: (0, 0)),    # bias, resident
            ],
            out_specs=pl.BlockSpec((tm, Dp), lambda i: (i, 0)),
        ),
        compiler_params=pltpu.CompilerParams(dimension_semantics=("parallel",)),
    )(x2d, w_io, bias_row)


def _linear_gelu_native3d(x3d, w_oi, bias_col, *, precision, approx_gelu,
                          target_bytes=_TARGET_BLOCK_BYTES, tu_max=2048):
    """x3d: (G, D, U) native 3D layout (no HBM transposes); U stays on lanes."""
    G, D, U = x3d.shape
    itemsize = x3d.dtype.itemsize
    if U >= 128:
        tu = min(tu_max, _round_down(U, 128))
    else:
        tu = U                                   # full (block dim == array dim)
    per_group = max(D * tu * itemsize, 1)
    gblk = max(1, min(G, target_bytes // per_group))
    # make sure the grid has >= 2 steps so megacore (v7x: 2 TCs) can split the work
    if pl.cdiv(G, gblk) * pl.cdiv(U, tu) < 2:
        if G >= 2:
            gblk = pl.cdiv(G, 2)
        elif tu >= 256:
            tu = ((tu // 2 + 127) // 128) * 128

    kernel = functools.partial(_native3d_kernel, precision=precision,
                               approx_gelu=approx_gelu)
    return pl.pallas_call(
        kernel,
        out_shape=jax.ShapeDtypeStruct((G, D, U), x3d.dtype),
        grid_spec=pltpu.PrefetchScalarGridSpec(
            num_scalar_prefetch=0,
            grid=(pl.cdiv(G, gblk), pl.cdiv(U, tu)),
            in_specs=[
                pl.BlockSpec((gblk, D, tu), lambda g, u: (g, 0, u)),
                pl.BlockSpec((D, D), lambda g, u: (0, 0)),   # weight (out x in), resident
                pl.BlockSpec((D, 1), lambda g, u: (0, 0)),   # bias column, resident
            ],
            out_specs=pl.BlockSpec((gblk, D, tu), lambda g, u: (g, 0, u)),
        ),
        compiler_params=pltpu.CompilerParams(
            dimension_semantics=("parallel", "parallel")),
    )(x3d, w_oi, bias_col)


# --------------------------------------------------------------------------- #
# Module
# --------------------------------------------------------------------------- #
class MMSharedMidPallas:
    """JAX/Pallas port of MMSharedMid (inference semantics)."""

    def __init__(self, num_modes, feat_dim, key, approx_gelu=False):
        self.num_modes = num_modes
        self.feat_dim = feat_dim
        self.approx_gelu = approx_gelu
        k_w, k_b = jax.random.split(key)
        # nn.Linear convention: W (out, in), b (out,)
        bound = 1.0 / math.sqrt(feat_dim)
        self.weight = jax.random.uniform(
            k_w, (feat_dim, feat_dim), jnp.float32, -bound, bound)
        self.bias = jax.random.uniform(
            k_b, (feat_dim,), jnp.float32, -bound, bound)

        self.bias_col = self.bias.reshape(feat_dim, 1)     # f32, native-3D path
        self._rows_f32 = {}     # u_key (None | U)            -> (w_io f32, bias_row f32, P, Dp)
        self._rows_w = {}       # (u_key, dtype name)          -> w_io cast
        self._native_w = {}     # dtype name                   -> (out, in) weight cast

    # -- parameter packing / caching ---------------------------------------- #
    def _rows_params(self, u_key, dtype):
        if u_key not in self._rows_f32:
            if u_key is None:                           # plain rows: lane axis = D
                w_io = self.weight.T                    # (in, out)
                b = self.bias
            else:                                       # fold (D, U) into one lane axis
                # out[g, d*U+u] = sum_{d'} x[g, d'*U+u] * W[d, d']  ->  W.T (x) I_U
                w_io = jnp.kron(self.weight.T, jnp.eye(u_key, dtype=jnp.float32))
                b = jnp.repeat(self.bias, u_key)
            De = w_io.shape[0]
            # lane packing: P logical rows per 128-lane vreg row when De < 128
            P = 128 // De if (De < 128 and 128 % De == 0) else 1
            if P > 1:
                w_io = jnp.kron(jnp.eye(P, dtype=jnp.float32), w_io)   # block-diagonal
                b = jnp.tile(b, P)
            self._rows_f32[u_key] = (w_io, b.reshape(1, -1), P, w_io.shape[0])
        w_f32, b_row, P, Dp = self._rows_f32[u_key]
        ck = (u_key, jnp.dtype(dtype).name)
        if ck not in self._rows_w:
            self._rows_w[ck] = w_f32.astype(dtype)
        return self._rows_w[ck], b_row, P, Dp

    def _native_weight(self, dtype):
        key = jnp.dtype(dtype).name
        if key not in self._native_w:
            self._native_w[key] = self.weight.astype(dtype)            # (out, in)
        return self._native_w[key]

    # -- execution paths ----------------------------------------------------- #
    def _rows_path(self, x2d, u_key, precision):
        w_io, b_row, P, Dp = self._rows_params(u_key, x2d.dtype)
        rows, De = x2d.shape
        pad = (-rows) % P
        if pad:
            # rare: pad a few rows so the lane-packed (128-wide) path is always taken
            x2d = jnp.pad(x2d, ((0, pad), (0, 0)))
        xp = x2d.reshape(-1, Dp)                    # contiguous merge, metadata-only
        yp = _linear_gelu_rows(xp, w_io, b_row, precision=precision,
                               approx_gelu=self.approx_gelu)
        y2d = yp.reshape(-1, De)
        if pad:
            y2d = y2d[:rows]
        return y2d

    def __call__(self, x):
        M, D = self.num_modes, self.feat_dim
        # f32: MXU at HIGHEST precision (free under the memory bound, torch-faithful)
        precision = (jax.lax.Precision.HIGHEST
                     if x.dtype == jnp.float32 else None)
        # dropout: identity (eval)  # TODO(synk): training-mode dropout not implemented

        if x.ndim == 3:
            B, MD, U = x.shape
            G = B * M
            if U < 128 and D * U <= _KRON_MAX_LANES:
                # Fold (D, U) into one lane axis and use the Kronecker weight:
                # no host transposes, lane-dense loads/stores, same rows kernel.
                y2d = self._rows_path(x.reshape(G, D * U), U, precision)
                return y2d.reshape(x.shape)
            # Native (B*M, D, U) layout: no HBM transposes, U stays on lanes.
            x3 = x.reshape(G, D, U)
            y3 = _linear_gelu_native3d(x3, self._native_weight(x.dtype), self.bias_col,
                                       precision=precision,
                                       approx_gelu=self.approx_gelu)
            return y3.reshape(x.shape)

        # 4D input (B, M, U, D)
        shape = x.shape
        y2d = self._rows_path(x.reshape(-1, D), None, precision)
        return y2d.reshape(shape)


# --------------------------------------------------------------------------- #
# Reference & self-test
# --------------------------------------------------------------------------- #
def _reference(x, module):
    """Pure-JAX f32 reference (mirrors MMSharedMid.forward, exact GELU)."""
    M, D = module.num_modes, module.feat_dim
    if x.ndim == 3:
        B, _, U = x.shape
        x_4d = x.reshape(B, M, D, U).transpose(0, 1, 3, 2)
    else:
        x_4d = x
    xf = x_4d.astype(jnp.float32)
    y = xf @ module.weight.T + module.bias
    y = 0.5 * y * (1.0 + jax.lax.erf(y * _INV_SQRT2))
    if x.ndim == 3:
        y = y.transpose(0, 1, 3, 2).reshape(x.shape)
    return y


if __name__ == "__main__":
    key = jax.random.PRNGKey(0)
    k_param, k_param2, k_x3, k_x3b, k_x4, k_x5 = jax.random.split(key, 6)

    num_modes, feat_dim = 4, 32
    B, U_small, U_big = 2, 16, 128
    module = MMSharedMidPallas(num_modes, feat_dim, k_param)

    # 3D input, small U: transpose-free Kronecker-folded rows kernel (lane-dense)
    x3 = jax.random.normal(k_x3, (B, num_modes * feat_dim, U_small), jnp.float32)
    y3 = jax.block_until_ready(module(x3))
    assert y3.shape == x3.shape
    assert jnp.allclose(y3, _reference(x3, module), atol=1e-5, rtol=1e-5)

    # 3D input, large U: native-layout kernel (no HBM transposes, U on lanes)
    x3b = jax.random.normal(k_x3b, (B, num_modes * feat_dim, U_big), jnp.float32)
    y3b = jax.block_until_ready(module(x3b))
    assert y3b.shape == x3b.shape
    assert jnp.allclose(y3b, _reference(x3b, module), atol=1e-5, rtol=1e-5)

    # 4D input: lane-packed rows kernel
    x4 = jax.random.normal(k_x4, (B, num_modes, U_small, feat_dim), jnp.float32)
    y4 = jax.block_until_ready(module(x4))
    assert y4.shape == x4.shape
    assert jnp.allclose(y4, _reference(x4, module), atol=1e-5, rtol=1e-5)

    # bf16 I/O fast path (f32 MXU accumulation + f32 GELU inside the kernel)
    x4b = x4.astype(jnp.bfloat16)
    y4b = jax.block_until_ready(module(x4b))
    assert y4b.dtype == jnp.bfloat16 and y4b.shape == x4b.shape
    assert jnp.allclose(y4b.astype(jnp.float32), _reference(x4b, module),
                        atol=5e-2, rtol=5e-2)

    # ragged row count (rows % P != 0): pad-to-P path stays lane-dense
    module1 = MMSharedMidPallas(1, feat_dim, k_param2)
    x5 = jax.random.normal(k_x5, (1, 1, 9, feat_dim), jnp.float32)
    y5 = jax.block_until_ready(module1(x5))
    assert y5.shape == x5.shape
    assert jnp.allclose(y5, _reference(x5, module1), atol=1e-5, rtol=1e-5)

    print("KERNEL_OK")
</pallas_src>

<mosaic_0001>
module attributes {stable_mosaic.version = 11 : i64} {
  func.func @_rows_kernel(%arg0: i32, %arg1: memref<8x512xf32, #tpu.memory_space<vmem>>, %arg2: memref<512x512xf32, #tpu.memory_space<vmem>>, %arg3: memref<1x512xf32, #tpu.memory_space<vmem>>, %arg4: memref<8x512xf32, #tpu.memory_space<vmem>>) attributes {dimension_semantics = [#tpu.dimension_semantics<parallel>], iteration_bounds = array<i64: 1>, scalar_prefetch = 0 : i64, scratch_operands = 0 : i64, tpu.core_type = #tpu.core_type<tc>, window_params = [{transform_indices = @transform_0, window_bounds = array<i64: 8, 512>}, {pipeline_mode = #tpu.pipeline_mode<synchronous>, transform_indices = @transform_1, window_bounds = array<i64: 512, 512>}, {pipeline_mode = #tpu.pipeline_mode<synchronous>, transform_indices = @transform_2, window_bounds = array<i64: 1, 512>}, {transform_indices = @transform_3, window_bounds = array<i64: 8, 512>}]} {
    %c0 = arith.constant 0 : index
    %c0_0 = arith.constant 0 : index
    %0 = vector.load %arg1[%c0, %c0_0] : memref<8x512xf32, #tpu.memory_space<vmem>>, vector<8x512xf32>
    %c0_1 = arith.constant 0 : index
    %c0_2 = arith.constant 0 : index
    %1 = vector.load %arg2[%c0_1, %c0_2] : memref<512x512xf32, #tpu.memory_space<vmem>>, vector<512x512xf32>
    %cst = arith.constant dense<0.000000e+00> : vector<8x512xf32>
    %2 = tpu.matmul %0, %1, %cst {dimension_numbers = #tpu.dot_dimension_numbers<[1], [0], [0], [1], [0, 0, 1, 1], [], []>, precision = #tpu.contract_precision<fp32>} : vector<8x512xf32>, vector<512x512xf32>, vector<8x512xf32> -> vector<8x512xf32>
    %c0_3 = arith.constant 0 : index
    %c0_4 = arith.constant 0 : index
    %3 = vector.load %arg3[%c0_3, %c0_4] : memref<1x512xf32, #tpu.memory_space<vmem>>, vector<1x512xf32>
    %4 = vector.broadcast %3 : vector<1x512xf32> to vector<8x512xf32>
    %5 = arith.addf %2, %4 : vector<8x512xf32>
    %cst_5 = arith.constant 5.000000e-01 : f32
    %6 = vector.broadcast %cst_5 : f32 to vector<8x512xf32>
    %7 = arith.mulf %6, %5 : vector<8x512xf32>
    %cst_6 = arith.constant 0.707106769 : f32
    %8 = vector.broadcast %cst_6 : f32 to vector<8x512xf32>
    %9 = arith.mulf %5, %8 : vector<8x512xf32>
    %10 = math.erf %9 : vector<8x512xf32>
    %cst_7 = arith.constant 1.000000e+00 : f32
    %11 = vector.broadcast %cst_7 : f32 to vector<8x512xf32>
    %12 = arith.addf %11, %10 : vector<8x512xf32>
    %13 = arith.mulf %7, %12 : vector<8x512xf32>
    %c0_8 = arith.constant 0 : index
    %c0_9 = arith.constant 0 : index
    %14 = vector.load %arg4[%c0_8, %c0_9] : memref<8x512xf32, #tpu.memory_space<vmem>>, vector<8x512xf32>
    tpu.vector_store %arg4[%c0_8, %c0_9], %13 {strides = array<i32>} : memref<8x512xf32, #tpu.memory_space<vmem>>, vector<8x512xf32>,
    return
  }
  func.func @transform_0(%arg0: i32) -> (i32, i32) {
    %c0_i32 = arith.constant 0 : i32
    %c0_i32_0 = arith.constant 0 : i32
    return %arg0, %c0_i32 : i32, i32
  }
  func.func @transform_1(%arg0: i32) -> (i32, i32) {
    %c0_i32 = arith.constant 0 : i32
    %c0_i32_0 = arith.constant 0 : i32
    %c0_i32_1 = arith.constant 0 : i32
    return %c0_i32, %c0_i32_0 : i32, i32
  }
  func.func @transform_2(%arg0: i32) -> (i32, i32) {
    %c0_i32 = arith.constant 0 : i32
    %c0_i32_0 = arith.constant 0 : i32
    %c0_i32_1 = arith.constant 0 : i32
    return %c0_i32, %c0_i32_0 : i32, i32
  }
  func.func @transform_3(%arg0: i32) -> (i32, i32) {
    %c0_i32 = arith.constant 0 : i32
    %c0_i32_0 = arith.constant 0 : i32
    return %arg0, %c0_i32 : i32, i32
  }
}

</mosaic_0001>

<bundles_post_ra>
// kernel: tpu_custom_call.1
= control target key start
LH: loop header
LB: loop body
LE: loop exit
PB: predicated region body
PF: predicated region fallthrough
CT: control target
= control target key end

     0   :  { %8 = vsyncpa [#allocation3], 0  ;;  %s10190_s0 = inlined_call_operand.hbm [shape: f32[8,512], index: 0, kind: input, shape index: {}]   ;;  %s10191_s1 = inlined_call_operand.hbm [shape: f32[512,512], index: 1, kind: input, shape index: {}]   ;;  %s10192_s2 = inlined_call_operand.hbm [shape: f32[1,512], index: 2, kind: input, shape index: {}]   ;;  %s10193_s3 = inlined_call_operand.hbm [shape: f32[8,512], index: 3, kind: output, shape index: {}]  }
   0x1   :  { %9 = vsyncpa [#allocation6], 0  ;;  %s26_s14 = sshll.u32 %s10191_s1, 4  ;;  %s27_s14 = int_to_ptr.hbm [resolvable:$true] %s26_s14 }
   0x2   :  { %10 = vsyncpa [#allocation4], 0  ;;  %s6105_s15 = smov [#allocation5]   ;;  %s16_s19 = sshll.u32 %s10190_s0, 4  ;;  %s17_s19 = int_to_ptr.hbm [resolvable:$true] %s16_s19 }
   0x3   :  { %s28_s16 = sshll.u32 %s6105_s15, 4  ;;  %s6106_s20 = smov 512   ;;  %s29_s16 = int_to_ptr.vmem [resolvable:$true] %s28_s16 }
   0x4   :  { %s6107_s21 = smov 32   ;;  %s6108_s22 = smov [#allocation2]  }
   0x5   :  { %34 = dma.hbm_to_vmem [thread:$0]  %s27_s14, 32768, %s29_s16, [#allocation6], %s6106_s20, %s6106_s20, %s6107_s21  }
   0x6   :  { %s18_s23 = sshll.u32 %s6108_s22, 4  ;;  %s40_s26 = sshll.u32 %s10192_s2, 4  ;;  %s19_s23 = int_to_ptr.vmem [resolvable:$true] %s18_s23  ;;  %s41_s26 = int_to_ptr.hbm [resolvable:$true] %s40_s26 }
   0x7   :  { %21 = dma.hbm_to_vmem [thread:$0]  %s17_s19, 512, %s19_s23, [#allocation3]  }
   0x8   :  { %s6109_s1 = smov [#allocation7]  }
   0x9   :  { %s42_s27 = sshll.u32 %s6109_s1, 4  ;;  %s43_s27 = int_to_ptr.vmem [resolvable:$true] %s42_s27 }
   0xa   :  { %45 = dma.hbm_to_vmem [thread:$0]  %s41_s26, 64, %s43_s27, [#allocation6]  }
   0xb   :  { %6099 = dma.done.wait [#allocation3], 512  }
   0xc   :  { %6100 = vsyncadd [#allocation3], 4294966784 }
   0xd   :  { %6101 = dma.done.wait [#allocation6], 32832  }
   0xe   :  { %6102 = vsyncadd [#allocation6], 4294934464  ;;  %v122_v0 = vld [vmem:[#allocation5 + $0x1e0] sm:$0xff]  ;;  %s6110_s0 = smov [#allocation8]   ;;  %s5971_s30 = sshll.u32 %s10193_s3, 4  ;;  %s5972_s30 = int_to_ptr.hbm [resolvable:$true] %s5971_s30 }
   0xf   :  { %v118_v1 = vld [vmem:[#allocation5 + $0x1c0] sm:$0xff]  ;;  %v6140_v3 = vand.u32 4294901760, %v122_v0  ;;  %s5969_s2 = sshll.u32 %s6110_s0, 4  ;;  %s5970_s2 = int_to_ptr.vmem [resolvable:$true] %s5969_s2 }
  0x10   :  { %v114_v2 = vld [vmem:[#allocation5 + $0x1a0] sm:$0xff]  ;;  %v6142_v4 = vand.u32 4294901760, %v118_v1 }
  0x11   :  { %v6144_v5 = vand.u32 4294901760, %v114_v2  ;;  %v110_v6 = vld [vmem:[#allocation5 + $0x180] sm:$0xff]  ;;  %329 = vmatpush.msra.mxu0 %v6140_v3  ;;  %v6154_v14 = vsub.f32 %v122_v0, %v6140_v3  ;;  %525 = vmatpush.msra.mxu3 %v6140_v3 }
  0x12   :  { %v106_v7 = vld [vmem:[#allocation5 + $0x160] sm:$0xff]  ;;  %v6146_v9 = vand.u32 4294901760, %v110_v6  ;;  %v6157_v15 = vsub.f32 %v118_v1, %v6142_v4 }
  0x13   :  { %v102_v8 = vld [vmem:[#allocation5 + $0x140] sm:$0xff]  ;;  %v6148_v10 = vand.u32 4294901760, %v106_v7  ;;  %v6161_v16 = vsub.f32 %v114_v2, %v6144_v5  ;;  %331 = vmatpush.msra.mxu0 %v6142_v4  ;;  %472 = vmatpush.msra.mxu2 %v6154_v14  ;;  %v371_v22 = vand.u32 4294901760, %v6154_v14 }
  0x14   :  { %v6150_v11 = vand.u32 4294901760, %v102_v8  ;;  %v98_v12 = vld [vmem:[#allocation5 + $0x120] sm:$0xff]  ;;  %v6166_v18 = vsub.f32 %v110_v6, %v6146_v9  ;;  %v10209_v23 = vand.u32 4294901760, %v6157_v15  ;;  %527 = vmatpush.msra.mxu3 %v6142_v4 }
  0x15   :  { %v94_v13 = vld [vmem:[#allocation5 + $0x100] sm:$0xff]  ;;  %v6163_v17 = vand.u32 4294901760, %v98_v12  ;;  %v6169_v19 = vsub.f32 %v106_v7, %v6148_v10  ;;  %v10207_v24 = vand.u32 4294901760, %v6161_v16  ;;  %333 = vmatpush.msra.mxu0 %v6144_v5  ;;  %475 = vmatpush.msra.mxu2 %v6157_v15  ;;  %v372_v30 = vsub.f32 %v6154_v14, %v371_v22 }
  0x16   :  { %v6172_v20 = vsub.f32 %v102_v8, %v6150_v11  ;;  %v90_v21 = vld [vmem:[#allocation5 + $0xe0] sm:$0xff]  ;;  %v6179_v25 = vand.u32 4294901760, %v94_v13  ;;  %v10206_v27 = vand.u32 4294901760, %v6166_v18  ;;  %v378_v31 = vsub.f32 %v6157_v15, %v10209_v23  ;;  %529 = vmatpush.msra.mxu3 %v6144_v5 }
  0x17   :  { %v86_v26 = vld [vmem:[#allocation5 + $0xc0] sm:$0xff]  ;;  %v10203_v28 = vand.u32 4294901760, %v6169_v19  ;;  %v6185_v29 = vsub.f32 %v98_v12, %v6163_v17  ;;  %v384_v32 = vsub.f32 %v6161_v16, %v10207_v24  ;;  %v6198_v33 = vand.u32 4294901760, %v90_v21  ;;  %335 = vmatpush.msra.mxu0 %v6146_v9  ;;  %478 = vmatpush.msra.mxu2 %v6161_v16 }
  0x18   :  { %v6201_v34 = vand.u32 4294901760, %v86_v26  ;;  %v10201_v35 = vand.u32 4294901760, %v6172_v20  ;;  %v82_v36 = vld [vmem:[#allocation5 + $0xa0] sm:$0xff]  ;;  %v373_v37 = vand.u32 4294901760, %v372_v30  ;;  %v379_v38 = vand.u32 4294901760, %v378_v31  ;;  %531 = vmatpush.msra.mxu3 %v6146_v9 }
  0x19   :  { %v390_v39 = vsub.f32 %v6166_v18, %v10206_v27  ;;  %v6210_v40 = vsub.f32 %v94_v13, %v6179_v25  ;;  %v396_v41 = vsub.f32 %v6169_v19, %v10203_v28  ;;  %v78_v42 = vld [vmem:[#allocation5 + $0x80] sm:$0xff]  ;;  %337 = vmatpush.msra.mxu0 %v6148_v10  ;;  %v385_v43 = vand.u32 4294901760, %v384_v32  ;;  %481 = vmatpush.msra.mxu2 %v6166_v18 }
  0x1a   :  { %374 = vmatpush.msra.mxu1 %v373_v37  ;;  %v6217_v44 = vand.u32 4294901760, %v82_v36  ;;  %v10200_v45 = vand.u32 4294901760, %v6185_v29  ;;  %v6221_v46 = vsub.f32 %v90_v21, %v6198_v33  ;;  %v74_v47 = vld [vmem:[#allocation5 + $0x60] sm:$0xff]  ;;  %533 = vmatpush.msra.mxu3 %v6148_v10  ;;  %v402_v48 = vsub.f32 %v6172_v20, %v10201_v35 }
  0x1b   :  { %339 = vmatpush.msra.mxu0 %v6150_v11  ;;  %v391_v49 = vand.u32 4294901760, %v390_v39  ;;  %v6229_v50 = vand.u32 4294901760, %v78_v42  ;;  %v10199_v51 = vand.u32 4294901760, %v6210_v40  ;;  %v6233_v52 = vsub.f32 %v86_v26, %v6201_v34  ;;  %484 = vmatpush.msra.mxu2 %v6169_v19  ;;  %v70_v54 = vld [vmem:[#allocation5 + $0x40] sm:$0xff] }
  0x1c   :  { %380 = vmatpush.msra.mxu1 %v379_v38  ;;  %535 = vmatpush.msra.mxu3 %v6150_v11  ;;  %v6237_v53 = vand.u32 4294901760, %v74_v47  ;;  %v397_v55 = vand.u32 4294901760, %v396_v41  ;;  %v408_v56 = vsub.f32 %v6185_v29, %v10200_v45  ;;  %v10198_v57 = vand.u32 4294901760, %v6221_v46  ;;  %v186_v59 = vld [vmem:[#allocation5 + $0x3e0] sm:$0xff] }
  0x1d   :  { %341 = vmatpush.msra.mxu0 %v6163_v17  ;;  %v6245_v58 = vsub.f32 %v82_v36, %v6217_v44  ;;  %487 = vmatpush.msra.mxu2 %v6172_v20  ;;  %v403_v60 = vand.u32 4294901760, %v402_v48  ;;  %v66_v61 = vld [vmem:[#allocation5 + $0x20] sm:$0xff]  ;;  %v414_v62 = vsub.f32 %v6210_v40, %v10199_v51  ;;  %v6253_v63 = vand.u32 4294901760, %v70_v54 }
  0x1e   :  { %386 = vmatpush.msra.mxu1 %v385_v43  ;;  %537 = vmatpush.msra.mxu3 %v6163_v17  ;;  %v10197_v0 = vand.u32 4294901760, %v6233_v52  ;;  %v6257_v1 = vsub.f32 %v78_v42, %v6229_v50  ;;  %v62_v2 = vld [vmem:[#allocation5] sm:$0xff]  ;;  %v6262_v7 = vsub.f32 %v74_v47, %v6237_v53  ;;  %v6264_v8 = vand.u32 4294901760, %v186_v59 }
  0x1f   :  { %343 = vmatpush.msra.mxu0 %v6179_v25  ;;  %v182_v6 = vld [vmem:[#allocation5 + $0x3c0] sm:$0xff]  ;;  %490 = vmatpush.msra.mxu2 %v6185_v29  ;;  %v409_v12 = vand.u32 4294901760, %v408_v56  ;;  %v420_v13 = vsub.f32 %v6221_v46, %v10198_v57  ;;  %v6270_v21 = vand.u32 4294901760, %v66_v61  ;;  %v10195_v26 = vand.u32 4294901760, %v6245_v58 }
  0x20   :  { %392 = vmatpush.msra.mxu1 %v391_v49  ;;  %539 = vmatpush.msra.mxu3 %v6179_v25  ;;  %v6275_v30 = vand.u32 4294901760, %v62_v2  ;;  %v6277_v31 = vand.u32 4294901760, %v182_v6  ;;  %v178_v32 = vld [vmem:[#allocation5 + $0x3a0] sm:$0xff]  ;;  %v415_v36 = vand.u32 4294901760, %v414_v62  ;;  %v426_v37 = vsub.f32 %v6233_v52, %v10197_v0 }
  0x21   :  { %345 = vmatpush.msra.mxu0 %v6198_v33  ;;  %493 = vmatpush.msra.mxu2 %v6210_v40  ;;  %v10194_v38 = vand.u32 4294901760, %v6257_v1  ;;  %v6285_v39 = vsub.f32 %v70_v54, %v6253_v63  ;;  %v10196_v41 = vand.u32 4294901760, %v6262_v7  ;;  %v6291_v42 = vsub.f32 %v186_v59, %v6264_v8  ;;  %v174_v43 = vld [vmem:[#allocation5 + $0x380] sm:$0xff] }
  0x22   :  { %398 = vmatpush.msra.mxu1 %v397_v55  ;;  %541 = vmatpush.msra.mxu3 %v6198_v33  ;;  %10394 = vst [vmem:[#allocation12_spill] sm:$0xff] %v6275_v30  ;;  %v421_v47 = vand.u32 4294901760, %v420_v13  ;;  %v432_v48 = vsub.f32 %v6245_v58, %v10195_v26  ;;  %v6298_v49 = vsub.f32 %v66_v61, %v6270_v21  ;;  %v6300_v54 = vand.u32 4294901760, %v178_v32  ;;  %v170_v59 = vld [vmem:[#allocation5 + $0x360] sm:$0xff] }
  0x23   :  { %347 = vmatpush.msra.mxu0 %v6201_v34  ;;  %496 = vmatpush.msra.mxu2 %v6221_v46  ;;  %v6305_v55 = vsub.f32 %v62_v2, %v6275_v30  ;;  %v6308_v56 = vsub.f32 %v182_v6, %v6277_v31  ;;  %v438_v61 = vsub.f32 %v6257_v1, %v10194_v38  ;;  %v10202_v62 = vand.u32 4294901760, %v6285_v39  ;;  %v166_v13 = vld [vmem:[#allocation5 + $0x340] sm:$0xff] }
  0x24   :  { %404 = vmatpush.msra.mxu1 %v403_v60  ;;  %543 = vmatpush.msra.mxu3 %v6201_v34  ;;  %v427_v60 = vand.u32 4294901760, %v426_v37  ;;  %v444_v2 = vsub.f32 %v6262_v7, %v10196_v41  ;;  %v10204_v6 = vand.u32 4294901760, %v6291_v42  ;;  %v10205_v37 = vand.u32 4294901760, %v6298_v49  ;;  %v162_v57 = vld [vmem:[#allocation5 + $0x320] sm:$0xff] }
  0x25   :  { %349 = vmatpush.msra.mxu0 %v6217_v44  ;;  %499 = vmatpush.msra.mxu2 %v6233_v52  ;;  %v6326_v38 = vsub.f32 %v178_v32, %v6300_v54  ;;  %v6328_v26 = vand.u32 4294901760, %v170_v59  ;;  %v10210_v41 = vand.u32 4294901760, %v6305_v55  ;;  %v10208_v0 = vand.u32 4294901760, %v6308_v56  ;;  %v158_v45 = vld [vmem:[#allocation5 + $0x300] sm:$0xff] }
  0x26   :  { %410 = vmatpush.msra.mxu1 %v409_v12  ;;  %545 = vmatpush.msra.mxu3 %v6217_v44  ;;  %v6315_v12 = vand.u32 4294901760, %v174_v43  ;;  %v450_v32 = vsub.f32 %v6285_v39, %v10202_v62  ;;  %v6341_v51 = vand.u32 4294901760, %v166_v13  ;;  %v445_v35 = vand.u32 4294901760, %v444_v2  ;;  %v154_v2 = vld [vmem:[#allocation5 + $0x2e0] sm:$0xff] }
  0x27   :  { %351 = vmatpush.msra.mxu0 %v6229_v50  ;;  %502 = vmatpush.msra.mxu2 %v6245_v58  ;;  %v6354_v62 = vsub.f32 %v170_v59, %v6328_v26  ;;  %v6356_v28 = vand.u32 4294901760, %v162_v57  ;;  %v462_v59 = vsub.f32 %v6305_v55, %v10210_v41  ;;  %v6376_v23 = vand.u32 4294901760, %v154_v2 }
  0x28   :  { %416 = vmatpush.msra.mxu1 %v415_v36  ;;  %547 = vmatpush.msra.mxu3 %v6229_v50  ;;  %v433_v36 = vand.u32 4294901760, %v432_v48  ;;  %v6339_v48 = vsub.f32 %v174_v43, %v6315_v12  ;;  %v456_v43 = vsub.f32 %v6298_v49, %v10205_v37  ;;  %v451_v37 = vand.u32 4294901760, %v450_v32 }
  0x29   :  { %353 = vmatpush.msra.mxu0 %v6237_v53  ;;  %505 = vmatpush.msra.mxu2 %v6257_v1  ;;  %v6371_v24 = vsub.f32 %v166_v13, %v6341_v51  ;;  %v10395_v32 = vand.u32 4294901760, %v6326_v38  ;;  %v6384_v27 = vsub.f32 %v162_v57, %v6356_v28  ;;  %v10396_v14 = vand.u32 4294901760, %v6157_v15 }
  0x2a   :  { %422 = vmatpush.msra.mxu1 %v421_v47  ;;  %549 = vmatpush.msra.mxu3 %v6237_v53  ;;  %v439_v47 = vand.u32 4294901760, %v438_v61  ;;  %v150_v61 = vld [vmem:[#allocation5 + $0x2c0] sm:$0xff]  ;;  %v10398_v15 = vand.u32 4294901760, %v6161_v16  ;;  %v10400_v16 = vand.u32 4294901760, %v6166_v18  ;;  %v10402_v18 = vand.u32 4294901760, %v6169_v19 }
  0x2b   :  { %355 = vmatpush.msra.mxu0 %v6253_v63  ;;  %508 = vmatpush.msra.mxu2 %v6262_v7  ;;  %v725_v41 = vsub.f32 %v6326_v38, %v10395_v32  ;;  %v10397_v32 = vand.u32 4294901760, %v6339_v48  ;;  %v10404_v19 = vand.u32 4294901760, %v6172_v20  ;;  %v10407_v20 = vand.u32 4294901760, %v6185_v29 }
  0x2c   :  { %428 = vmatpush.msra.mxu1 %v427_v60  ;;  %551 = vmatpush.msra.mxu3 %v6253_v63  ;;  %v713_v60 = vsub.f32 %v6291_v42, %v10204_v6  ;;  %v6363_v6 = vand.u32 4294901760, %v158_v45  ;;  %v10409_v29 = vand.u32 4294901760, %v6210_v40  ;;  %v10412_v40 = vand.u32 4294901760, %v6221_v46 }
  0x2d   :  { %357 = vmatpush.msra.mxu0 %v6270_v21  ;;  %511 = vmatpush.msra.mxu2 %v6285_v39  ;;  %v731_v13 = vsub.f32 %v6339_v48, %v10397_v32  ;;  %v10414_v46 = vand.u32 4294901760, %v6233_v52 }
  0x2e   :  { %434 = vmatpush.msra.mxu1 %v433_v36  ;;  %553 = vmatpush.msra.mxu3 %v6270_v21  ;;  %v719_v36 = vsub.f32 %v6308_v56, %v10208_v0  ;;  %v714_v0 = vand.u32 4294901760, %v713_v60  ;;  %v146_v60 = vld [vmem:[#allocation5 + $0x2a0] sm:$0xff] }
  0x2f   :  { %359 = vmatpush.msra.mxu0 %v6275_v30  ;;  %514 = vmatpush.msra.mxu2 %v6298_v49  ;;  %v6409_v57 = vand.u32 4294901760, %v146_v60 }
  0x30   :  { %440 = vmatpush.msra.mxu1 %v439_v47  ;;  %v457_v47 = vand.u32 4294901760, %v456_v43  ;;  %555 = vmatpush.msra.mxu3 %v6275_v30  ;;  %v463_v43 = vand.u32 4294901760, %v462_v59  ;;  %v6397_v30 = vand.u32 4294901760, %v150_v61  ;;  %v10399_v59 = vand.u32 4294901760, %v6354_v62 }
  0x31   :  { %566 = vmatpush.msrb.mxu0 %v371_v22  ;;  %517 = vmatpush.msra.mxu2 %v6305_v55  ;;  %v720_v22 = vand.u32 4294901760, %v719_v36  ;;  %v142_v36 = vld [vmem:[#allocation5 + $0x280] sm:$0xff] }
  0x32   :  { %446 = vmatpush.msra.mxu1 %v445_v35  ;;  %v6390_v35 = vsub.f32 %v158_v45, %v6363_v6  ;;  %715 = vmatpush.msrb.mxu3 %v714_v0  ;;  %v6402_v45 = vsub.f32 %v154_v2, %v6376_v23  ;;  %v138_v2 = vld [vmem:[#allocation5 + $0x260] sm:$0xff]  ;;  %v6421_v32 = vand.u32 4294901760, %v142_v36 }
  0x33   :  { %570 = vmatpush.msrb.mxu0 %v10396_v14  ;;  %670 = vmatpush.msrb.mxu2 %v6264_v8  ;;  %v737_v14 = vsub.f32 %v6354_v62, %v10399_v59  ;;  %v6419_v59 = vsub.f32 %v150_v61, %v6397_v30  ;;  %v6432_v61 = vsub.f32 %v146_v60, %v6409_v57  ;;  %v6434_v0 = vand.u32 4294901760, %v138_v2 }
  0x34   :  { %452 = vmatpush.msra.mxu1 %v451_v37  ;;  %v726_v37 = vand.u32 4294901760, %v725_v41  ;;  %721 = vmatpush.msrb.mxu3 %v720_v22  ;;  %v10401_v41 = vand.u32 4294901760, %v6371_v24  ;;  %v6445_v60 = vsub.f32 %v142_v36, %v6421_v32 }
  0x35   :  { %574 = vmatpush.msrb.mxu0 %v10398_v15  ;;  %672 = vmatpush.msrb.mxu2 %v6277_v31 }
  0x36   :  { %458 = vmatpush.msra.mxu1 %v457_v47  ;;  %v732_v47 = vand.u32 4294901760, %v731_v13  ;;  %v743_v15 = vsub.f32 %v6371_v24, %v10401_v41  ;;  %727 = vmatpush.msrb.mxu3 %v726_v37  ;;  %v738_v13 = vand.u32 4294901760, %v737_v14  ;;  %v134_v37 = vld [vmem:[#allocation5 + $0x240] sm:$0xff] }
  0x37   :  { %578 = vmatpush.msrb.mxu0 %v10400_v16  ;;  %674 = vmatpush.msrb.mxu2 %v6300_v54  ;;  %v10403_v16 = vand.u32 4294901760, %v6384_v27  ;;  %v6457_v36 = vand.u32 4294901760, %v134_v37 }
  0x38   :  { %464 = vmatpush.msra.mxu1 %v463_v43  ;;  %v58_v43 = vld [vmem:[#allocation2] sm:$0xff]  ;;  %733 = vmatpush.msrb.mxu3 %v732_v47  ;;  %v744_v14 = vand.u32 4294901760, %v743_v15 }
  0x39   :  { %582 = vmatpush.msrb.mxu0 %v10402_v18  ;;  %676 = vmatpush.msrb.mxu2 %v6315_v12  ;;  %v749_v41 = vsub.f32 %v6384_v27, %v10403_v16  ;;  %v6447_v22 = vand.u32 4294901760, %v58_v43  ;;  %v6460_v16 = vsub.f32 %v138_v2, %v6434_v0 }
  0x3a   :  { %633 = vmatpush.msrb.mxu1 %v6140_v3  ;;  %v10405_v3 = vand.u32 4294901760, %v6390_v35  ;;  %739 = vmatpush.msrb.mxu3 %v738_v13  ;;  %v10410_v13 = vand.u32 4294901760, %v6419_v59 }
  0x3b   :  { %586 = vmatpush.msrb.mxu0 %v10404_v19  ;;  %678 = vmatpush.msrb.mxu2 %v6328_v26  ;;  %10406 = vst [vmem:[#allocation13_spill] sm:$0xff] %v6447_v22  ;;  %v750_v47 = vand.u32 4294901760, %v749_v41  ;;  %v6471_v15 = vsub.f32 %v58_v43, %v6447_v22  ;;  %v6484_v43 = vsub.f32 %v134_v37, %v6457_v36 }
  0x3c   :  { %635 = vmatpush.msrb.mxu1 %v6142_v4  ;;  %v755_v18 = vsub.f32 %v6390_v35, %v10405_v3  ;;  %v10408_v4 = vand.u32 4294901760, %v6402_v45  ;;  %v130_v3 = vld [vmem:[#allocation5 + $0x220] sm:$0xff]  ;;  %745 = vmatpush.msrb.mxu3 %v744_v14  ;;  %v767_v41 = vsub.f32 %v6419_v59, %v10410_v13 }
  0x3d   :  { %590 = vmatpush.msrb.mxu0 %v10407_v20  ;;  %680 = vmatpush.msrb.mxu2 %v6341_v51  ;;  %v126_v20 = vld [vmem:[#allocation5 + $0x200] sm:$0xff]  ;;  %10411 = vst [vmem:[#allocation14_spill] sm:$0xff] %v6471_v15  ;;  %v6473_v2 = vand.u32 4294901760, %v130_v3 }
  0x3e   :  { %637 = vmatpush.msrb.mxu1 %v6144_v5  ;;  %v761_v19 = vsub.f32 %v6402_v45, %v10408_v4  ;;  %v756_v5 = vand.u32 4294901760, %v755_v18  ;;  %v778_v4 = vand.u32 4294901760, %v6445_v60  ;;  %751 = vmatpush.msrb.mxu3 %v750_v47  ;;  %v10413_v18 = vand.u32 4294901760, %v6432_v61 }
  0x3f   :  { %594 = vmatpush.msrb.mxu0 %v10409_v29  ;;  %682 = vmatpush.msrb.mxu2 %v6356_v28  ;;  %v784_v29 = vand.u32 4294901760, %v6460_v16  ;;  %v6486_v13 = vand.u32 4294901760, %v126_v20  ;;  %v6496_v47 = vand.u32 4294901760, %v6471_v15  ;;  %v6499_v37 = vsub.f32 %v130_v3, %v6473_v2 }
  0x40   :  { %639 = vmatpush.msrb.mxu1 %v6146_v9  ;;  %v762_v9 = vand.u32 4294901760, %v761_v19  ;;  %v773_v14 = vsub.f32 %v6432_v61, %v10413_v18  ;;  %757 = vmatpush.msrb.mxu3 %v756_v5  ;;  %v779_v19 = vsub.f32 %v6445_v60, %v778_v4  ;;  %v790_v5 = vand.u32 4294901760, %v6484_v43 }
  0x41   :  { %598 = vmatpush.msrb.mxu0 %v10412_v40  ;;  %684 = vmatpush.msrb.mxu2 %v6363_v6  ;;  %10415 = vst [vmem:[#allocation15_spill] sm:$0xff] %v6496_v47  ;;  %v10416_v40 = vand.u32 4294901760, %v6245_v58  ;;  %v785_v52 = vsub.f32 %v6460_v16, %v784_v29  ;;  %v10417_v3 = vand.u32 4294901760, %v6257_v1  ;;  %v59_v58 = vld [vmem:[#allocation2 + $0x8] sm:$0xff]  ;;  %v796_v18 = vand.u32 4294901760, %v6499_v37 }
  0x42   :  { %641 = vmatpush.msrb.mxu1 %v6148_v10  ;;  %v768_v10 = vand.u32 4294901760, %v767_v41  ;;  %763 = vmatpush.msrb.mxu3 %v762_v9  ;;  %v6510_v41 = vsub.f32 %v126_v20, %v6486_v13  ;;  %v363_v9 = vsub.f32 %v6471_v15, %v6496_v47 }
  0x43   :  { %602 = vmatpush.msrb.mxu0 %v10414_v46  ;;  %686 = vmatpush.msrb.mxu2 %v6376_v23  ;;  %v786_v1 = vand.u32 4294901760, %v785_v52  ;;  %v6527_v46 = vand.u32 4294901760, %v59_v58 }
  0x44   :  { %643 = vmatpush.msrb.mxu1 %v6150_v11  ;;  %v774_v11 = vand.u32 4294901760, %v773_v14  ;;  %769 = vmatpush.msrb.mxu3 %v768_v10  ;;  %v10418_v14 = vand.u32 4294901760, %v6262_v7  ;;  %v802_v20 = vand.u32 4294901760, %v6510_v41  ;;  %v10420_v10 = vand.u32 4294901760, %v6285_v39 }
  0x45   :  { %606 = vmatpush.msrb.mxu0 %v10416_v40  ;;  %688 = vmatpush.msrb.mxu2 %v6397_v30  ;;  %10419 = vst [vmem:[#allocation16_spill] sm:$0xff] %v6527_v46  ;;  %v797_v7 = vsub.f32 %v6499_v37, %v796_v18  ;;  %v6546_v40 = vsub.f32 %v59_v58, %v6527_v46 }
  0x46   :  { %645 = vmatpush.msrb.mxu1 %v6163_v17  ;;  %v780_v17 = vand.u32 4294901760, %v779_v19  ;;  %775 = vmatpush.msrb.mxu3 %v774_v11  ;;  %v10422_v19 = vand.u32 4294901760, %v6298_v49  ;;  %v10424_v11 = vand.u32 4294901760, %v6305_v55  ;;  %v10428_v55 = vld [vmem:[#allocation12_spill] sm:$0xff] }
  0x47   :  { %610 = vmatpush.msrb.mxu0 %v10417_v3  ;;  %690 = vmatpush.msrb.mxu2 %v6409_v57  ;;  %10423 = vst [vmem:[#allocation18_spill] sm:$0xff] %v6546_v40  ;;  %v6557_v52 = vand.u32 4294901760, %v6546_v40 }
  0x48   :  { %647 = vmatpush.msrb.mxu1 %v6179_v25  ;;  %v791_v25 = vsub.f32 %v6484_v43, %v790_v5  ;;  %781 = vmatpush.msrb.mxu3 %v780_v17  ;;  %v218_v17 = vld [vmem:[#allocation5 + $0x4e0] sm:$0xff] }
  0x49   :  { %614 = vmatpush.msrb.mxu0 %v10418_v14  ;;  %692 = vmatpush.msrb.mxu2 %v6421_v32  ;;  %10425 = vst [vmem:[#allocation19_spill] sm:$0xff] %v6557_v52 }
  0x4a   :  { %649 = vmatpush.msrb.mxu1 %v6198_v33  ;;  %v6533_v33 = vand.u32 4294901760, %v363_v9  ;;  %787 = vmatpush.msrb.mxu3 %v786_v1  ;;  %v792_v39 = vand.u32 4294901760, %v791_v25  ;;  %v214_v1 = vld [vmem:[#allocation5 + $0x4c0] sm:$0xff] }
  0x4b   :  { %618 = vmatpush.msrb.mxu0 %v10420_v10  ;;  %694 = vmatpush.msrb.mxu2 %v6434_v0  ;;  %v6707_v10 = vand.u32 4294901760, %v218_v17 }
  0x4c   :  { %651 = vmatpush.msrb.mxu1 %v6201_v34  ;;  %10421 = vst [vmem:[#allocation17_spill] sm:$0xff] %v6533_v33  ;;  %v803_v34 = vsub.f32 %v6510_v41, %v802_v20  ;;  %365 = vmatmul.f32.vlgmr.msra.gmra.mxu0 %v6533_v33  ;;  %v270_v33 = vld [vmem:[#allocation5 + $0x680] sm:$0xff] }
  0x4d   :  { %622 = vmatpush.msrb.mxu0 %v10422_v19  ;;  %696 = vmatpush.msrb.mxu2 %v6457_v36  ;;  %v210_v19 = vld [vmem:[#allocation5 + $0x4a0] sm:$0xff] }
  0x4e   :  { %653 = vmatpush.msrb.mxu1 %v6217_v44  ;;  %v798_v44 = vand.u32 4294901760, %v797_v7  ;;  %793 = vmatpush.msrb.mxu3 %v792_v39  ;;  %v804_v49 = vand.u32 4294901760, %v803_v34 }
  0x4f   :  { %626 = vmatpush.msrb.mxu0 %v10424_v11  ;;  %698 = vmatpush.msrb.mxu2 %v6473_v2  ;;  %v6720_v11 = vand.u32 4294901760, %v214_v1 }
  0x50   :  { %655 = vmatpush.msrb.mxu1 %v6229_v50  ;;  %799 = vmatpush.msrb.mxu3 %v798_v44  ;;  %v10426_v50 = vand.u32 4294901760, %v6291_v42 }
  0x51   :  { %813 = vmatpush.msra.mxu0 %v6291_v42  ;;  %700 = vmatpush.msrb.mxu2 %v6486_v13 }
  0x52   :  { %657 = vmatpush.msrb.mxu1 %v6237_v53  ;;  %520 = vmatmul.f32.vlgmr.msra.gmra.mxu2 %v6471_v15  ;;  %v704_v53 = vsub.f32 %v6546_v40, %v6557_v52 }
  0x53   :  { %816 = vmatpush.msra.mxu0 %v6308_v56  ;;  %907 = vmatpush.msra.mxu2 %v10426_v50 }
  0x54   :  { %659 = vmatpush.msrb.mxu1 %v6253_v63  ;;  %805 = vmatpush.msrb.mxu3 %v804_v49  ;;  %v10427_v63 = vand.u32 4294901760, %v6308_v56  ;;  %v6578_v42 = vand.u32 4294901760, %v704_v53  ;;  %v10431_v56 = vand.u32 4294901760, %v6339_v48  ;;  %v206_v49 = vld [vmem:[#allocation5 + $0x480] sm:$0xff]  ;;  %v6731_v53 = vand.u32 4294901760, %v210_v19 }
  0x55   :  { %819 = vmatpush.msra.mxu0 %v6326_v38  ;;  %559 = vmatmul.f32.vlgmr.msra.gmra.mxu3 %v6496_v47  ;;  %v278_v47 = vld [vmem:[#allocation5 + $0x6c0] sm:$0xff] }
  0x56   :  { %661 = vmatpush.msrb.mxu1 %v6270_v21  ;;  %911 = vmatpush.msra.mxu2 %v10427_v63  ;;  %v10429_v21 = vand.u32 4294901760, %v6326_v38  ;;  %10430 = vst [vmem:[#allocation12_spill] sm:$0xff] %v6578_v42  ;;  %v10432_v38 = vand.u32 4294901760, %v6354_v62 }
  0x57   :  { %822 = vmatpush.msra.mxu0 %v6339_v48  ;;  %974 = vmatpush.msra.mxu3 %v6264_v8 }
  0x58   :  { %663 = vmatpush.msrb.mxu1 %v10428_v55  ;;  %915 = vmatpush.msra.mxu2 %v10429_v21  ;;  %v6735_v55 = vsub.f32 %v218_v17, %v6707_v10  ;;  %v60_v21 = vld [vmem:[#allocation2 + $0x10] sm:$0xff] }
  0x59   :  { %825 = vmatpush.msra.mxu0 %v6354_v62  ;;  %466 = vmatmul.f32.vlgmr.msra.gmra.mxu1 %v6447_v22 }
  0x5a   :  { %866 = vmatpush.msra.mxu1 %v6264_v8  ;;  %976 = vmatpush.msra.mxu3 %v6277_v31  ;;  %v10433_v8 = vand.u32 4294901760, %v6371_v24 }
  0x5b   :  { %828 = vmatpush.msra.mxu0 %v6371_v24  ;;  %919 = vmatpush.msra.mxu2 %v10431_v56  ;;  %v10435_v24 = vand.u32 4294901760, %v6390_v35 }
  0x5c   :  { %868 = vmatpush.msra.mxu1 %v6277_v31  ;;  %978 = vmatpush.msra.mxu3 %v6300_v54  ;;  %v10434_v31 = vand.u32 4294901760, %v6384_v27 }
  0x5d   :  { %706 = vmatmul.f32.vlgmr.msrb.gmra.mxu2 %v6578_v42  ;;  %831 = vmatpush.msra.mxu0 %v6384_v27  ;;  %v246_v27 = vld [vmem:[#allocation5 + $0x5c0] sm:$0xff] }
  0x5e   :  { %870 = vmatpush.msra.mxu1 %v6300_v54  ;;  %923 = vmatpush.msra.mxu2 %v10432_v38  ;;  %v250_v54 = vld [vmem:[#allocation5 + $0x5e0] sm:$0xff]  ;;  %v6628_v48 = vand.u32 4294901760, %v246_v27 }
  0x5f   :  { %980 = vmatpush.msra.mxu3 %v6315_v12  ;;  %628 = vmatmul.f32.vlgmr.msrb.gmra.mxu0 %v6447_v22  ;;  %v6621_v62 = vand.u32 4294901760, %v250_v54  ;;  %v202_v38 = vld [vmem:[#allocation5 + $0x460] sm:$0xff] }
  0x60   :  { %807 = vmatmul.f32.vlgmr.msrb.gmra.mxu3 %v6527_v46  ;;  %834 = vmatpush.msra.mxu0 %v6390_v35 }
  0x61   :  { %872 = vmatpush.msra.mxu1 %v6315_v12  ;;  %927 = vmatpush.msra.mxu2 %v10433_v8  ;;  %v10438_v12 = vand.u32 4294901760, %v6432_v61 }
  0x62   :  { %982 = vmatpush.msra.mxu3 %v6328_v26  ;;  %665 = vmatmul.f32.vlgmr.msrb.gmra.mxu1 %v6447_v22  ;;  %v282_v22 = vld [vmem:[#allocation5 + $0x6e0] sm:$0xff] }
  0x63   :  { %837 = vmatpush.msra.mxu0 %v6402_v45  ;;  %874 = vmatpush.msra.mxu1 %v6328_v26  ;;  %v10436_v26 = vand.u32 4294901760, %v6402_v45  ;;  %v234_v45 = vld [vmem:[#allocation5 + $0x560] sm:$0xff]  ;;  %v6919_v15 = vand.u32 4294901760, %v282_v22 }
  0x64   :  { %931 = vmatpush.msra.mxu2 %v10434_v31  ;;  %984 = vmatpush.msra.mxu3 %v6341_v51  ;;  %v6743_v31 = vand.u32 4294901760, %v206_v49 }
  0x65   :  { %840 = vmatpush.msra.mxu0 %v6419_v59  ;;  %876 = vmatpush.msra.mxu1 %v6341_v51  ;;  %v10437_v51 = vand.u32 4294901760, %v6419_v59  ;;  %v6648_v59 = vsub.f32 %v246_v27, %v6628_v48  ;;  %v198_v27 = vld [vmem:[#allocation5 + $0x440] sm:$0xff] }
  0x66   :  { %935 = vmatpush.msra.mxu2 %v10435_v24  ;;  %986 = vmatpush.msra.mxu3 %v6356_v28  ;;  %v6773_v17 = vsub.f32 %v206_v49, %v6743_v31  ;;  %v190_v49 = vld [vmem:[#allocation5 + $0x400] sm:$0xff] }
  0x67   :  { %843 = vmatpush.msra.mxu0 %v6432_v61  ;;  %878 = vmatpush.msra.mxu1 %v6356_v28  ;;  %v242_v28 = vld [vmem:[#allocation5 + $0x5a0] sm:$0xff] }
  0x68   :  { %939 = vmatpush.msra.mxu2 %v10436_v26  ;;  %988 = vmatpush.msra.mxu3 %v6363_v6  ;;  %v6635_v35 = vand.u32 4294901760, %v242_v28  ;;  %v230_v61 = vld [vmem:[#allocation5 + $0x540] sm:$0xff] }
  0x69   :  { %846 = vmatpush.msra.mxu0 %v6445_v60  ;;  %880 = vmatpush.msra.mxu1 %v6363_v6  ;;  %v238_v6 = vld [vmem:[#allocation5 + $0x580] sm:$0xff]  ;;  %v6652_v60 = vand.u32 4294901760, %v234_v45 }
  0x6a   :  { %943 = vmatpush.msra.mxu2 %v10437_v51  ;;  %990 = vmatpush.msra.mxu3 %v6376_v23  ;;  %v6751_v51 = vand.u32 4294901760, %v60_v21 }
  0x6b   :  { %849 = vmatpush.msra.mxu0 %v6460_v16  ;;  %882 = vmatpush.msra.mxu1 %v6376_v23  ;;  %v6638_v23 = vsub.f32 %v250_v54, %v6621_v62  ;;  %v6659_v16 = vsub.f32 %v242_v28, %v6635_v35  ;;  %v6747_v54 = vsub.f32 %v214_v1, %v6720_v11 }
  0x6c   :  { %947 = vmatpush.msra.mxu2 %v10438_v12  ;;  %992 = vmatpush.msra.mxu3 %v6397_v30  ;;  %10439 = vst [vmem:[#allocation20_spill] sm:$0xff] %v6751_v51  ;;  %v6757_v12 = vand.u32 4294901760, %v202_v38  ;;  %v6778_v1 = vsub.f32 %v60_v21, %v6751_v51 }
  0x6d   :  { %852 = vmatpush.msra.mxu0 %v6484_v43  ;;  %884 = vmatpush.msra.mxu1 %v6397_v30  ;;  %v6645_v30 = vand.u32 4294901760, %v238_v6  ;;  %v10221_v58 = vand.u32 4294901760, %v6659_v16 }
  0x6e   :  { %951 = vmatpush.msra.mxu2 %v778_v4  ;;  %994 = vmatpush.msra.mxu3 %v6409_v57  ;;  %v6663_v4 = vand.u32 4294901760, %v230_v61  ;;  %10440 = vst [vmem:[#allocation21_spill] sm:$0xff] %v6778_v1 }
  0x6f   :  { %855 = vmatpush.msra.mxu0 %v6499_v37  ;;  %886 = vmatpush.msra.mxu1 %v6409_v57  ;;  %v10224_v57 = vand.u32 4294901760, %v6638_v23  ;;  %v6670_v43 = vsub.f32 %v238_v6, %v6645_v30  ;;  %v10213_v6 = vand.u32 4294901760, %v6735_v55 }
  0x70   :  { %955 = vmatpush.msra.mxu2 %v784_v29  ;;  %996 = vmatpush.msra.mxu3 %v6421_v32  ;;  %v226_v29 = vld [vmem:[#allocation5 + $0x520] sm:$0xff] }
  0x71   :  { %858 = vmatpush.msra.mxu0 %v6510_v41  ;;  %888 = vmatpush.msra.mxu1 %v6421_v32  ;;  %v10223_v32 = vand.u32 4294901760, %v6648_v59  ;;  %v1054_v37 = vsub.f32 %v6638_v23, %v10224_v57  ;;  %v6683_v3 = vand.u32 4294901760, %v226_v29 }
  0x72   :  { %959 = vmatpush.msra.mxu2 %v790_v5  ;;  %998 = vmatpush.msra.mxu3 %v6434_v0  ;;  %v6675_v5 = vsub.f32 %v234_v45, %v6652_v60  ;;  %v6761_v45 = vsub.f32 %v210_v19, %v6731_v53 }
  0x73   :  { %861 = vmatmul.f32.vlgmr.msra.gmra.mxu0 %v6546_v40  ;;  %890 = vmatpush.msra.mxu1 %v6434_v0  ;;  %v222_v0 = vld [vmem:[#allocation5 + $0x500] sm:$0xff]  ;;  %v1060_v41 = vsub.f32 %v6648_v59, %v10223_v32  ;;  %v1055_v25 = vand.u32 4294901760, %v1054_v37  ;;  %v6710_v7 = vsub.f32 %v226_v29, %v6683_v3  ;;  %v10212_v37 = vand.u32 4294901760, %v6747_v54 }
  0x74   :  { %1011 = vmatpush.msrb.mxu0 %v6621_v62  ;;  %963 = vmatpush.msra.mxu2 %v796_v18  ;;  %v6696_v9 = vand.u32 4294901760, %v222_v0  ;;  %v10220_v18 = vand.u32 4294901760, %v6670_v43  ;;  %v10219_v14 = vand.u32 4294901760, %v6675_v5  ;;  %v10215_v19 = vand.u32 4294901760, %v6761_v45 }
  0x75   :  { %1000 = vmatpush.msra.mxu3 %v6457_v36  ;;  %892 = vmatpush.msra.mxu1 %v6457_v36  ;;  %v6689_v36 = vsub.f32 %v230_v61, %v6663_v4  ;;  %v1061_v39 = vand.u32 4294901760, %v1060_v41  ;;  %v10216_v63 = vand.u32 4294901760, %v6710_v7  ;;  %v194_v41 = vld [vmem:[#allocation5 + $0x420] sm:$0xff]  ;;  %v1108_v21 = vsub.f32 %v6747_v54, %v10212_v37 }
  0x76   :  { %1013 = vmatpush.msrb.mxu0 %v6628_v48  ;;  %967 = vmatpush.msra.mxu2 %v802_v20  ;;  %v1066_v20 = vsub.f32 %v6659_v16, %v10221_v58  ;;  %v1072_v34 = vsub.f32 %v6670_v43, %v10220_v18  ;;  %v6723_v44 = vsub.f32 %v222_v0, %v6696_v9  ;;  %v6769_v0 = vand.u32 4294901760, %v198_v27  ;;  %v298_v58 = vld [vmem:[#allocation5 + $0x760] sm:$0xff] }
  0x77   :  { %1002 = vmatpush.msra.mxu3 %v6473_v2  ;;  %969 = vmatmul.f32.vlgmr.msra.gmra.mxu2 %v6527_v46  ;;  %v1090_v28 = vsub.f32 %v6710_v7, %v10216_v63 }
  0x78   :  { %1015 = vmatpush.msrb.mxu0 %v6635_v35  ;;  %1154 = vmatpush.msrb.mxu2 %v6638_v23  ;;  %v1067_v50 = vand.u32 4294901760, %v1066_v20  ;;  %v1073_v8 = vand.u32 4294901760, %v1072_v34  ;;  %v10214_v24 = vand.u32 4294901760, %v6723_v44  ;;  %v1102_v20 = vsub.f32 %v6735_v55, %v10213_v6  ;;  %v314_v34 = vld [vmem:[#allocation5 + $0x7e0] sm:$0xff] }
  0x79   :  { %894 = vmatpush.msra.mxu1 %v6473_v2  ;;  %1004 = vmatpush.msra.mxu3 %v6486_v13  ;;  %v10217_v2 = vand.u32 4294901760, %v6689_v36 }
  0x7a   :  { %1006 = vmatmul.f32.vlgmr.msra.gmra.mxu3 %v6527_v46  ;;  %1017 = vmatpush.msrb.mxu0 %v6645_v30  ;;  %v1096_v29 = vsub.f32 %v6723_v44, %v10214_v24  ;;  %v306_v24 = vld [vmem:[#allocation5 + $0x7a0] sm:$0xff] }
  0x7b   :  { %1157 = vmatpush.msrb.mxu2 %v6648_v59  ;;  %1207 = vmatpush.msrb.mxu3 %v6621_v62  ;;  %v1084_v56 = vsub.f32 %v6689_v36, %v10217_v2  ;;  %v302_v2 = vld [vmem:[#allocation5 + $0x780] sm:$0xff]  ;;  %v6840_v18 = vand.u32 4294901760, %v306_v24 }
  0x7c   :  { %896 = vmatpush.msra.mxu1 %v6486_v13  ;;  %1019 = vmatpush.msrb.mxu0 %v6652_v60  ;;  %v1078_v13 = vsub.f32 %v6675_v5, %v10219_v14  ;;  %v286_v46 = vld [vmem:[#allocation5 + $0x700] sm:$0xff] }
  0x7d   :  { %900 = vmatmul.f32.vlgmr.msra.gmra.mxu1 %v6557_v52  ;;  %1160 = vmatpush.msrb.mxu2 %v6659_v16  ;;  %v1085_v61 = vand.u32 4294901760, %v1084_v56  ;;  %v10218_v56 = vand.u32 4294901760, %v6773_v17 }
  0x7e   :  { %1056 = vmatpush.msrb.mxu1 %v1055_v25  ;;  %1209 = vmatpush.msrb.mxu3 %v6628_v48  ;;  %v1079_v26 = vand.u32 4294901760, %v1078_v13  ;;  %v1091_v25 = vand.u32 4294901760, %v1090_v28  ;;  %v6790_v13 = vand.u32 4294901760, %v194_v41  ;;  %v310_v28 = vld [vmem:[#allocation5 + $0x7c0] sm:$0xff] }
  0x7f   :  { %1021 = vmatpush.msrb.mxu0 %v6663_v4  ;;  %1163 = vmatpush.msrb.mxu2 %v6670_v43  ;;  %v6824_v63 = vand.u32 4294901760, %v310_v28 }
  0x80   :  { %1062 = vmatpush.msrb.mxu1 %v1061_v39  ;;  %1211 = vmatpush.msrb.mxu3 %v6635_v35  ;;  %v6786_v39 = vsub.f32 %v202_v38, %v6757_v12  ;;  %v6798_v38 = vsub.f32 %v198_v27, %v6769_v0  ;;  %v6811_v27 = vand.u32 4294901760, %v190_v49  ;;  %v6817_v6 = vsub.f32 %v194_v41, %v6790_v13 }
  0x81   :  { %1023 = vmatpush.msrb.mxu0 %v6683_v3  ;;  %1166 = vmatpush.msrb.mxu2 %v6675_v5 }
  0x82   :  { %1068 = vmatpush.msrb.mxu1 %v1067_v50  ;;  %1213 = vmatpush.msrb.mxu3 %v6645_v30  ;;  %v1097_v50 = vand.u32 4294901760, %v1096_v29  ;;  %v1114_v29 = vsub.f32 %v6761_v45, %v10215_v19  ;;  %v10222_v37 = vand.u32 4294901760, %v6786_v39  ;;  %v10225_v19 = vand.u32 4294901760, %v6798_v38 }
  0x83   :  { %1025 = vmatpush.msrb.mxu0 %v6696_v9  ;;  %1169 = vmatpush.msrb.mxu2 %v6689_v36  ;;  %v6838_v14 = vsub.f32 %v190_v49, %v6811_v27 }
  0x84   :  { %1074 = vmatpush.msrb.mxu1 %v1073_v8  ;;  %1215 = vmatpush.msrb.mxu3 %v6652_v60  ;;  %v6803_v8 = vand.u32 4294901760, %v6778_v1  ;;  %v1132_v49 = vsub.f32 %v6798_v38, %v10225_v19 }
  0x85   :  { %1027 = vmatpush.msrb.mxu0 %v6707_v10  ;;  %1172 = vmatpush.msrb.mxu2 %v6710_v7 }
  0x86   :  { %1080 = vmatpush.msrb.mxu1 %v1079_v26  ;;  %1217 = vmatpush.msrb.mxu3 %v6663_v4  ;;  %10441 = vst [vmem:[#allocation22_spill] sm:$0xff] %v6803_v8  ;;  %v6805_v26 = vand.u32 4294901760, %v314_v34  ;;  %v1045_v41 = vsub.f32 %v6778_v1, %v6803_v8 }
  0x87   :  { %1029 = vmatpush.msrb.mxu0 %v6720_v11  ;;  %1175 = vmatpush.msrb.mxu2 %v6723_v44 }
  0x88   :  { %1086 = vmatpush.msrb.mxu1 %v1085_v61  ;;  %1219 = vmatpush.msrb.mxu3 %v6683_v3  ;;  %v1103_v61 = vand.u32 4294901760, %v1102_v20  ;;  %v1120_v20 = vsub.f32 %v6773_v17, %v10218_v56  ;;  %v1126_v56 = vsub.f32 %v6786_v39, %v10222_v37  ;;  %v6852_v37 = vsub.f32 %v310_v28, %v6824_v63 }
  0x89   :  { %1031 = vmatpush.msrb.mxu0 %v6731_v53  ;;  %1178 = vmatpush.msrb.mxu2 %v6735_v55  ;;  %v6856_v32 = vand.u32 4294901760, %v1045_v41  ;;  %v6864_v28 = vsub.f32 %v306_v24, %v6840_v18  ;;  %v10443_v41 = vand.u32 4294901760, %v6817_v6 }
  0x8a   :  { %1092 = vmatpush.msrb.mxu1 %v1091_v25  ;;  %1221 = vmatpush.msrb.mxu3 %v6696_v9  ;;  %v1109_v25 = vand.u32 4294901760, %v1108_v21  ;;  %v1115_v21 = vand.u32 4294901760, %v1114_v29  ;;  %v1121_v29 = vand.u32 4294901760, %v1120_v20  ;;  %v1127_v20 = vand.u32 4294901760, %v1126_v56 }
  0x8b   :  { %1033 = vmatpush.msrb.mxu0 %v6743_v31  ;;  %1181 = vmatpush.msrb.mxu2 %v6747_v54  ;;  %10442 = vst [vmem:[#allocation23_spill] sm:$0xff] %v6856_v32  ;;  %v1138_v57 = vsub.f32 %v6817_v6, %v10443_v41  ;;  %v1133_v56 = vand.u32 4294901760, %v1132_v49  ;;  %v10446_v49 = vand.u32 4294901760, %v6838_v14 }
  0x8c   :  { %1098 = vmatpush.msrb.mxu1 %v1097_v50  ;;  %1223 = vmatpush.msrb.mxu3 %v6707_v10  ;;  %v6831_v50 = vsub.f32 %v314_v34, %v6805_v26  ;;  %v6859_v34 = vand.u32 4294901760, %v298_v58 }
  0x8d   :  { %1035 = vmatpush.msrb.mxu0 %v6757_v12  ;;  %1184 = vmatpush.msrb.mxu2 %v6761_v45  ;;  %v1144_v19 = vsub.f32 %v6838_v14, %v10446_v49 }
  0x8e   :  { %1104 = vmatpush.msrb.mxu1 %v1103_v61  ;;  %1225 = vmatpush.msrb.mxu3 %v6720_v11  ;;  %v6845_v61 = vand.u32 4294901760, %v302_v2  ;;  %v10444_v40 = vand.u32 4294901760, %v6831_v50 }
  0x8f   :  { %1037 = vmatpush.msrb.mxu0 %v6769_v0  ;;  %1187 = vmatpush.msrb.mxu2 %v6773_v17 }
  0x90   :  { %1110 = vmatpush.msrb.mxu1 %v1109_v25  ;;  %1227 = vmatpush.msrb.mxu3 %v6731_v53  ;;  %v294_v25 = vld [vmem:[#allocation5 + $0x740] sm:$0xff]  ;;  %v6872_v52 = vsub.f32 %v302_v2, %v6845_v61  ;;  %v1395_v41 = vsub.f32 %v6831_v50, %v10444_v40  ;;  %v6884_v2 = vsub.f32 %v298_v58, %v6859_v34  ;;  %v1139_v40 = vand.u32 4294901760, %v1138_v57 }
  0x91   :  { %1039 = vmatpush.msrb.mxu0 %v6790_v13  ;;  %1190 = vmatpush.msrb.mxu2 %v6786_v39  ;;  %v6876_v24 = vand.u32 4294901760, %v294_v25 }
  0x92   :  { %1116 = vmatpush.msrb.mxu1 %v1115_v21  ;;  %1229 = vmatpush.msrb.mxu3 %v6743_v31  ;;  %v290_v21 = vld [vmem:[#allocation5 + $0x720] sm:$0xff]  ;;  %v1396_v57 = vand.u32 4294901760, %v1395_v41  ;;  %v10451_v41 = vand.u32 4294901760, %v6872_v52 }
  0x93   :  { %1041 = vmatpush.msrb.mxu0 %v6811_v27  ;;  %1193 = vmatpush.msrb.mxu2 %v6798_v38  ;;  %v6892_v42 = vand.u32 4294901760, %v290_v21  ;;  %v6903_v49 = vsub.f32 %v294_v25, %v6876_v24 }
  0x94   :  { %1122 = vmatpush.msrb.mxu1 %v1121_v29  ;;  %1231 = vmatpush.msrb.mxu3 %v6757_v12  ;;  %v10445_v29 = vand.u32 4294901760, %v6638_v23  ;;  %v10447_v23 = vand.u32 4294901760, %v6648_v59  ;;  %v10449_v59 = vand.u32 4294901760, %v6659_v16  ;;  %v1413_v16 = vsub.f32 %v6872_v52, %v10451_v41 }
  0x95   :  { %1047 = vmatmul.f32.vlgmr.msrb.gmra.mxu0 %v6856_v32  ;;  %1196 = vmatpush.msrb.mxu2 %v6817_v6  ;;  %v6905_v32 = vand.u32 4294901760, %v286_v46 }
  0x96   :  { %1248 = vmatpush.msra.mxu0 %v10445_v29  ;;  %1128 = vmatpush.msrb.mxu1 %v1127_v20  ;;  %v10448_v20 = vand.u32 4294901760, %v6852_v37 }
  0x97   :  { %1233 = vmatpush.msrb.mxu3 %v6769_v0  ;;  %1199 = vmatpush.msrb.mxu2 %v6838_v14 }
  0x98   :  { %1252 = vmatpush.msra.mxu0 %v10447_v23  ;;  %1134 = vmatpush.msrb.mxu1 %v1133_v56  ;;  %v1401_v29 = vsub.f32 %v6852_v37, %v10448_v20  ;;  %v1145_v56 = vand.u32 4294901760, %v1144_v19  ;;  %v10450_v23 = vand.u32 4294901760, %v6864_v28  ;;  %v6917_v20 = vsub.f32 %v290_v21, %v6892_v42 }
  0x99   :  { %1235 = vmatpush.msrb.mxu3 %v6790_v13  ;;  %1202 = vmatmul.f32.vlgmr.msrb.gmra.mxu2 %v6778_v1  ;;  %v10452_v19 = vand.u32 4294901760, %v6670_v43  ;;  %v6930_v21 = vsub.f32 %v286_v46, %v6905_v32  ;;  %v6932_v1 = vand.u32 4294901760, %v278_v47  ;;  %v10454_v43 = vand.u32 4294901760, %v6675_v5 }
  0x9a   :  { %1256 = vmatpush.msra.mxu0 %v10449_v59  ;;  %1352 = vmatpush.msra.mxu2 %v6805_v26  ;;  %v1407_v25 = vsub.f32 %v6864_v28, %v10450_v23  ;;  %v274_v59 = vld [vmem:[#allocation5 + $0x6a0] sm:$0xff]  ;;  %v1402_v58 = vand.u32 4294901760, %v1401_v29  ;;  %v6942_v46 = vsub.f32 %v282_v22, %v6919_v15  ;;  %v10455_v5 = vand.u32 4294901760, %v6903_v49 }
  0x9b   :  { %1140 = vmatpush.msrb.mxu1 %v1139_v40  ;;  %1237 = vmatpush.msrb.mxu3 %v6811_v27  ;;  %v10453_v40 = vand.u32 4294901760, %v6884_v2  ;;  %v6944_v23 = vand.u32 4294901760, %v274_v59  ;;  %v6954_v22 = vsub.f32 %v278_v47, %v6932_v1 }
  0x9c   :  { %1241 = vmatmul.f32.vlgmr.msrb.gmra.mxu3 %v6803_v8  ;;  %1260 = vmatpush.msra.mxu0 %v10452_v19  ;;  %v1408_v29 = vand.u32 4294901760, %v1407_v25  ;;  %v10248_v19 = vand.u32 4294901760, %v6917_v20  ;;  %v266_v8 = vld [vmem:[#allocation5 + $0x660] sm:$0xff] }
  0x9d   :  { %1354 = vmatpush.msra.mxu2 %v6824_v63  ;;  %1397 = vmatpush.msra.mxu3 %v1396_v57  ;;  %v1419_v41 = vsub.f32 %v6884_v2, %v10453_v40  ;;  %v1414_v57 = vand.u32 4294901760, %v1413_v16  ;;  %v6956_v40 = vand.u32 4294901760, %v270_v33  ;;  %v6967_v47 = vsub.f32 %v274_v59, %v6944_v23  ;;  %v262_v25 = vld [vmem:[#allocation5 + $0x640] sm:$0xff] }
  0x9e   :  { %1146 = vmatpush.msrb.mxu1 %v1145_v56  ;;  %1264 = vmatpush.msra.mxu0 %v10454_v43  ;;  %v1425_v56 = vsub.f32 %v6903_v49, %v10455_v5  ;;  %v10456_v43 = vand.u32 4294901760, %v6689_v36  ;;  %v6969_v5 = vand.u32 4294901760, %v266_v8  ;;  %v10457_v36 = vand.u32 4294901760, %v6710_v7 }
  0x9f   :  { %1148 = vmatmul.f32.vlgmr.msrb.gmra.mxu1 %v6751_v51  ;;  %1356 = vmatpush.msra.mxu2 %v6840_v18  ;;  %v1420_v16 = vand.u32 4294901760, %v1419_v41  ;;  %v10458_v41 = vand.u32 4294901760, %v6930_v21  ;;  %v6980_v59 = vsub.f32 %v270_v33, %v6956_v40  ;;  %v10459_v7 = vand.u32 4294901760, %v6723_v44 }
  0xa0   :  { %1315 = vmatpush.msra.mxu1 %v6621_v62  ;;  %1403 = vmatpush.msra.mxu3 %v1402_v58  ;;  %v1431_v62 = vsub.f32 %v6917_v20, %v10248_v19  ;;  %v258_v19 = vld [vmem:[#allocation5 + $0x620] sm:$0xff]  ;;  %v61_v58 = vld [vmem:[#allocation2 + $0x18] sm:$0xff]  ;;  %v10461_v44 = vand.u32 4294901760, %v6735_v55  ;;  %v10464_v33 = vand.u32 4294901760, %v6747_v54  ;;  %v10466_v54 = vand.u32 4294901760, %v6761_v45 }
  0xa1   :  { %1268 = vmatpush.msra.mxu0 %v10456_v43  ;;  %1358 = vmatpush.msra.mxu2 %v6845_v61  ;;  %v254_v43 = vld [vmem:[#allocation5 + $0x600] sm:$0xff] }
  0xa2   :  { %1317 = vmatpush.msra.mxu1 %v6628_v48  ;;  %1409 = vmatpush.msra.mxu3 %v1408_v29  ;;  %v1426_v48 = vand.u32 4294901760, %v1425_v56  ;;  %v1437_v29 = vsub.f32 %v6930_v21, %v10458_v41  ;;  %v6993_v41 = vsub.f32 %v266_v8, %v6969_v5  ;;  %v1460_v8 = vand.u32 4294901760, %v6980_v59 }
  0xa3   :  { %1272 = vmatpush.msra.mxu0 %v10457_v36  ;;  %1360 = vmatpush.msra.mxu2 %v6859_v34  ;;  %v6985_v36 = vand.u32 4294901760, %v262_v25 }
  0xa4   :  { %1319 = vmatpush.msra.mxu1 %v6635_v35  ;;  %1415 = vmatpush.msra.mxu3 %v1414_v57  ;;  %v1432_v35 = vand.u32 4294901760, %v1431_v62  ;;  %v10460_v57 = vand.u32 4294901760, %v6942_v46  ;;  %v10463_v62 = vand.u32 4294901760, %v6954_v22 }
  0xa5   :  { %1276 = vmatpush.msra.mxu0 %v10459_v7  ;;  %1362 = vmatpush.msra.mxu2 %v6876_v24  ;;  %v6998_v7 = vand.u32 4294901760, %v258_v19  ;;  %v7011_v55 = vsub.f32 %v262_v25, %v6985_v36 }
  0xa6   :  { %1321 = vmatpush.msra.mxu1 %v6645_v30  ;;  %1421 = vmatpush.msra.mxu3 %v1420_v16  ;;  %v1443_v56 = vsub.f32 %v6942_v46, %v10460_v57  ;;  %v7000_v30 = vand.u32 4294901760, %v61_v58  ;;  %v1438_v16 = vand.u32 4294901760, %v1437_v29  ;;  %v1449_v57 = vsub.f32 %v6954_v22, %v10463_v62 }
  0xa7   :  { %1280 = vmatpush.msra.mxu0 %v10461_v44  ;;  %1364 = vmatpush.msra.mxu2 %v6892_v42  ;;  %v7013_v44 = vand.u32 4294901760, %v254_v43  ;;  %v1466_v62 = vand.u32 4294901760, %v6993_v41  ;;  %v7024_v25 = vsub.f32 %v258_v19, %v6998_v7  ;;  %v1472_v45 = vand.u32 4294901760, %v7011_v55 }
  0xa8   :  { %10462 = vst [vmem:[#allocation24_spill] sm:$0xff] %v7000_v30  ;;  %1323 = vmatpush.msra.mxu1 %v6652_v60  ;;  %1427 = vmatpush.msra.mxu3 %v1426_v48  ;;  %v1444_v60 = vand.u32 4294901760, %v1443_v56  ;;  %v10465_v48 = vand.u32 4294901760, %v6967_v47  ;;  %v10468_v56 = vand.u32 4294901760, %v6773_v17 }
  0xa9   :  { %1284 = vmatpush.msra.mxu0 %v10464_v33  ;;  %1366 = vmatpush.msra.mxu2 %v6905_v32  ;;  %v7027_v33 = vsub.f32 %v61_v58, %v7000_v30  ;;  %v7038_v19 = vsub.f32 %v254_v43, %v7013_v44  ;;  %v1467_v58 = vsub.f32 %v6993_v41, %v1466_v62  ;;  %v1478_v17 = vand.u32 4294901760, %v7024_v25 }
  0xaa   :  { %1325 = vmatpush.msra.mxu1 %v6663_v4  ;;  %1433 = vmatpush.msra.mxu3 %v1432_v35  ;;  %v1455_v29 = vsub.f32 %v6967_v47, %v10465_v48  ;;  %v1450_v4 = vand.u32 4294901760, %v1449_v57  ;;  %v1461_v35 = vsub.f32 %v6980_v59, %v1460_v8  ;;  %v10471_v43 = vand.u32 4294901760, %v6798_v38 }
  0xab   :  { %1288 = vmatpush.msra.mxu0 %v10466_v54  ;;  %1368 = vmatpush.msra.mxu2 %v6919_v15  ;;  %10467 = vst [vmem:[#allocation25_spill] sm:$0xff] %v7027_v33  ;;  %v7049_v57 = vand.u32 4294901760, %v7027_v33  ;;  %v1468_v48 = vand.u32 4294901760, %v1467_v58  ;;  %v10473_v54 = vand.u32 4294901760, %v6838_v14 }
  0xac   :  { %1327 = vmatpush.msra.mxu1 %v6683_v3  ;;  %1439 = vmatpush.msra.mxu3 %v1438_v16  ;;  %v1456_v3 = vand.u32 4294901760, %v1455_v29  ;;  %v10469_v16 = vand.u32 4294901760, %v6786_v39  ;;  %v1473_v39 = vsub.f32 %v7011_v55, %v1472_v45  ;;  %v10472_v29 = vand.u32 4294901760, %v6817_v6 }
  0xad   :  { %1292 = vmatpush.msra.mxu0 %v10468_v56  ;;  %1370 = vmatpush.msra.mxu2 %v6932_v1  ;;  %10470 = vst [vmem:[#allocation26_spill] sm:$0xff] %v7049_v57  ;;  %v1386_v38 = vsub.f32 %v7027_v33, %v7049_v57 }
  0xae   :  { %1329 = vmatpush.msra.mxu1 %v6696_v9  ;;  %1445 = vmatpush.msra.mxu3 %v1444_v60  ;;  %v1462_v9 = vand.u32 4294901760, %v1461_v35  ;;  %v1484_v60 = vand.u32 4294901760, %v7038_v19  ;;  %v91_v35 = vld [vmem:[#allocation5 + $0xe8] sm:$0xff] }
  0xaf   :  { %1296 = vmatpush.msra.mxu0 %v10469_v16  ;;  %1372 = vmatpush.msra.mxu2 %v6944_v23  ;;  %v7217_v58 = vand.u32 4294901760, %v91_v35 }
  0xb0   :  { %1331 = vmatpush.msra.mxu1 %v6707_v10  ;;  %1451 = vmatpush.msra.mxu3 %v1450_v4  ;;  %v1479_v10 = vsub.f32 %v7024_v25, %v1478_v17  ;;  %v1485_v6 = vsub.f32 %v7038_v19, %v1484_v60 }
  0xb1   :  { %1300 = vmatpush.msra.mxu0 %v10471_v43  ;;  %1374 = vmatpush.msra.mxu2 %v6956_v40 }
  0xb2   :  { %1333 = vmatpush.msra.mxu1 %v6720_v11  ;;  %1457 = vmatpush.msra.mxu3 %v1456_v3  ;;  %v1474_v11 = vand.u32 4294901760, %v1473_v39  ;;  %v1480_v4 = vand.u32 4294901760, %v1479_v10  ;;  %v1486_v14 = vand.u32 4294901760, %v1485_v6  ;;  %v87_v3 = vld [vmem:[#allocation5 + $0xc8] sm:$0xff] }
  0xb3   :  { %1304 = vmatpush.msra.mxu0 %v10472_v29  ;;  %1376 = vmatpush.msra.mxu2 %v6969_v5  ;;  %v83_v39 = vld [vmem:[#allocation5 + $0xa8] sm:$0xff] }
  0xb4   :  { %1335 = vmatpush.msra.mxu1 %v6731_v53  ;;  %1463 = vmatpush.msra.mxu3 %v1462_v9  ;;  %v7078_v53 = vand.u32 4294901760, %v1386_v38  ;;  %v7244_v38 = vsub.f32 %v91_v35, %v7217_v58  ;;  %v7250_v6 = vand.u32 4294901760, %v83_v39 }
  0xb5   :  { %1308 = vmatpush.msra.mxu0 %v10473_v54  ;;  %1378 = vmatpush.msra.mxu2 %v6985_v36 }
  0xb6   :  { %1337 = vmatpush.msra.mxu1 %v6743_v31  ;;  %1469 = vmatpush.msra.mxu3 %v1468_v48  ;;  %10474 = vst [vmem:[#allocation27_spill] sm:$0xff] %v7078_v53  ;;  %v10475_v31 = vand.u32 4294901760, %v6831_v50 }
  0xb7   :  { %1310 = vmatmul.f32.vlgmr.msra.gmra.mxu0 %v6751_v51  ;;  %1380 = vmatpush.msra.mxu2 %v6998_v7 }
  0xb8   :  { %1495 = vmatpush.msrb.mxu0 %v6831_v50  ;;  %1339 = vmatpush.msra.mxu1 %v6757_v12  ;;  %v10476_v12 = vand.u32 4294901760, %v6852_v37  ;;  %v10484_v50 = vand.u32 4294901760, %v6954_v22 }
  0xb9   :  { %1475 = vmatpush.msra.mxu3 %v1474_v11  ;;  %1382 = vmatpush.msra.mxu2 %v7013_v44 }
  0xba   :  { %1498 = vmatpush.msrb.mxu0 %v6852_v37  ;;  %1341 = vmatpush.msra.mxu1 %v6769_v0  ;;  %v10477_v0 = vand.u32 4294901760, %v6864_v28  ;;  %v10478_v37 = vand.u32 4294901760, %v6872_v52 }
  0xbb   :  { %1481 = vmatpush.msra.mxu3 %v1480_v4  ;;  %1388 = vmatmul.f32.vlgmr.msra.gmra.mxu2 %v7078_v53 }
  0xbc   :  { %1501 = vmatpush.msrb.mxu0 %v6864_v28  ;;  %1589 = vmatpush.msrb.mxu2 %v10475_v31  ;;  %v10485_v28 = vand.u32 4294901760, %v6967_v47  ;;  %v75_v31 = vld [vmem:[#allocation5 + $0x68] sm:$0xff] }
  0xbd   :  { %1343 = vmatpush.msra.mxu1 %v6790_v13  ;;  %1487 = vmatpush.msra.mxu3 %v1486_v14  ;;  %v10479_v13 = vand.u32 4294901760, %v6884_v2 }
  0xbe   :  { %1489 = vmatmul.f32.vlgmr.msra.gmra.mxu3 %v7000_v30  ;;  %1504 = vmatpush.msrb.mxu0 %v6872_v52  ;;  %v10481_v52 = vand.u32 4294901760, %v6917_v20 }
  0xbf   :  { %1593 = vmatpush.msrb.mxu2 %v10476_v12  ;;  %1656 = vmatpush.msrb.mxu3 %v6805_v26 }
  0xc0   :  { %1345 = vmatpush.msra.mxu1 %v6811_v27  ;;  %1507 = vmatpush.msrb.mxu0 %v6884_v2  ;;  %v123_v27 = vld [vmem:[#allocation5 + $0x1e8] sm:$0xff] }
  0xc1   :  { %1347 = vmatmul.f32.vlgmr.msra.gmra.mxu1 %v6751_v51  ;;  %1597 = vmatpush.msrb.mxu2 %v10477_v0  ;;  %v139_v51 = vld [vmem:[#allocation5 + $0x268] sm:$0xff] }
  0xc2   :  { %1548 = vmatpush.msrb.mxu1 %v6805_v26  ;;  %1658 = vmatpush.msrb.mxu3 %v6824_v63  ;;  %v10480_v26 = vand.u32 4294901760, %v6903_v49 }
  0xc3   :  { %1510 = vmatpush.msrb.mxu0 %v6903_v49  ;;  %1601 = vmatpush.msrb.mxu2 %v10478_v37 }
  0xc4   :  { %1550 = vmatpush.msrb.mxu1 %v6824_v63  ;;  %1660 = vmatpush.msrb.mxu3 %v6840_v18  ;;  %v10483_v63 = vand.u32 4294901760, %v6942_v46 }
  0xc5   :  { %1513 = vmatpush.msrb.mxu0 %v6917_v20  ;;  %1605 = vmatpush.msrb.mxu2 %v10479_v13 }
  0xc6   :  { %1552 = vmatpush.msrb.mxu1 %v6840_v18  ;;  %1662 = vmatpush.msrb.mxu3 %v6845_v61  ;;  %v10482_v18 = vand.u32 4294901760, %v6930_v21 }
  0xc7   :  { %1516 = vmatpush.msrb.mxu0 %v6930_v21  ;;  %1609 = vmatpush.msrb.mxu2 %v10480_v26  ;;  %v103_v21 = vld [vmem:[#allocation5 + $0x148] sm:$0xff]  ;;  %v10251_v26 = vand.u32 4294901760, %v7244_v38 }
  0xc8   :  { %1554 = vmatpush.msrb.mxu1 %v6845_v61  ;;  %1664 = vmatpush.msrb.mxu3 %v6859_v34  ;;  %v7137_v61 = vand.u32 4294901760, %v123_v27 }
  0xc9   :  { %1519 = vmatpush.msrb.mxu0 %v6942_v46  ;;  %1613 = vmatpush.msrb.mxu2 %v10481_v52  ;;  %v71_v52 = vld [vmem:[#allocation5 + $0x48] sm:$0xff] }
  0xca   :  { %1556 = vmatpush.msrb.mxu1 %v6859_v34  ;;  %1666 = vmatpush.msrb.mxu3 %v6876_v24  ;;  %v119_v34 = vld [vmem:[#allocation5 + $0x1c8] sm:$0xff]  ;;  %v7154_v49 = vsub.f32 %v123_v27, %v7137_v61  ;;  %v7272_v27 = vand.u32 4294901760, %v75_v31 }
  0xcb   :  { %1522 = vmatpush.msrb.mxu0 %v6954_v22  ;;  %1617 = vmatpush.msrb.mxu2 %v10482_v18 }
  0xcc   :  { %1558 = vmatpush.msrb.mxu1 %v6876_v24  ;;  %1668 = vmatpush.msrb.mxu3 %v6892_v42  ;;  %v7144_v24 = vand.u32 4294901760, %v119_v34 }
  0xcd   :  { %1525 = vmatpush.msrb.mxu0 %v6967_v47  ;;  %1621 = vmatpush.msrb.mxu2 %v10483_v63  ;;  %v99_v47 = vld [vmem:[#allocation5 + $0x128] sm:$0xff] }
  0xce   :  { %1560 = vmatpush.msrb.mxu1 %v6892_v42  ;;  %1670 = vmatpush.msrb.mxu3 %v6905_v32  ;;  %v115_v42 = vld [vmem:[#allocation5 + $0x1a8] sm:$0xff] }
  0xcf   :  { %1528 = vmatpush.msrb.mxu0 %v6980_v59  ;;  %1625 = vmatpush.msrb.mxu2 %v10484_v50  ;;  %v7151_v2 = vand.u32 4294901760, %v115_v42  ;;  %v7275_v50 = vsub.f32 %v83_v39, %v7250_v6 }
  0xd0   :  { %1562 = vmatpush.msrb.mxu1 %v6905_v32  ;;  %1672 = vmatpush.msrb.mxu3 %v6919_v15  ;;  %v111_v32 = vld [vmem:[#allocation5 + $0x188] sm:$0xff] }
  0xd1   :  { %1531 = vmatpush.msrb.mxu0 %v6993_v41  ;;  %1629 = vmatpush.msrb.mxu2 %v10485_v28  ;;  %v7161_v20 = vand.u32 4294901760, %v111_v32  ;;  %v7175_v22 = vsub.f32 %v115_v42, %v7151_v2  ;;  %v67_v28 = vld [vmem:[#allocation5 + $0x28] sm:$0xff] }
  0xd2   :  { %1564 = vmatpush.msrb.mxu1 %v6919_v15  ;;  %1674 = vmatpush.msrb.mxu3 %v6932_v1  ;;  %v107_v15 = vld [vmem:[#allocation5 + $0x168] sm:$0xff] }
  0xd3   :  { %1534 = vmatpush.msrb.mxu0 %v7011_v55  ;;  %1633 = vmatpush.msrb.mxu2 %v1460_v8  ;;  %v7171_v46 = vand.u32 4294901760, %v107_v15  ;;  %v7186_v41 = vsub.f32 %v111_v32, %v7161_v20  ;;  %v95_v8 = vld [vmem:[#allocation5 + $0x108] sm:$0xff]  ;;  %v7196_v55 = vand.u32 4294901760, %v99_v47 }
  0xd4   :  { %1566 = vmatpush.msrb.mxu1 %v6932_v1  ;;  %1676 = vmatpush.msrb.mxu3 %v6944_v23  ;;  %v7164_v1 = vsub.f32 %v119_v34, %v7144_v24  ;;  %v7209_v56 = vand.u32 4294901760, %v95_v8 }
  0xd5   :  { %1537 = vmatpush.msrb.mxu0 %v7024_v25  ;;  %1637 = vmatpush.msrb.mxu2 %v1466_v62  ;;  %v10261_v62 = vand.u32 4294901760, %v7175_v22  ;;  %v7200_v25 = vsub.f32 %v107_v15, %v7171_v46  ;;  %v7226_v43 = vsub.f32 %v99_v47, %v7196_v55  ;;  %v7284_v15 = vand.u32 4294901760, %v71_v52  ;;  %v187_v47 = vld [vmem:[#allocation5 + $0x3e8] sm:$0xff] }
  0xd6   :  { %1568 = vmatpush.msrb.mxu1 %v6944_v23  ;;  %1678 = vmatpush.msrb.mxu3 %v6956_v40  ;;  %v1735_v23 = vand.u32 4294901760, %v7154_v49  ;;  %v10262_v59 = vand.u32 4294901760, %v7164_v1  ;;  %v7239_v10 = vsub.f32 %v95_v8, %v7209_v56  ;;  %v1784_v8 = vsub.f32 %v7244_v38, %v10251_v26  ;;  %v171_v26 = vld [vmem:[#allocation5 + $0x368] sm:$0xff] }
  0xd7   :  { %1540 = vmatpush.msrb.mxu0 %v7038_v19  ;;  %1641 = vmatpush.msrb.mxu2 %v1472_v45  ;;  %v10259_v45 = vand.u32 4294901760, %v7186_v41  ;;  %v10257_v9 = vand.u32 4294901760, %v7200_v25  ;;  %v10254_v4 = vand.u32 4294901760, %v7226_v43  ;;  %v7306_v39 = vand.u32 4294901760, %v187_v47 }
  0xd8   :  { %1570 = vmatpush.msrb.mxu1 %v6956_v40  ;;  %1680 = vmatpush.msrb.mxu3 %v6969_v5  ;;  %v7182_v40 = vand.u32 4294901760, %v103_v21  ;;  %v10253_v13 = vand.u32 4294901760, %v7239_v10 }
  0xd9   :  { %1543 = vmatmul.f32.vlgmr.msrb.gmra.mxu0 %v7027_v33  ;;  %1645 = vmatpush.msrb.mxu2 %v1478_v17  ;;  %v1748_v17 = vsub.f32 %v7175_v22, %v10261_v62  ;;  %v1754_v48 = vsub.f32 %v7186_v41, %v10259_v45  ;;  %v1760_v11 = vsub.f32 %v7200_v25, %v10257_v9 }
  0xda   :  { %1693 = vmatpush.msra.mxu0 %v7137_v61  ;;  %1572 = vmatpush.msrb.mxu1 %v6969_v5  ;;  %v1736_v5 = vsub.f32 %v7154_v49, %v1735_v23  ;;  %v7213_v19 = vsub.f32 %v103_v21, %v7182_v40  ;;  %v1772_v63 = vsub.f32 %v7226_v43, %v10254_v4  ;;  %v7357_v4 = vand.u32 4294901760, %v171_v26 }
  0xdb   :  { %1682 = vmatpush.msrb.mxu3 %v6985_v36  ;;  %1649 = vmatpush.msrb.mxu2 %v1484_v60  ;;  %v1749_v54 = vand.u32 4294901760, %v1748_v17  ;;  %v1755_v12 = vand.u32 4294901760, %v1754_v48  ;;  %v1761_v18 = vand.u32 4294901760, %v1760_v11  ;;  %v1778_v32 = vsub.f32 %v7239_v10, %v10253_v13 }
  0xdc   :  { %1695 = vmatpush.msra.mxu0 %v7144_v24  ;;  %1574 = vmatpush.msrb.mxu1 %v6985_v36  ;;  %v1742_v36 = vsub.f32 %v7164_v1, %v10262_v59  ;;  %v1737_v16 = vand.u32 4294901760, %v1736_v5  ;;  %v10256_v29 = vand.u32 4294901760, %v7213_v19  ;;  %v63_v5 = vld [vmem:[#allocation5 + $0x8] sm:$0xff]  ;;  %v1773_v35 = vand.u32 4294901760, %v1772_v63 }
  0xdd   :  { %1684 = vmatpush.msrb.mxu3 %v6998_v7  ;;  %1651 = vmatmul.f32.vlgmr.msrb.gmra.mxu2 %v7000_v30  ;;  %v1779_v48 = vand.u32 4294901760, %v1778_v32  ;;  %v7313_v11 = vsub.f32 %v71_v52, %v7284_v15 }
  0xde   :  { %1697 = vmatpush.msra.mxu0 %v7151_v2  ;;  %1836 = vmatpush.msra.mxu2 %v7154_v49  ;;  %v1743_v60 = vand.u32 4294901760, %v1742_v36  ;;  %v1766_v0 = vsub.f32 %v7213_v19, %v10256_v29  ;;  %v7295_v36 = vand.u32 4294901760, %v67_v28  ;;  %v10487_v49 = vand.u32 4294901760, %v7164_v1 }
  0xdf   :  { %1576 = vmatpush.msrb.mxu1 %v6998_v7  ;;  %1686 = vmatpush.msrb.mxu3 %v7013_v44  ;;  %v7230_v7 = vand.u32 4294901760, %v87_v3 }
  0xe0   :  { %1688 = vmatmul.f32.vlgmr.msrb.gmra.mxu3 %v7000_v30  ;;  %1699 = vmatpush.msra.mxu0 %v7161_v20  ;;  %v1767_v42 = vand.u32 4294901760, %v1766_v0  ;;  %v7323_v63 = vsub.f32 %v67_v28, %v7295_v36  ;;  %v10258_v28 = vand.u32 4294901760, %v7313_v11 }
  0xe1   :  { %1839 = vmatpush.msra.mxu2 %v7164_v1  ;;  %1889 = vmatpush.msra.mxu3 %v7137_v61  ;;  %v7256_v14 = vsub.f32 %v87_v3, %v7230_v7  ;;  %v10249_v3 = vand.u32 4294901760, %v7275_v50  ;;  %v10489_v1 = vand.u32 4294901760, %v7175_v22 }
  0xe2   :  { %1578 = vmatpush.msrb.mxu1 %v7013_v44  ;;  %1701 = vmatpush.msra.mxu0 %v7171_v46  ;;  %v79_v44 = vld [vmem:[#allocation5 + $0x88] sm:$0xff] }
  0xe3   :  { %1582 = vmatmul.f32.vlgmr.msrb.gmra.mxu1 %v7049_v57  ;;  %1842 = vmatpush.msra.mxu2 %v7175_v22  ;;  %v7262_v37 = vand.u32 4294901760, %v79_v44  ;;  %v10250_v34 = vand.u32 4294901760, %v7256_v14  ;;  %v1796_v0 = vsub.f32 %v7275_v50, %v10249_v3  ;;  %v10491_v22 = vand.u32 4294901760, %v7186_v41 }
  0xe4   :  { %1738 = vmatpush.msra.mxu1 %v1737_v16  ;;  %1891 = vmatpush.msra.mxu3 %v7144_v24  ;;  %v7299_v16 = vsub.f32 %v75_v31, %v7272_v27  ;;  %v1785_v31 = vand.u32 4294901760, %v1784_v8  ;;  %v7330_v8 = vsub.f32 %v187_v47, %v7306_v39 }
  0xe5   :  { %1703 = vmatpush.msra.mxu0 %v7182_v40  ;;  %1845 = vmatpush.msra.mxu2 %v7186_v41  ;;  %v7287_v21 = vsub.f32 %v79_v44, %v7262_v37  ;;  %v1790_v17 = vsub.f32 %v7256_v14, %v10250_v34  ;;  %v7309_v44 = vand.u32 4294901760, %v63_v5  ;;  %v10493_v41 = vand.u32 4294901760, %v7200_v25 }
  0xe6   :  { %1744 = vmatpush.msra.mxu1 %v1743_v60  ;;  %1893 = vmatpush.msra.mxu3 %v7151_v2  ;;  %v183_v60 = vld [vmem:[#allocation5 + $0x3c8] sm:$0xff]  ;;  %v10263_v13 = vand.u32 4294901760, %v7330_v8 }
  0xe7   :  { %1705 = vmatpush.msra.mxu0 %v7196_v55  ;;  %1848 = vmatpush.msra.mxu2 %v7200_v25  ;;  %v7325_v52 = vand.u32 4294901760, %v183_v60  ;;  %v1791_v32 = vand.u32 4294901760, %v1790_v17  ;;  %v7338_v3 = vsub.f32 %v63_v5, %v7309_v44  ;;  %v1797_v17 = vand.u32 4294901760, %v1796_v0 }
  0xe8   :  { %1750 = vmatpush.msra.mxu1 %v1749_v54  ;;  %1895 = vmatpush.msra.mxu3 %v7161_v20  ;;  %v10252_v54 = vand.u32 4294901760, %v7287_v21  ;;  %v10260_v5 = vand.u32 4294901760, %v7323_v63  ;;  %v10495_v25 = vand.u32 4294901760, %v7213_v19 }
  0xe9   :  { %1707 = vmatpush.msra.mxu0 %v7209_v56  ;;  %1851 = vmatpush.msra.mxu2 %v7213_v19  ;;  %v10496_v19 = vand.u32 4294901760, %v7226_v43 }
  0xea   :  { %1756 = vmatpush.msra.mxu1 %v1755_v12  ;;  %1897 = vmatpush.msra.mxu3 %v7171_v46  ;;  %v179_v12 = vld [vmem:[#allocation5 + $0x3a8] sm:$0xff] }
  0xeb   :  { %1709 = vmatpush.msra.mxu0 %v7217_v58  ;;  %1854 = vmatpush.msra.mxu2 %v7226_v43  ;;  %v7340_v34 = vand.u32 4294901760, %v179_v12 }
  0xec   :  { %1762 = vmatpush.msra.mxu1 %v1761_v18  ;;  %1899 = vmatpush.msra.mxu3 %v7182_v40  ;;  %v10255_v18 = vand.u32 4294901760, %v7299_v16 }
  0xed   :  { %1711 = vmatpush.msra.mxu0 %v7230_v7  ;;  %1857 = vmatpush.msra.mxu2 %v7239_v10  ;;  %v7365_v29 = vsub.f32 %v179_v12, %v7340_v34 }
  0xee   :  { %1768 = vmatpush.msra.mxu1 %v1767_v42  ;;  %1901 = vmatpush.msra.mxu3 %v7196_v55  ;;  %v175_v42 = vld [vmem:[#allocation5 + $0x388] sm:$0xff] }
  0xef   :  { %1713 = vmatpush.msra.mxu0 %v7250_v6  ;;  %1860 = vmatpush.msra.mxu2 %v7244_v38  ;;  %v7344_v47 = vand.u32 4294901760, %v175_v42 }
  0xf0   :  { %1774 = vmatpush.msra.mxu1 %v1773_v35  ;;  %1903 = vmatpush.msra.mxu3 %v7209_v56  ;;  %v1802_v35 = vsub.f32 %v7287_v21, %v10252_v54  ;;  %v7352_v54 = vsub.f32 %v183_v60, %v7325_v52  ;;  %v10264_v60 = vand.u32 4294901760, %v7338_v3 }
  0xf1   :  { %1715 = vmatpush.msra.mxu0 %v7262_v37  ;;  %1863 = vmatpush.msra.mxu2 %v7256_v14  ;;  %v7370_v9 = vsub.f32 %v175_v42, %v7344_v47  ;;  %v2077_v42 = vsub.f32 %v7330_v8, %v10263_v13  ;;  %v155_v13 = vld [vmem:[#allocation5 + $0x2e8] sm:$0xff] }
  0xf2   :  { %1780 = vmatpush.msra.mxu1 %v1779_v48  ;;  %1905 = vmatpush.msra.mxu3 %v7217_v58  ;;  %v1808_v48 = vsub.f32 %v7299_v16, %v10255_v18  ;;  %v1803_v0 = vand.u32 4294901760, %v1802_v35  ;;  %v1814_v18 = vsub.f32 %v7313_v11, %v10258_v28  ;;  %v1820_v28 = vsub.f32 %v7323_v63, %v10260_v5 }
  0xf3   :  { %1717 = vmatpush.msra.mxu0 %v7272_v27  ;;  %1866 = vmatpush.msra.mxu2 %v7275_v50  ;;  %v1826_v62 = vsub.f32 %v7338_v3, %v10264_v60  ;;  %v7418_v30 = vand.u32 4294901760, %v155_v13 }
  0xf4   :  { %1786 = vmatpush.msra.mxu1 %v1785_v31  ;;  %1907 = vmatpush.msra.mxu3 %v7230_v7  ;;  %v167_v31 = vld [vmem:[#allocation5 + $0x348] sm:$0xff]  ;;  %v1809_v35 = vand.u32 4294901760, %v1808_v48  ;;  %v1815_v5 = vand.u32 4294901760, %v1814_v18  ;;  %v1821_v18 = vand.u32 4294901760, %v1820_v28 }
  0xf5   :  { %1719 = vmatpush.msra.mxu0 %v7284_v15  ;;  %1869 = vmatpush.msra.mxu2 %v7287_v21  ;;  %v7377_v12 = vand.u32 4294901760, %v167_v31  ;;  %v159_v48 = vld [vmem:[#allocation5 + $0x308] sm:$0xff]  ;;  %v1827_v28 = vand.u32 4294901760, %v1826_v62 }
  0xf6   :  { %1792 = vmatpush.msra.mxu1 %v1791_v32  ;;  %1909 = vmatpush.msra.mxu3 %v7250_v6  ;;  %v163_v32 = vld [vmem:[#allocation5 + $0x328] sm:$0xff]  ;;  %v7405_v57 = vand.u32 4294901760, %v159_v48 }
  0xf7   :  { %1721 = vmatpush.msra.mxu0 %v7295_v36  ;;  %1872 = vmatpush.msra.mxu2 %v7299_v16  ;;  %v7392_v45 = vand.u32 4294901760, %v163_v32  ;;  %v7403_v59 = vsub.f32 %v167_v31, %v7377_v12 }
  0xf8   :  { %1798 = vmatpush.msra.mxu1 %v1797_v17  ;;  %1911 = vmatpush.msra.mxu3 %v7262_v37  ;;  %v7385_v17 = vsub.f32 %v171_v26, %v7357_v4  ;;  %v151_v26 = vld [vmem:[#allocation5 + $0x2c8] sm:$0xff] }
  0xf9   :  { %1723 = vmatpush.msra.mxu0 %v7309_v44  ;;  %1875 = vmatpush.msra.mxu2 %v7313_v11  ;;  %v7416_v33 = vsub.f32 %v163_v32, %v7392_v45  ;;  %v7429_v32 = vsub.f32 %v159_v48, %v7405_v57  ;;  %v7441_v48 = vsub.f32 %v155_v13, %v7418_v30 }
  0xfa   :  { %1804 = vmatpush.msra.mxu1 %v1803_v0  ;;  %1913 = vmatpush.msra.mxu3 %v7272_v27  ;;  %v10486_v0 = vand.u32 4294901760, %v7352_v54 }
  0xfb   :  { %1930 = vmatpush.msrb.mxu0 %v1735_v23  ;;  %1878 = vmatpush.msra.mxu2 %v7323_v63  ;;  %v2078_v23 = vand.u32 4294901760, %v2077_v42  ;;  %v10490_v42 = vand.u32 4294901760, %v7370_v9 }
  0xfc   :  { %1810 = vmatpush.msra.mxu1 %v1809_v35  ;;  %1915 = vmatpush.msra.mxu3 %v7284_v15  ;;  %v2083_v60 = vsub.f32 %v7352_v54, %v10486_v0  ;;  %v10488_v0 = vand.u32 4294901760, %v7365_v29  ;;  %v7431_v35 = vand.u32 4294901760, %v151_v26 }
  0xfd   :  { %1934 = vmatpush.msrb.mxu0 %v10487_v49  ;;  %1881 = vmatpush.msra.mxu2 %v7338_v3  ;;  %v147_v49 = vld [vmem:[#allocation5 + $0x2a8] sm:$0xff] }
  0xfe   :  { %1816 = vmatpush.msra.mxu1 %v1815_v5  ;;  %1917 = vmatpush.msra.mxu3 %v7295_v36  ;;  %v2089_v31 = vsub.f32 %v7365_v29, %v10488_v0  ;;  %v2095_v5 = vsub.f32 %v7370_v9, %v10490_v42  ;;  %v2084_v62 = vand.u32 4294901760, %v2083_v60  ;;  %v10275_v0 = vand.u32 4294901760, %v7416_v33 }
  0xff   :  { %1938 = vmatpush.msrb.mxu0 %v10489_v1  ;;  %2034 = vmatpush.msrb.mxu2 %v7306_v39  ;;  %v10492_v1 = vand.u32 4294901760, %v7385_v17  ;;  %v7443_v53 = vand.u32 4294901760, %v147_v49  ;;  %v7454_v13 = vsub.f32 %v151_v26, %v7431_v35 }
 0x100   :  { %1822 = vmatpush.msra.mxu1 %v1821_v18  ;;  %1919 = vmatpush.msra.mxu3 %v7309_v44  ;;  %v143_v18 = vld [vmem:[#allocation5 + $0x288] sm:$0xff]  ;;  %v2090_v60 = vand.u32 4294901760, %v2089_v31  ;;  %v2118_v31 = vand.u32 4294901760, %v7429_v32 }
 0x101   :  { %1942 = vmatpush.msrb.mxu0 %v10491_v22  ;;  %2036 = vmatpush.msrb.mxu2 %v7325_v52  ;;  %v2101_v42 = vsub.f32 %v7385_v17, %v10492_v1  ;;  %v2096_v22 = vand.u32 4294901760, %v2095_v5  ;;  %v7456_v1 = vand.u32 4294901760, %v143_v18  ;;  %v2113_v5 = vsub.f32 %v7416_v33, %v10275_v0 }
 0x102   :  { %2079 = vmatpush.msrb.mxu3 %v2078_v23  ;;  %1828 = vmatpush.msra.mxu1 %v1827_v28  ;;  %v10494_v23 = vand.u32 4294901760, %v7403_v59  ;;  %v7467_v26 = vsub.f32 %v147_v49, %v7443_v53  ;;  %v10497_v0 = vand.u32 4294901760, %v7239_v10  ;;  %v10498_v10 = vand.u32 4294901760, %v7244_v38 }
 0x103   :  { %1946 = vmatpush.msrb.mxu0 %v10493_v41  ;;  %2038 = vmatpush.msrb.mxu2 %v7340_v34  ;;  %v7469_v41 = vand.u32 4294901760, %v139_v51  ;;  %v7480_v49 = vsub.f32 %v143_v18, %v7456_v1  ;;  %v2114_v43 = vand.u32 4294901760, %v2113_v5 }
 0x104   :  { %1997 = vmatpush.msrb.mxu1 %v7137_v61  ;;  %2085 = vmatpush.msrb.mxu3 %v2084_v62  ;;  %v2107_v28 = vsub.f32 %v7403_v59, %v10494_v23  ;;  %v2102_v61 = vand.u32 4294901760, %v2101_v42  ;;  %v2124_v62 = vand.u32 4294901760, %v7441_v48  ;;  %v135_v23 = vld [vmem:[#allocation5 + $0x248] sm:$0xff]  ;;  %v2119_v42 = vsub.f32 %v7429_v32, %v2118_v31 }
 0x105   :  { %1950 = vmatpush.msrb.mxu0 %v10495_v25  ;;  %2040 = vmatpush.msrb.mxu2 %v7344_v47  ;;  %v131_v25 = vld [vmem:[#allocation5 + $0x228] sm:$0xff]  ;;  %v7493_v18 = vsub.f32 %v139_v51, %v7469_v41  ;;  %v2142_v5 = vand.u32 4294901760, %v7480_v49  ;;  %v10499_v51 = vand.u32 4294901760, %v7256_v14  ;;  %v10500_v14 = vand.u32 4294901760, %v7275_v50 }
 0x106   :  { %1999 = vmatpush.msrb.mxu1 %v7144_v24  ;;  %2091 = vmatpush.msrb.mxu3 %v2090_v60  ;;  %v2108_v24 = vand.u32 4294901760, %v2107_v28  ;;  %v2130_v60 = vand.u32 4294901760, %v7454_v13  ;;  %v2136_v28 = vand.u32 4294901760, %v7467_v26 }
 0x107   :  { %1954 = vmatpush.msrb.mxu0 %v10496_v19  ;;  %2042 = vmatpush.msrb.mxu2 %v7357_v4  ;;  %v127_v19 = vld [vmem:[#allocation5 + $0x208] sm:$0xff] }
 0x108   :  { %2001 = vmatpush.msrb.mxu1 %v7151_v2  ;;  %2097 = vmatpush.msrb.mxu3 %v2096_v22  ;;  %v7485_v2 = vand.u32 4294901760, %v135_v23  ;;  %v2125_v22 = vsub.f32 %v7441_v48, %v2124_v62 }
 0x109   :  { %1958 = vmatpush.msrb.mxu0 %v10497_v0  ;;  %2044 = vmatpush.msrb.mxu2 %v7377_v12  ;;  %v2120_v0 = vand.u32 4294901760, %v2119_v42  ;;  %v2137_v42 = vsub.f32 %v7467_v26, %v2136_v28 }
 0x10a   :  { %2003 = vmatpush.msrb.mxu1 %v7161_v20  ;;  %2103 = vmatpush.msrb.mxu3 %v2102_v61  ;;  %v7498_v20 = vand.u32 4294901760, %v131_v25  ;;  %v2131_v61 = vsub.f32 %v7454_v13, %v2130_v60  ;;  %v7509_v38 = vsub.f32 %v135_v23, %v7485_v2 }
 0x10b   :  { %1962 = vmatpush.msrb.mxu0 %v10498_v10  ;;  %2046 = vmatpush.msrb.mxu2 %v7392_v45  ;;  %v2148_v10 = vand.u32 4294901760, %v7493_v18 }
 0x10c   :  { %2005 = vmatpush.msrb.mxu1 %v7171_v46  ;;  %2109 = vmatpush.msrb.mxu3 %v2108_v24  ;;  %v7511_v46 = vand.u32 4294901760, %v127_v19  ;;  %v2126_v24 = vand.u32 4294901760, %v2125_v22  ;;  %v2132_v23 = vand.u32 4294901760, %v2131_v61  ;;  %v10501_v22 = vand.u32 4294901760, %v7287_v21 }
 0x10d   :  { %1966 = vmatpush.msrb.mxu0 %v10499_v51  ;;  %2048 = vmatpush.msrb.mxu2 %v7405_v57  ;;  %v2154_v50 = vand.u32 4294901760, %v7509_v38  ;;  %v10502_v61 = vand.u32 4294901760, %v7299_v16 }
 0x10e   :  { %2007 = vmatpush.msrb.mxu1 %v7182_v40  ;;  %2115 = vmatpush.msrb.mxu3 %v2114_v43  ;;  %v7522_v40 = vsub.f32 %v131_v25, %v7498_v20  ;;  %v2143_v43 = vsub.f32 %v7480_v49, %v2142_v5  ;;  %v2138_v25 = vand.u32 4294901760, %v2137_v42  ;;  %v10504_v42 = vand.u32 4294901760, %v7323_v63 }
 0x10f   :  { %1970 = vmatpush.msrb.mxu0 %v10500_v14  ;;  %2050 = vmatpush.msrb.mxu2 %v7418_v30  ;;  %v2155_v51 = vsub.f32 %v7509_v38, %v2154_v50  ;;  %v10505_v14 = vand.u32 4294901760, %v7338_v3 }
 0x110   :  { %2009 = vmatpush.msrb.mxu1 %v7196_v55  ;;  %2121 = vmatpush.msrb.mxu3 %v2120_v0  ;;  %v7533_v55 = vsub.f32 %v127_v19, %v7511_v46  ;;  %v2149_v0 = vsub.f32 %v7493_v18, %v2148_v10  ;;  %v2144_v21 = vand.u32 4294901760, %v2143_v43  ;;  %v10503_v19 = vand.u32 4294901760, %v7313_v11  ;;  %v366_v43 = vpop.f32.mrf.mxu0 }
 0x111   :  { %1974 = vmatpush.msrb.mxu0 %v10501_v22  ;;  %2052 = vmatpush.msrb.mxu2 %v7431_v35 }
 0x112   :  { %2011 = vmatpush.msrb.mxu1 %v7209_v56  ;;  %2127 = vmatpush.msrb.mxu3 %v2126_v24  ;;  %v2160_v56 = vand.u32 4294901760, %v7522_v40  ;;  %v2166_v16 = vand.u32 4294901760, %v7533_v55  ;;  %v318_v24 = vld [vmem:[#allocation7] sm:$0xf] }
 0x113   :  { %1978 = vmatpush.msrb.mxu0 %v10502_v61  ;;  %2054 = vmatpush.msrb.mxu2 %v7443_v53  ;;  %v320_v11 = vperm.slane %v318_v24, 0  ;;  %v560_v24 = vpop.f32.mrf.mxu3 }
 0x114   :  { %2013 = vmatpush.msrb.mxu1 %v7217_v58  ;;  %2133 = vmatpush.msrb.mxu3 %v2132_v23  ;;  %v2150_v58 = vand.u32 4294901760, %v2149_v0  ;;  %v2156_v23 = vand.u32 4294901760, %v2155_v51  ;;  %v2167_v63 = vsub.f32 %v7533_v55, %v2166_v16  ;;  %v10507_v0 = vld [vmem:[#allocation14_spill] sm:$0xff]  ;;  %v10511_v51 = vld [vmem:[#allocation13_spill] sm:$0xff] }
 0x115   :  { %1982 = vmatpush.msrb.mxu0 %v10503_v19  ;;  %2056 = vmatpush.msrb.mxu2 %v7456_v1  ;;  %v367_v3 = vadd.f32 %v366_v43, %v320_v11  ;;  %v10510_v19 = vand.u32 4294901760, %v7352_v54 }
 0x116   :  { %2015 = vmatpush.msrb.mxu1 %v7230_v7  ;;  %2139 = vmatpush.msrb.mxu3 %v2138_v25  ;;  %v2161_v7 = vsub.f32 %v7522_v40, %v2160_v56  ;;  %v467_v25 = vpop.f32.mrf.mxu1 }
 0x117   :  { %1986 = vmatpush.msrb.mxu0 %v10504_v42  ;;  %2058 = vmatpush.msrb.mxu2 %v7469_v41  ;;  %v468_v61 = vadd.f32 %v467_v25, %v367_v3  ;;  %v10517_v42 = vand.u32 4294901760, %v7403_v59  ;;  %v219_v25 = vld [vmem:[#allocation5 + $0x4e8] sm:$0xff] }
 0x118   :  { %2017 = vmatpush.msrb.mxu1 %v7250_v6  ;;  %2145 = vmatpush.msrb.mxu3 %v2144_v21  ;;  %v10506_v6 = vld [vmem:[#allocation17_spill] sm:$0xff]  ;;  %v2162_v22 = vand.u32 4294901760, %v2161_v7  ;;  %v521_v21 = vpop.f32.mrf.mxu2 }
 0x119   :  { %1990 = vmatpush.msrb.mxu0 %v10505_v14  ;;  %2060 = vmatpush.msrb.mxu2 %v7485_v2 }
 0x11a   :  { %2019 = vmatpush.msrb.mxu1 %v7262_v37  ;;  %2151 = vmatpush.msrb.mxu3 %v2150_v58  ;;  %v2168_v37 = vand.u32 4294901760, %v2167_v63  ;;  %v10514_v58 = vld [vmem:[#allocation12_spill] sm:$0xff] }
 0x11b   :  { %1729 = vmatmul.f32.vlgmr.msra.gmra.mxu0 %v10506_v6  ;;  %2062 = vmatpush.msrb.mxu2 %v7498_v20 }
 0x11c   :  { %2021 = vmatpush.msrb.mxu1 %v7272_v27  ;;  %2177 = vmatpush.msra.mxu0 %v7330_v8  ;;  %v10508_v27 = vand.u32 4294901760, %v7330_v8  ;;  %v522_v8 = vadd.f32 %v521_v21, %v468_v61 }
 0x11d   :  { %2157 = vmatpush.msrb.mxu3 %v2156_v23  ;;  %2064 = vmatpush.msrb.mxu2 %v7511_v46 }
 0x11e   :  { %2023 = vmatpush.msrb.mxu1 %v7284_v15  ;;  %2180 = vmatpush.msra.mxu0 %v7352_v54  ;;  %v10509_v15 = vld [vmem:[#allocation15_spill] sm:$0xff]  ;;  %v10513_v54 = vand.u32 4294901760, %v7370_v9  ;;  %v666_v7 = vpop.f32.mrf.mxu1 }
 0x11f   :  { %2163 = vmatpush.msrb.mxu3 %v2162_v22  ;;  %1884 = vmatmul.f32.vlgmr.msra.gmra.mxu2 %v10507_v0  ;;  %v223_v22 = vld [vmem:[#allocation5 + $0x508] sm:$0xff] }
 0x120   :  { %2183 = vmatpush.msra.mxu0 %v7365_v29  ;;  %2271 = vmatpush.msra.mxu2 %v10508_v27 }
 0x121   :  { %2025 = vmatpush.msrb.mxu1 %v7295_v36  ;;  %2169 = vmatpush.msrb.mxu3 %v2168_v37  ;;  %v10512_v36 = vand.u32 4294901760, %v7365_v29  ;;  %v629_v29 = vpop.f32.mrf.mxu0 }
 0x122   :  { %1923 = vmatmul.f32.vlgmr.msra.gmra.mxu3 %v10509_v15  ;;  %2186 = vmatpush.msra.mxu0 %v7370_v9  ;;  %v10516_v9 = vld [vmem:[#allocation16_spill] sm:$0xff] }
 0x123   :  { %2275 = vmatpush.msra.mxu2 %v10510_v19  ;;  %2338 = vmatpush.msra.mxu3 %v7306_v39 }
 0x124   :  { %2027 = vmatpush.msrb.mxu1 %v7309_v44  ;;  %2189 = vmatpush.msra.mxu0 %v7385_v17  ;;  %v561_v44 = vadd.f32 %v560_v24, %v522_v8  ;;  %v215_v8 = vld [vmem:[#allocation5 + $0x4c8] sm:$0xff] }
 0x125   :  { %1830 = vmatmul.f32.vlgmr.msra.gmra.mxu1 %v10511_v51  ;;  %2279 = vmatpush.msra.mxu2 %v10512_v36 }
 0x126   :  { %2230 = vmatpush.msra.mxu1 %v7306_v39  ;;  %2340 = vmatpush.msra.mxu3 %v7325_v52  ;;  %v10515_v39 = vand.u32 4294901760, %v7385_v17 }
 0x127   :  { %2192 = vmatpush.msra.mxu0 %v7403_v59  ;;  %2283 = vmatpush.msra.mxu2 %v10513_v54  ;;  %v707_v59 = vpop.f32.mrf.mxu2 }
 0x128   :  { %2232 = vmatpush.msra.mxu1 %v7325_v52  ;;  %2342 = vmatpush.msra.mxu3 %v7340_v34  ;;  %v630_v52 = vadd.f32 %v629_v29, %v561_v44  ;;  %v7715_v44 = vand.u32 4294901760, %v219_v25 }
 0x129   :  { %2070 = vmatmul.f32.vlgmr.msrb.gmra.mxu2 %v10514_v58  ;;  %2195 = vmatpush.msra.mxu0 %v7416_v33 }
 0x12a   :  { %2234 = vmatpush.msra.mxu1 %v7340_v34  ;;  %2287 = vmatpush.msra.mxu2 %v10515_v39  ;;  %v10518_v34 = vand.u32 4294901760, %v7416_v33  ;;  %v667_v17 = vadd.f32 %v666_v7, %v630_v52  ;;  %v211_v52 = vld [vmem:[#allocation5 + $0x4a8] sm:$0xff] }
 0x12b   :  { %2344 = vmatpush.msra.mxu3 %v7344_v47  ;;  %1992 = vmatmul.f32.vlgmr.msrb.gmra.mxu0 %v10511_v51 }
 0x12c   :  { %2171 = vmatmul.f32.vlgmr.msrb.gmra.mxu3 %v10516_v9  ;;  %2198 = vmatpush.msra.mxu0 %v7429_v32  ;;  %v708_v33 = vadd.f32 %v707_v59, %v667_v17 }
 0x12d   :  { %2236 = vmatpush.msra.mxu1 %v7344_v47  ;;  %2291 = vmatpush.msra.mxu2 %v10517_v42  ;;  %v247_v47 = vld [vmem:[#allocation5 + $0x5c8] sm:$0xff] }
 0x12e   :  { %2346 = vmatpush.msra.mxu3 %v7357_v4  ;;  %2029 = vmatmul.f32.vlgmr.msrb.gmra.mxu1 %v10511_v51 }
 0x12f   :  { %2201 = vmatpush.msra.mxu0 %v7441_v48  ;;  %2238 = vmatpush.msra.mxu1 %v7357_v4  ;;  %v251_v4 = vld [vmem:[#allocation5 + $0x5e8] sm:$0xff]  ;;  %v862_v48 = vpop.f32.mrf.mxu0  ;;  %v970_v23 = vpop.f32.mrf.mxu2 }
 0x130   :  { %2295 = vmatpush.msra.mxu2 %v10518_v34  ;;  %2348 = vmatpush.msra.mxu3 %v7377_v12  ;;  %v7629_v32 = vand.u32 4294901760, %v251_v4  ;;  %v7728_v34 = vand.u32 4294901760, %v215_v8 }
 0x131   :  { %2204 = vmatpush.msra.mxu0 %v7454_v13  ;;  %2240 = vmatpush.msra.mxu1 %v7377_v12  ;;  %v808_v12 = vpop.f32.mrf.mxu3  ;;  %v239_v13 = vld [vmem:[#allocation5 + $0x588] sm:$0xff] }
 0x132   :  { %2299 = vmatpush.msra.mxu2 %v2118_v31  ;;  %2350 = vmatpush.msra.mxu3 %v7392_v45  ;;  %v809_v31 = vadd.f32 %v808_v12, %v708_v33  ;;  %v207_v33 = vld [vmem:[#allocation5 + $0x488] sm:$0xff] }
 0x133   :  { %2207 = vmatpush.msra.mxu0 %v7467_v26  ;;  %2242 = vmatpush.msra.mxu1 %v7392_v45  ;;  %v243_v45 = vld [vmem:[#allocation5 + $0x5a8] sm:$0xff]  ;;  %v7646_v26 = vsub.f32 %v251_v4, %v7629_v32  ;;  %v10520_v4 = vld [vmem:[#allocation19_spill] sm:$0xff] }
 0x134   :  { %2303 = vmatpush.msra.mxu2 %v2124_v62  ;;  %2352 = vmatpush.msra.mxu3 %v7405_v57  ;;  %v901_v62 = vpop.f32.mrf.mxu1 }
 0x135   :  { %2210 = vmatpush.msra.mxu0 %v7480_v49  ;;  %2244 = vmatpush.msra.mxu1 %v7405_v57  ;;  %v7636_v57 = vand.u32 4294901760, %v247_v47 }
 0x136   :  { %2307 = vmatpush.msra.mxu2 %v2130_v60  ;;  %2354 = vmatpush.msra.mxu3 %v7418_v30  ;;  %v235_v60 = vld [vmem:[#allocation5 + $0x568] sm:$0xff] }
 0x137   :  { %2213 = vmatpush.msra.mxu0 %v7493_v18  ;;  %2246 = vmatpush.msra.mxu1 %v7418_v30  ;;  %v7643_v30 = vand.u32 4294901760, %v243_v45  ;;  %v7656_v49 = vsub.f32 %v247_v47, %v7636_v57  ;;  %v7660_v14 = vand.u32 4294901760, %v235_v60  ;;  %v1048_v27 = vpop.f32.mrf.mxu0  ;;  %v1203_v47 = vpop.f32.mrf.mxu2 }
 0x138   :  { %2311 = vmatpush.msra.mxu2 %v2136_v28  ;;  %2356 = vmatpush.msra.mxu3 %v7431_v35  ;;  %v863_v28 = vadd.f32 %v862_v48, %v809_v31  ;;  %v7743_v31 = vsub.f32 %v219_v25, %v7715_v44 }
 0x139   :  { %2216 = vmatpush.msra.mxu0 %v7509_v38  ;;  %2248 = vmatpush.msra.mxu1 %v7431_v35  ;;  %v7653_v35 = vand.u32 4294901760, %v239_v13  ;;  %v7667_v18 = vsub.f32 %v243_v45, %v7643_v30  ;;  %v10287_v38 = vand.u32 4294901760, %v7656_v49  ;;  %v1007_v3 = vpop.f32.mrf.mxu3  ;;  %v7739_v45 = vand.u32 4294901760, %v211_v52 }
 0x13a   :  { %2315 = vmatpush.msra.mxu2 %v2142_v5  ;;  %2358 = vmatpush.msra.mxu3 %v7443_v53  ;;  %v231_v5 = vld [vmem:[#allocation5 + $0x548] sm:$0xff]  ;;  %v902_v11 = vadd.f32 %v901_v62, %v863_v28  ;;  %v7751_v28 = vand.u32 4294901760, %v207_v33  ;;  %v10277_v25 = vand.u32 4294901760, %v7743_v31 }
 0x13b   :  { %2219 = vmatpush.msra.mxu0 %v7522_v40  ;;  %2250 = vmatpush.msra.mxu1 %v7443_v53  ;;  %v10288_v53 = vand.u32 4294901760, %v7646_v26  ;;  %v7671_v63 = vand.u32 4294901760, %v231_v5  ;;  %v10286_v37 = vand.u32 4294901760, %v7667_v18  ;;  %v203_v62 = vld [vmem:[#allocation5 + $0x468] sm:$0xff] }
 0x13c   :  { %2319 = vmatpush.msra.mxu2 %v2148_v10  ;;  %2360 = vmatpush.msra.mxu3 %v7456_v1  ;;  %v10519_v10 = vld [vmem:[#allocation18_spill] sm:$0xff]  ;;  %v971_v43 = vadd.f32 %v970_v23, %v902_v11  ;;  %v1149_v36 = vpop.f32.mrf.mxu1  ;;  %v7755_v11 = vsub.f32 %v215_v8, %v7728_v34 }
 0x13d   :  { %2222 = vmatpush.msra.mxu0 %v7533_v55  ;;  %2252 = vmatpush.msra.mxu1 %v7456_v1  ;;  %v227_v1 = vld [vmem:[#allocation5 + $0x528] sm:$0xff]  ;;  %v2418_v40 = vsub.f32 %v7646_v26, %v10288_v53  ;;  %v2424_v55 = vsub.f32 %v7656_v49, %v10287_v38  ;;  %v2430_v54 = vsub.f32 %v7667_v18, %v10286_v37 }
 0x13e   :  { %2323 = vmatpush.msra.mxu2 %v2154_v50  ;;  %2362 = vmatpush.msra.mxu3 %v7469_v41  ;;  %v7678_v50 = vsub.f32 %v239_v13, %v7653_v35  ;;  %v1008_v21 = vadd.f32 %v1007_v3, %v971_v43  ;;  %v199_v43 = vld [vmem:[#allocation5 + $0x448] sm:$0xff] }
 0x13f   :  { %2225 = vmatmul.f32.vlgmr.msra.gmra.mxu0 %v10519_v10  ;;  %2254 = vmatpush.msra.mxu1 %v7469_v41  ;;  %v7683_v41 = vsub.f32 %v235_v60, %v7660_v14  ;;  %v2419_v24 = vand.u32 4294901760, %v2418_v40  ;;  %v2425_v42 = vand.u32 4294901760, %v2424_v55  ;;  %v2431_v12 = vand.u32 4294901760, %v2430_v54 }
 0x140   :  { %2375 = vmatpush.msrb.mxu0 %v7629_v32  ;;  %2327 = vmatpush.msra.mxu2 %v2160_v56  ;;  %v7691_v56 = vand.u32 4294901760, %v227_v1  ;;  %v10284_v61 = vand.u32 4294901760, %v7678_v50  ;;  %v7763_v40 = vand.u32 4294901760, %v203_v62  ;;  %v7779_v54 = vsub.f32 %v207_v33, %v7751_v28 }
 0x141   :  { %2364 = vmatpush.msra.mxu3 %v7485_v2  ;;  %2256 = vmatpush.msra.mxu1 %v7485_v2  ;;  %v7697_v2 = vsub.f32 %v231_v5, %v7671_v63  ;;  %v10283_v19 = vand.u32 4294901760, %v7683_v41 }
 0x142   :  { %2377 = vmatpush.msrb.mxu0 %v7636_v57  ;;  %2331 = vmatpush.msra.mxu2 %v2166_v16  ;;  %v7704_v16 = vand.u32 4294901760, %v223_v22  ;;  %v7718_v29 = vsub.f32 %v227_v1, %v7691_v56  ;;  %v2436_v7 = vsub.f32 %v7678_v50, %v10284_v61  ;;  %v7789_v33 = vsub.f32 %v203_v62, %v7763_v40 }
 0x143   :  { %2366 = vmatpush.msra.mxu3 %v7498_v20  ;;  %2333 = vmatmul.f32.vlgmr.msra.gmra.mxu2 %v10516_v9  ;;  %v10281_v39 = vand.u32 4294901760, %v7697_v2  ;;  %v10282_v62 = vand.u32 4294901760, %v7779_v54 }
 0x144   :  { %2379 = vmatpush.msrb.mxu0 %v7643_v30  ;;  %2518 = vmatpush.msrb.mxu2 %v7646_v26  ;;  %v7731_v17 = vsub.f32 %v223_v22, %v7704_v16  ;;  %v10280_v48 = vand.u32 4294901760, %v7718_v29  ;;  %v2437_v60 = vand.u32 4294901760, %v2436_v7  ;;  %v1242_v22 = vpop.f32.mrf.mxu3 }
 0x145   :  { %2258 = vmatpush.msra.mxu1 %v7498_v20  ;;  %2368 = vmatpush.msra.mxu3 %v7511_v46  ;;  %v1049_v20 = vadd.f32 %v1048_v27, %v1008_v21  ;;  %v2448_v13 = vsub.f32 %v7697_v2, %v10281_v39  ;;  %v7767_v27 = vsub.f32 %v211_v52, %v7739_v45  ;;  %v1311_v21 = vpop.f32.mrf.mxu0 }
 0x146   :  { %2370 = vmatmul.f32.vlgmr.msra.gmra.mxu3 %v10516_v9  ;;  %2381 = vmatpush.msrb.mxu0 %v7653_v35  ;;  %v10279_v5 = vand.u32 4294901760, %v7731_v17  ;;  %v2454_v3 = vsub.f32 %v7718_v29, %v10280_v48  ;;  %v303_v48 = vld [vmem:[#allocation5 + $0x788] sm:$0xff]  ;;  %v10525_v9 = vld [vmem:[#allocation23_spill] sm:$0xff] }
 0x147   :  { %2521 = vmatpush.msrb.mxu2 %v7656_v49  ;;  %2571 = vmatpush.msrb.mxu3 %v7629_v32  ;;  %v1150_v59 = vadd.f32 %v1149_v36, %v1049_v20  ;;  %v2449_v55 = vand.u32 4294901760, %v2448_v13  ;;  %v7775_v36 = vand.u32 4294901760, %v199_v43  ;;  %v195_v20 = vld [vmem:[#allocation5 + $0x428] sm:$0xff] }
 0x148   :  { %2260 = vmatpush.msra.mxu1 %v7511_v46  ;;  %2383 = vmatpush.msrb.mxu0 %v7660_v14  ;;  %v2442_v46 = vsub.f32 %v7683_v41, %v10283_v19  ;;  %v2460_v8 = vsub.f32 %v7731_v17, %v10279_v5  ;;  %v2455_v7 = vand.u32 4294901760, %v2454_v3  ;;  %v7793_v13 = vand.u32 4294901760, %v195_v20 }
 0x149   :  { %2264 = vmatmul.f32.vlgmr.msra.gmra.mxu1 %v10520_v4  ;;  %2524 = vmatpush.msrb.mxu2 %v7667_v18  ;;  %v1204_v23 = vadd.f32 %v1203_v47, %v1150_v59  ;;  %v2466_v59 = vsub.f32 %v7743_v31, %v10277_v25  ;;  %v315_v47 = vld [vmem:[#allocation5 + $0x7e8] sm:$0xff] }
 0x14a   :  { %2420 = vmatpush.msrb.mxu1 %v2419_v24  ;;  %2573 = vmatpush.msrb.mxu3 %v7636_v57  ;;  %v2443_v1 = vand.u32 4294901760, %v2442_v46  ;;  %v10276_v24 = vand.u32 4294901760, %v7755_v11  ;;  %v10278_v46 = vand.u32 4294901760, %v7767_v27 }
 0x14b   :  { %2385 = vmatpush.msrb.mxu0 %v7671_v63  ;;  %2527 = vmatpush.msrb.mxu2 %v7678_v50  ;;  %v1243_v52 = vadd.f32 %v1242_v22, %v1204_v23  ;;  %v2461_v23 = vand.u32 4294901760, %v2460_v8  ;;  %v7801_v22 = vsub.f32 %v199_v43, %v7775_v36  ;;  %v2467_v8 = vand.u32 4294901760, %v2466_v59 }
 0x14c   :  { %2426 = vmatpush.msrb.mxu1 %v2425_v42  ;;  %2575 = vmatpush.msrb.mxu3 %v7643_v30  ;;  %v1348_v42 = vpop.f32.mrf.mxu1  ;;  %v10285_v43 = vand.u32 4294901760, %v7789_v33  ;;  %v2484_v59 = vsub.f32 %v7779_v54, %v10282_v62 }
 0x14d   :  { %2387 = vmatpush.msrb.mxu0 %v7691_v56  ;;  %2530 = vmatpush.msrb.mxu2 %v7683_v41 }
 0x14e   :  { %2432 = vmatpush.msrb.mxu1 %v2431_v12  ;;  %2577 = vmatpush.msrb.mxu3 %v7653_v35  ;;  %v1312_v12 = vadd.f32 %v1311_v21, %v1243_v52  ;;  %v7805_v21 = vand.u32 4294901760, %v315_v47  ;;  %v1389_v52 = vpop.f32.mrf.mxu2  ;;  %v2490_v62 = vsub.f32 %v7789_v33, %v10285_v43 }
 0x14f   :  { %2389 = vmatpush.msrb.mxu0 %v7704_v16  ;;  %2533 = vmatpush.msrb.mxu2 %v7697_v2 }
 0x150   :  { %2438 = vmatpush.msrb.mxu1 %v2437_v60  ;;  %2579 = vmatpush.msrb.mxu3 %v7660_v14  ;;  %v191_v60 = vld [vmem:[#allocation5 + $0x408] sm:$0xff]  ;;  %v1349_v3 = vadd.f32 %v1348_v42, %v1312_v12  ;;  %v7817_v42 = vsub.f32 %v195_v20, %v7793_v13  ;;  %v7829_v20 = vsub.f32 %v315_v47, %v7805_v21 }
 0x151   :  { %2391 = vmatpush.msrb.mxu0 %v7715_v44  ;;  %2536 = vmatpush.msrb.mxu2 %v7718_v29  ;;  %v7811_v25 = vand.u32 4294901760, %v191_v60  ;;  %v307_v12 = vld [vmem:[#allocation5 + $0x7a8] sm:$0xff] }
 0x152   :  { %2444 = vmatpush.msrb.mxu1 %v2443_v1  ;;  %2581 = vmatpush.msrb.mxu3 %v7671_v63  ;;  %v2472_v1 = vsub.f32 %v7755_v11, %v10276_v24  ;;  %v2478_v24 = vsub.f32 %v7767_v27, %v10278_v46  ;;  %v10289_v46 = vand.u32 4294901760, %v7801_v22  ;;  %v1390_v39 = vadd.f32 %v1389_v52, %v1349_v3  ;;  %v299_v52 = vld [vmem:[#allocation5 + $0x768] sm:$0xff] }
 0x153   :  { %2393 = vmatpush.msrb.mxu0 %v7728_v34  ;;  %2539 = vmatpush.msrb.mxu2 %v7731_v17  ;;  %v7836_v19 = vsub.f32 %v191_v60, %v7811_v25  ;;  %v7838_v3 = vand.u32 4294901760, %v307_v12  ;;  %v7855_v53 = vand.u32 4294901760, %v299_v52 }
 0x154   :  { %2450 = vmatpush.msrb.mxu1 %v2449_v55  ;;  %2583 = vmatpush.msrb.mxu3 %v7691_v56  ;;  %v311_v55 = vld [vmem:[#allocation5 + $0x7c8] sm:$0xff]  ;;  %v2496_v60 = vsub.f32 %v7801_v22, %v10289_v46 }
 0x155   :  { %2395 = vmatpush.msrb.mxu0 %v7739_v45  ;;  %2542 = vmatpush.msrb.mxu2 %v7743_v31  ;;  %v7824_v5 = vand.u32 4294901760, %v311_v55  ;;  %10522 = vst [vmem:[#allocation29_spill] sm:$0xff] %v7838_v3  ;;  %v7860_v46 = vsub.f32 %v307_v12, %v7838_v3  ;;  %v10528_v12 = vand.u32 4294901760, %v7836_v19 }
 0x156   :  { %2456 = vmatpush.msrb.mxu1 %v2455_v7  ;;  %2585 = vmatpush.msrb.mxu3 %v7704_v16  ;;  %v2473_v7 = vand.u32 4294901760, %v2472_v1  ;;  %v2479_v1 = vand.u32 4294901760, %v2478_v24  ;;  %v2485_v24 = vand.u32 4294901760, %v2484_v59  ;;  %v1544_v61 = vpop.f32.mrf.mxu0  ;;  %v2491_v59 = vand.u32 4294901760, %v2490_v62 }
 0x157   :  { %2397 = vmatpush.msrb.mxu0 %v7751_v28  ;;  %2545 = vmatpush.msrb.mxu2 %v7755_v11  ;;  %10521 = vst [vmem:[#allocation28_spill] sm:$0xff] %v7824_v5  ;;  %v7850_v43 = vsub.f32 %v311_v55, %v7824_v5  ;;  %v10524_v55 = vand.u32 4294901760, %v7817_v42  ;;  %v2497_v62 = vand.u32 4294901760, %v2496_v60  ;;  %v10527_v60 = vand.u32 4294901760, %v7646_v26  ;;  %v283_v26 = vld [vmem:[#allocation5 + $0x6e8] sm:$0xff] }
 0x158   :  { %2462 = vmatpush.msrb.mxu1 %v2461_v23  ;;  %2587 = vmatpush.msrb.mxu3 %v7715_v44  ;;  %v1490_v23 = vpop.f32.mrf.mxu3  ;;  %v2508_v58 = vsub.f32 %v7836_v19, %v10528_v12 }
 0x159   :  { %2399 = vmatpush.msrb.mxu0 %v7763_v40  ;;  %2548 = vmatpush.msrb.mxu2 %v7767_v27  ;;  %v1491_v37 = vadd.f32 %v1490_v23, %v1390_v39  ;;  %v2502_v23 = vsub.f32 %v7817_v42, %v10524_v55  ;;  %v287_v55 = vld [vmem:[#allocation5 + $0x708] sm:$0xff]  ;;  %v10530_v12 = vand.u32 4294901760, %v7850_v43 }
 0x15a   :  { %2468 = vmatpush.msrb.mxu1 %v2467_v8  ;;  %2589 = vmatpush.msrb.mxu3 %v7728_v34  ;;  %v7843_v8 = vand.u32 4294901760, %v303_v48  ;;  %v7901_v15 = vand.u32 4294901760, %v287_v55 }
 0x15b   :  { %2401 = vmatpush.msrb.mxu0 %v7775_v36  ;;  %2551 = vmatpush.msrb.mxu2 %v7779_v54  ;;  %v1545_v39 = vadd.f32 %v1544_v61, %v1491_v37  ;;  %v10526_v37 = vand.u32 4294901760, %v7829_v20 }
 0x15c   :  { %10523 = vst [vmem:[#allocation30_spill] sm:$0xff] %v7843_v8  ;;  %2474 = vmatpush.msrb.mxu1 %v2473_v7  ;;  %2591 = vmatpush.msrb.mxu3 %v7739_v45  ;;  %v295_v7 = vld [vmem:[#allocation5 + $0x748] sm:$0xff]  ;;  %v7868_v38 = vsub.f32 %v303_v48, %v7843_v8 }
 0x15d   :  { %2403 = vmatpush.msrb.mxu0 %v7793_v13  ;;  %2554 = vmatpush.msrb.mxu2 %v7789_v33  ;;  %v7872_v10 = vand.u32 4294901760, %v295_v7  ;;  %v2759_v61 = vsub.f32 %v7829_v20, %v10526_v37 }
 0x15e   :  { %2480 = vmatpush.msrb.mxu1 %v2479_v1  ;;  %2593 = vmatpush.msrb.mxu3 %v7751_v28  ;;  %v291_v1 = vld [vmem:[#allocation5 + $0x728] sm:$0xff] }
 0x15f   :  { %2405 = vmatpush.msrb.mxu0 %v7811_v25  ;;  %2557 = vmatpush.msrb.mxu2 %v7801_v22  ;;  %v7888_v51 = vand.u32 4294901760, %v291_v1 }
 0x160   :  { %2486 = vmatpush.msrb.mxu1 %v2485_v24  ;;  %2595 = vmatpush.msrb.mxu3 %v7763_v40  ;;  %v1583_v47 = vpop.f32.mrf.mxu1  ;;  %v1652_v4 = vpop.f32.mrf.mxu2  ;;  %v7880_v24 = vsub.f32 %v299_v52, %v7855_v53 }
 0x161   :  { %2411 = vmatmul.f32.vlgmr.msrb.gmra.mxu0 %v10525_v9  ;;  %2560 = vmatpush.msrb.mxu2 %v7817_v42  ;;  %v1584_v48 = vadd.f32 %v1583_v47, %v1545_v39  ;;  %v2503_v47 = vand.u32 4294901760, %v2502_v23  ;;  %v7899_v9 = vsub.f32 %v295_v7, %v7872_v10  ;;  %v2760_v23 = vand.u32 4294901760, %v2759_v61 }
 0x162   :  { %2612 = vmatpush.msra.mxu0 %v10527_v60  ;;  %2492 = vmatpush.msrb.mxu1 %v2491_v59  ;;  %v10529_v59 = vand.u32 4294901760, %v7656_v49  ;;  %v2765_v60 = vsub.f32 %v7850_v43, %v10530_v12  ;;  %v2509_v12 = vand.u32 4294901760, %v2508_v58  ;;  %v10534_v7 = vand.u32 4294901760, %v7860_v46  ;;  %v275_v58 = vld [vmem:[#allocation5 + $0x6a8] sm:$0xff] }
 0x163   :  { %2597 = vmatpush.msrb.mxu3 %v7775_v36  ;;  %2563 = vmatpush.msrb.mxu2 %v7836_v19  ;;  %v1653_v52 = vadd.f32 %v1652_v4, %v1584_v48  ;;  %v1689_v37 = vpop.f32.mrf.mxu3  ;;  %v10531_v4 = vld [vmem:[#allocation21_spill] sm:$0xff]  ;;  %v7915_v0 = vsub.f32 %v291_v1, %v7888_v51  ;;  %v10536_v61 = vand.u32 4294901760, %v7868_v38  ;;  %v10540_v6 = vand.u32 4294901760, %v7880_v24 }
 0x164   :  { %2616 = vmatpush.msra.mxu0 %v10529_v59  ;;  %2498 = vmatpush.msrb.mxu1 %v2497_v62  ;;  %v279_v59 = vld [vmem:[#allocation5 + $0x6c8] sm:$0xff]  ;;  %v10533_v62 = vand.u32 4294901760, %v7667_v18  ;;  %v2771_v39 = vsub.f32 %v7860_v46, %v10534_v7  ;;  %v2766_v1 = vand.u32 4294901760, %v2765_v60  ;;  %v10541_v60 = vand.u32 4294901760, %v7683_v41 }
 0x165   :  { %2599 = vmatpush.msrb.mxu3 %v7793_v13  ;;  %2566 = vmatmul.f32.vlgmr.msrb.gmra.mxu2 %v10531_v4  ;;  %v7905_v48 = vadd.f32 %v1689_v37, %v1653_v52  ;;  %10535 = vst [vmem:[#allocation32_spill] sm:$0xff] %v7915_v0  ;;  %v7917_v4 = vand.u32 4294901760, %v283_v26  ;;  %v2777_v18 = vsub.f32 %v7868_v38, %v10536_v61  ;;  %v10538_v37 = vld [vmem:[#allocation22_spill] sm:$0xff]  ;;  %v7933_v49 = vand.u32 4294901760, %v279_v59 }
 0x166   :  { %2620 = vmatpush.msra.mxu0 %v10533_v62  ;;  %2716 = vmatpush.msra.mxu2 %v7805_v21  ;;  %v10539_v62 = vand.u32 4294901760, %v7678_v50  ;;  %v271_v50 = vld [vmem:[#allocation5 + $0x688] sm:$0xff]  ;;  %v10543_v41 = vand.u32 4294901760, %v7899_v9 }
 0x167   :  { %10532 = vst [vmem:[#allocation31_spill] sm:$0xff] %v7905_v48  ;;  %2504 = vmatpush.msrb.mxu1 %v2503_v47  ;;  %2601 = vmatpush.msrb.mxu3 %v7811_v25  ;;  %v7924_v52 = vmul.f32 0.70710677, %v7905_v48  ;;  %v7931_v47 = vsub.f32 %v287_v55, %v7901_v15  ;;  %v7945_v7 = vsub.f32 %v283_v26, %v7917_v4  ;;  %v7947_v48 = vand.u32 4294901760, %v275_v58 }
 0x168   :  { %2605 = vmatmul.f32.vlgmr.msrb.gmra.mxu3 %v10538_v37  ;;  %2624 = vmatpush.msra.mxu0 %v10539_v62  ;;  %v2783_v37 = vsub.f32 %v7880_v24, %v10540_v6  ;;  %v2772_v62 = vand.u32 4294901760, %v2771_v39  ;;  %v267_v6 = vld [vmem:[#allocation5 + $0x668] sm:$0xff]  ;;  %v2789_v39 = vsub.f32 %v7899_v9, %v10543_v41  ;;  %v10544_v55 = vand.u32 4294901760, %v7697_v2 }
 0x169   :  { %10537 = vst [vmem:[#allocation33_spill] sm:$0xff] %v7924_v52  ;;  %2718 = vmatpush.msra.mxu2 %v7824_v5  ;;  %2761 = vmatpush.msra.mxu3 %v2760_v23  ;;  %v5792_v61 = vmul.f32 %v7924_v52, %v7924_v52  ;;  %v10542_v23 = vld [vmem:[#allocation20_spill] sm:$0xff]  ;;  %v2778_v52 = vand.u32 4294901760, %v2777_v18  ;;  %v7974_v26 = vsub.f32 %v275_v58, %v7947_v48  ;;  %v7976_v2 = vand.u32 4294901760, %v267_v6 }
 0x16a   :  { %2510 = vmatpush.msrb.mxu1 %v2509_v12  ;;  %2628 = vmatpush.msra.mxu0 %v10541_v60  ;;  %v7959_v12 = vsub.f32 %v279_v59, %v7933_v49  ;;  %v7961_v60 = vand.u32 4294901760, %v271_v50 }
 0x16b   :  { %2512 = vmatmul.f32.vlgmr.msrb.gmra.mxu1 %v10542_v23  ;;  %2720 = vmatpush.msra.mxu2 %v7838_v3  ;;  %v7951_v5 = vmin.f32 %v5792_v61, 16.0  ;;  %v10545_v61 = vand.u32 4294901760, %v7915_v0  ;;  %v259_v3 = vld [vmem:[#allocation5 + $0x628] sm:$0xff] }
 0x16c   :  { %2679 = vmatpush.msra.mxu1 %v7629_v32  ;;  %2767 = vmatpush.msra.mxu3 %v2766_v1  ;;  %v2784_v1 = vand.u32 4294901760, %v2783_v37  ;;  %v2812_v58 = vand.u32 4294901760, %v7959_v12 }
 0x16d   :  { %2632 = vmatpush.msra.mxu0 %v10544_v55  ;;  %2722 = vmatpush.msra.mxu2 %v7843_v8  ;;  %v5794_v18 = vmul.f32 2.1237322e-06, %v7951_v5  ;;  %v5805_v32 = vmul.f32 3.8918573e-05, %v7951_v5  ;;  %v2795_v59 = vsub.f32 %v7915_v0, %v10545_v61  ;;  %v263_v55 = vld [vmem:[#allocation5 + $0x648] sm:$0xff]  ;;  %v10546_v8 = vand.u32 4294901760, %v7718_v29 }
 0x16e   :  { %2681 = vmatpush.msra.mxu1 %v7636_v57  ;;  %2773 = vmatpush.msra.mxu3 %v2772_v62  ;;  %v2790_v62 = vand.u32 4294901760, %v2789_v39  ;;  %v10547_v61 = vand.u32 4294901760, %v7931_v47  ;;  %v7987_v0 = vsub.f32 %v271_v50, %v7961_v60  ;;  %v10549_v39 = vand.u32 4294901760, %v7945_v7 }
 0x16f   :  { %2636 = vmatpush.msra.mxu0 %v10546_v8  ;;  %2724 = vmatpush.msra.mxu2 %v7855_v53  ;;  %v5795_v37 = vadd.f32 0.00028619796, %v5794_v18  ;;  %v5806_v57 = vadd.f32 0.001143296, %v5805_v32  ;;  %v10548_v18 = vand.u32 4294901760, %v7731_v17  ;;  %v2818_v32 = vand.u32 4294901760, %v7974_v26 }
 0x170   :  { %2683 = vmatpush.msra.mxu1 %v7643_v30  ;;  %2779 = vmatpush.msra.mxu3 %v2778_v52  ;;  %v2801_v41 = vsub.f32 %v7931_v47, %v10547_v61  ;;  %v7994_v30 = vand.u32 4294901760, %v263_v55  ;;  %v2796_v52 = vand.u32 4294901760, %v2795_v59  ;;  %v2807_v50 = vsub.f32 %v7945_v7, %v10549_v39 }
 0x171   :  { %v5796_v29 = vmul.f32 %v5795_v37, %v7951_v5  ;;  %v5807_v8 = vmul.f32 %v5806_v57, %v7951_v5  ;;  %2640 = vmatpush.msra.mxu0 %v10548_v18  ;;  %2726 = vmatpush.msra.mxu2 %v7872_v10  ;;  %v8002_v37 = vsub.f32 %v267_v6, %v7976_v2  ;;  %v255_v57 = vld [vmem:[#allocation5 + $0x608] sm:$0xff]  ;;  %v10550_v61 = vand.u32 4294901760, %v7743_v31 }
 0x172   :  { %2685 = vmatpush.msra.mxu1 %v7653_v35  ;;  %2785 = vmatpush.msra.mxu3 %v2784_v1  ;;  %v8007_v18 = vand.u32 4294901760, %v259_v3  ;;  %v2802_v1 = vand.u32 4294901760, %v2801_v41  ;;  %v2813_v59 = vsub.f32 %v7959_v12, %v2812_v58  ;;  %v2824_v6 = vand.u32 4294901760, %v7987_v0 }
 0x173   :  { %v5808_v17 = vadd.f32 0.014752088, %v5807_v8  ;;  %2644 = vmatpush.msra.mxu0 %v10550_v61  ;;  %2728 = vmatpush.msra.mxu2 %v7888_v51  ;;  %v5797_v35 = vadd.f32 0.0036580483, %v5796_v29  ;;  %v10551_v31 = vand.u32 4294901760, %v7755_v11  ;;  %v8019_v39 = vsub.f32 %v263_v55, %v7994_v30 }
 0x174   :  { %2687 = vmatpush.msra.mxu1 %v7660_v14  ;;  %2791 = vmatpush.msra.mxu3 %v2790_v62  ;;  %v8021_v29 = vand.u32 4294901760, %v255_v57  ;;  %v2808_v14 = vand.u32 4294901760, %v2807_v50  ;;  %v2819_v41 = vsub.f32 %v7974_v26, %v2818_v32  ;;  %v2830_v62 = vand.u32 4294901760, %v8002_v37 }
 0x175   :  { %v5809_v8 = vmul.f32 %v5808_v17, %v7951_v5  ;;  %2648 = vmatpush.msra.mxu0 %v10551_v31  ;;  %2730 = vmatpush.msra.mxu2 %v7901_v15  ;;  %v10552_v11 = vand.u32 4294901760, %v7767_v27  ;;  %v8032_v55 = vsub.f32 %v259_v3, %v8007_v18  ;;  %v5798_v61 = vmul.f32 %v5797_v35, %v7951_v5 }
 0x176   :  { %2689 = vmatpush.msra.mxu1 %v7671_v63  ;;  %2797 = vmatpush.msra.mxu3 %v2796_v52  ;;  %v2814_v63 = vand.u32 4294901760, %v2813_v59  ;;  %v2825_v52 = vsub.f32 %v7987_v0, %v2824_v6  ;;  %v10553_v27 = vand.u32 4294901760, %v7779_v54  ;;  %v2836_v3 = vand.u32 4294901760, %v8019_v39 }
 0x177   :  { %v5810_v17 = vadd.f32 0.112945676, %v5809_v8  ;;  %2652 = vmatpush.msra.mxu0 %v10552_v11  ;;  %2732 = vmatpush.msra.mxu2 %v7917_v4  ;;  %v8045_v8 = vsub.f32 %v255_v57, %v8021_v29  ;;  %v2831_v35 = vsub.f32 %v8002_v37, %v2830_v62  ;;  %v10554_v59 = vand.u32 4294901760, %v7789_v33 }
 0x178   :  { %2691 = vmatpush.msra.mxu1 %v7691_v56  ;;  %2803 = vmatpush.msra.mxu3 %v2802_v1  ;;  %v2820_v56 = vand.u32 4294901760, %v2819_v41  ;;  %v2842_v54 = vand.u32 4294901760, %v8032_v55  ;;  %v5799_v31 = vadd.f32 0.05243302, %v5798_v61  ;;  %v2826_v57 = vand.u32 4294901760, %v2825_v52 }
 0x179   :  { %v5811_v50 = vmul.f32 %v5810_v17, %v7951_v5  ;;  %2656 = vmatpush.msra.mxu0 %v10553_v27  ;;  %2734 = vmatpush.msra.mxu2 %v7933_v49  ;;  %v2837_v33 = vsub.f32 %v8019_v39, %v2836_v3  ;;  %v2848_v41 = vand.u32 4294901760, %v8045_v8  ;;  %v2832_v17 = vand.u32 4294901760, %v2831_v35 }
 0x17a   :  { %2693 = vmatpush.msra.mxu1 %v7704_v16  ;;  %2809 = vmatpush.msra.mxu3 %v2808_v14  ;;  %v10555_v14 = vand.u32 4294901760, %v7801_v22  ;;  %v10556_v11 = vand.u32 4294901760, %v7817_v42  ;;  %v2843_v22 = vsub.f32 %v8032_v55, %v2842_v54  ;;  %v5800_v61 = vmul.f32 %v5799_v31, %v7951_v5 }
 0x17b   :  { %v5812_v1 = vadd.f32 0.4994258, %v5811_v50  ;;  %2660 = vmatpush.msra.mxu0 %v10554_v59  ;;  %2736 = vmatpush.msra.mxu2 %v7947_v48  ;;  %v2849_v42 = vsub.f32 %v8045_v8, %v2848_v41  ;;  %v10558_v50 = vld [vmem:[#allocation27_spill] sm:$0xff]  ;;  %v10559_v35 = vand.u32 4294901760, %v7829_v20  ;;  %v10561_v59 = vand.u32 4294901760, %v7850_v43 }
 0x17c   :  { %2695 = vmatpush.msra.mxu1 %v7715_v44  ;;  %2815 = vmatpush.msra.mxu3 %v2814_v63  ;;  %v2838_v63 = vand.u32 4294901760, %v2837_v33  ;;  %v5801_v52 = vadd.f32 0.18741608, %v5800_v61  ;;  %v10569_v61 = vld [vmem:[#allocation30_spill] sm:$0xff] }
 0x17d   :  { %v5813_v16 = vmul.f32 %v5812_v1, %v7951_v5  ;;  %2664 = vmatpush.msra.mxu0 %v10555_v14  ;;  %2738 = vmatpush.msra.mxu2 %v7961_v60  ;;  %v10560_v1 = vld [vmem:[#allocation24_spill] sm:$0xff]  ;;  %v10564_v14 = vand.u32 4294901760, %v7868_v38 }
 0x17e   :  { %2697 = vmatpush.msra.mxu1 %v7728_v34  ;;  %2821 = vmatpush.msra.mxu3 %v2820_v56  ;;  %v10557_v34 = vand.u32 4294901760, %v7836_v19  ;;  %v2850_v19 = vand.u32 4294901760, %v2849_v42  ;;  %v5802_v27 = vmul.f32 %v5801_v52, %v7951_v5 }
 0x17f   :  { %v5814_v44 = vadd.f32 1.0, %v5813_v16  ;;  %2668 = vmatpush.msra.mxu0 %v10556_v11  ;;  %2740 = vmatpush.msra.mxu2 %v7976_v2  ;;  %v10567_v11 = vld [vmem:[#allocation32_spill] sm:$0xff] }
 0x180   :  { %2699 = vmatpush.msra.mxu1 %v7739_v45  ;;  %2827 = vmatpush.msra.mxu3 %v2826_v57  ;;  %v2844_v45 = vand.u32 4294901760, %v2843_v22  ;;  %v5803_v5 = vadd.f32 1.1283791, %v5802_v27 }
 0x181   :  { %5992 = vrcp.f32 %v5814_v44  ;;  %2672 = vmatpush.msra.mxu0 %v10557_v34  ;;  %2742 = vmatpush.msra.mxu2 %v7994_v30  ;;  %v5824_v57 = vand.u32 2147483647, %v5814_v44  ;;  %vm5820_vm1 = vweird.f32 %v5814_v44 }
 0x182   :  { %2701 = vmatpush.msra.mxu1 %v7751_v28  ;;  %2833 = vmatpush.msra.mxu3 %v2832_v17 }
 0x183   :  { %2674 = vmatmul.f32.vlgmr.msra.gmra.mxu0 %v10542_v23  ;;  %2744 = vmatpush.msra.mxu2 %v8007_v18  ;;  %vm5825_vm3 = vcmp.eq.f32.partialorder %v5824_v57, 8.507059e+37 }
 0x184   :  { %2859 = vmatpush.msrb.mxu0 %v7829_v20  ;;  %2703 = vmatpush.msra.mxu1 %v7763_v40 }
 0x185   :  { %2839 = vmatpush.msra.mxu3 %v2838_v63  ;;  %2746 = vmatpush.msra.mxu2 %v8021_v29  ;;  %v10572_v63 = vld [vmem:[#allocation31_spill] sm:$0xff] }
 0x186   :  { %2862 = vmatpush.msrb.mxu0 %v7850_v43  ;;  %2705 = vmatpush.msra.mxu1 %v7775_v36  ;;  %v5826_v36 = vand.u32 2147483648, %v5814_v44  ;;  %v10563_v43 = vld [vmem:[#allocation28_spill] sm:$0xff]  ;;  %v5784_v42 = vmul.f32 0.5, %v10572_v63 }
 0x187   :  { %v5993_v28 = vpop.eup %5992  ;;  %2845 = vmatpush.msra.mxu3 %v2844_v45  ;;  %2752 = vmatmul.f32.vlgmr.msra.gmra.mxu2 %v10558_v50 }
 0x188   :  { %v5816_v56 = vmul.f32 %v5993_v28, %v5814_v44  ;;  %2865 = vmatpush.msrb.mxu0 %v7860_v46  ;;  %2953 = vmatpush.msrb.mxu2 %v10559_v35  ;;  %vm5821_vm0 = vweird.f32 %v5993_v28  ;;  %v5827_v16 = vor.u32 1.1754944e-38, %v5826_v36 }
 0x189   :  { %2707 = vmatpush.msra.mxu1 %v7793_v13  ;;  %2851 = vmatpush.msra.mxu3 %v2850_v19  ;;  %v10562_v13 = vand.u32 4294901760, %v7860_v46  ;;  %vm5822_vm2 = vmor %vm5820_vm1, %vm5821_vm0  ;;  %v10566_v46 = vld [vmem:[#allocation29_spill] sm:$0xff]  ;;  %v10574_v19 = vand.u32 4294901760, %v7945_v7 }
 0x18a   :  { %v5817_v40 = vsub.f32 1.0, %v5816_v56  ;;  %2853 = vmatmul.f32.vlgmr.msra.gmra.mxu3 %v10560_v1  ;;  %2868 = vmatpush.msrb.mxu0 %v7868_v38  ;;  %v10570_v38 = vand.u32 4294901760, %v7899_v9  ;;  %v92_v56 = vld [vmem:[#allocation5 + $0xf0] sm:$0xff] }
 0x18b   :  { %2957 = vmatpush.msrb.mxu2 %v10561_v59  ;;  %3020 = vmatpush.msrb.mxu3 %v7805_v21  ;;  %v8222_v36 = vand.u32 4294901760, %v92_v56 }
 0x18c   :  { %v5818_v31 = vmul.f32 %v5993_v28, %v5817_v40  ;;  %2709 = vmatpush.msra.mxu1 %v7811_v25  ;;  %2871 = vmatpush.msrb.mxu0 %v7880_v24  ;;  %v10565_v25 = vld [vmem:[#allocation33_spill] sm:$0xff] }
 0x18d   :  { %2711 = vmatmul.f32.vlgmr.msra.gmra.mxu1 %v10542_v23  ;;  %2961 = vmatpush.msrb.mxu2 %v10562_v13  ;;  %v5804_v33 = vmul.f32 %v5803_v5, %v10565_v25  ;;  %v88_v40 = vld [vmem:[#allocation5 + $0xd0] sm:$0xff] }
 0x18e   :  { %v5819_v20 = vadd.f32 %v5993_v28, %v5818_v31  ;;  %2912 = vmatpush.msrb.mxu1 %v7805_v21  ;;  %3022 = vmatpush.msrb.mxu3 %v10563_v43  ;;  %v10568_v21 = vand.u32 4294901760, %v7880_v24  ;;  %v10571_v24 = vand.u32 4294901760, %v10567_v11  ;;  %v84_v13 = vld [vmem:[#allocation5 + $0xb0] sm:$0xff] }
 0x18f   :  { %2874 = vmatpush.msrb.mxu0 %v7899_v9  ;;  %2965 = vmatpush.msrb.mxu2 %v10564_v14  ;;  %v10573_v9 = vand.u32 4294901760, %v7931_v47  ;;  %v10576_v25 = vld [vmem:[#allocation26_spill] sm:$0xff] }
 0x190   :  { %v5823_v17 = vsel %vm5822_vm2, %v5993_v28, %v5819_v20  ;;  %2914 = vmatpush.msrb.mxu1 %v10563_v43  ;;  %3024 = vmatpush.msrb.mxu3 %v10566_v46  ;;  %v124_v28 = vld [vmem:[#allocation5 + $0x1f0] sm:$0xff] }
 0x191   :  { %v5828_v44 = vsel %vm5825_vm3, %v5827_v16, %v5823_v17  ;;  %2877 = vmatpush.msrb.mxu0 %v10567_v11  ;;  %2969 = vmatpush.msrb.mxu2 %v10568_v21  ;;  %v140_v23 = vld [vmem:[#allocation5 + $0x270] sm:$0xff] }
 0x192   :  { %v5829_v22 = vmul.f32 %v5828_v44, %v5804_v33  ;;  %2916 = vmatpush.msrb.mxu1 %v10566_v46  ;;  %3026 = vmatpush.msrb.mxu3 %v10569_v61  ;;  %v8249_v33 = vsub.f32 %v92_v56, %v8222_v36  ;;  %v8255_v44 = vand.u32 4294901760, %v84_v13 }
 0x193   :  { %2880 = vmatpush.msrb.mxu0 %v7931_v47  ;;  %2973 = vmatpush.msrb.mxu2 %v10570_v38 }
 0x194   :  { %v5982_v34 = vclamps-f32 %v5829_v22, 1.0  ;;  %2918 = vmatpush.msrb.mxu1 %v10569_v61  ;;  %3028 = vmatpush.msrb.mxu3 %v7855_v53  ;;  %v76_v22 = vld [vmem:[#allocation5 + $0x70] sm:$0xff]  ;;  %v10304_v63 = vand.u32 4294901760, %v8249_v33 }
 0x195   :  { %2883 = vmatpush.msrb.mxu0 %v7945_v7  ;;  %2977 = vmatpush.msrb.mxu2 %v10571_v24 }
 0x196   :  { %v5952_v45 = vadd.f32 1.0, %v5982_v34  ;;  %2920 = vmatpush.msrb.mxu1 %v7855_v53  ;;  %3030 = vmatpush.msrb.mxu3 %v7872_v10  ;;  %v120_v53 = vld [vmem:[#allocation5 + $0x1d0] sm:$0xff] }
 0x197   :  { %2886 = vmatpush.msrb.mxu0 %v7959_v12  ;;  %2981 = vmatpush.msrb.mxu2 %v10573_v9  ;;  %v8149_v7 = vand.u32 4294901760, %v120_v53  ;;  %v104_v12 = vld [vmem:[#allocation5 + $0x150] sm:$0xff] }
 0x198   :  { %v5956_v52 = vmul.f32 %v5952_v45, %v5784_v42  ;;  %2922 = vmatpush.msrb.mxu1 %v7872_v10  ;;  %3032 = vmatpush.msrb.mxu3 %v7888_v51  ;;  %v8142_v10 = vand.u32 4294901760, %v124_v28  ;;  %v72_v42 = vld [vmem:[#allocation5 + $0x50] sm:$0xff] }
 0x199   :  { %2889 = vmatpush.msrb.mxu0 %v7974_v26  ;;  %2985 = vmatpush.msrb.mxu2 %v10574_v19  ;;  %v8280_v19 = vsub.f32 %v84_v13, %v8255_v44 }
 0x19a   :  { %5960 = vst [vmem:[#allocation8] sm:$0xff] %v5956_v52  ;;  %2924 = vmatpush.msrb.mxu1 %v7888_v51  ;;  %3034 = vmatpush.msrb.mxu3 %v7901_v15  ;;  %v116_v51 = vld [vmem:[#allocation5 + $0x1b0] sm:$0xff]  ;;  %v8159_v26 = vsub.f32 %v124_v28, %v8142_v10  ;;  %v8277_v52 = vand.u32 4294901760, %v76_v22 }
 0x19b   :  { %2892 = vmatpush.msrb.mxu0 %v7987_v0  ;;  %2989 = vmatpush.msrb.mxu2 %v2812_v58  ;;  %v8156_v47 = vand.u32 4294901760, %v116_v51 }
 0x19c   :  { %2926 = vmatpush.msrb.mxu1 %v7901_v15  ;;  %3036 = vmatpush.msrb.mxu3 %v7917_v4  ;;  %v112_v15 = vld [vmem:[#allocation5 + $0x190] sm:$0xff] }
 0x19d   :  { %2895 = vmatpush.msrb.mxu0 %v8002_v37  ;;  %2993 = vmatpush.msrb.mxu2 %v2818_v32  ;;  %v8166_v0 = vand.u32 4294901760, %v112_v15  ;;  %v8180_v32 = vsub.f32 %v116_v51, %v8156_v47  ;;  %v10575_v37 = vld [vmem:[#allocation25_spill] sm:$0xff] }
 0x19e   :  { %2928 = vmatpush.msrb.mxu1 %v7917_v4  ;;  %3038 = vmatpush.msrb.mxu3 %v7933_v49  ;;  %v108_v4 = vld [vmem:[#allocation5 + $0x170] sm:$0xff] }
 0x19f   :  { %2898 = vmatpush.msrb.mxu0 %v8019_v39  ;;  %2997 = vmatpush.msrb.mxu2 %v2824_v6  ;;  %v8176_v58 = vand.u32 4294901760, %v108_v4  ;;  %v100_v6 = vld [vmem:[#allocation5 + $0x130] sm:$0xff] }
 0x1a0   :  { %2930 = vmatpush.msrb.mxu1 %v7933_v49  ;;  %3040 = vmatpush.msrb.mxu3 %v7947_v48  ;;  %v8169_v49 = vsub.f32 %v120_v53, %v8149_v7  ;;  %v68_v53 = vld [vmem:[#allocation5 + $0x30] sm:$0xff] }
 0x1a1   :  { %2901 = vmatpush.msrb.mxu0 %v8032_v55  ;;  %3001 = vmatpush.msrb.mxu2 %v2830_v62  ;;  %v8191_v62 = vsub.f32 %v112_v15, %v8166_v0  ;;  %v8201_v55 = vand.u32 4294901760, %v100_v6  ;;  %v8205_v27 = vsub.f32 %v108_v4, %v8176_v58  ;;  %v8289_v4 = vand.u32 4294901760, %v72_v42 }
 0x1a2   :  { %2932 = vmatpush.msrb.mxu1 %v7947_v48  ;;  %3042 = vmatpush.msrb.mxu3 %v7961_v60  ;;  %v3099_v48 = vand.u32 4294901760, %v8159_v26  ;;  %v10315_v39 = vand.u32 4294901760, %v8169_v49 }
 0x1a3   :  { %2904 = vmatpush.msrb.mxu0 %v8045_v8  ;;  %3005 = vmatpush.msrb.mxu2 %v2836_v3  ;;  %v96_v3 = vld [vmem:[#allocation5 + $0x110] sm:$0xff]  ;;  %v10310_v31 = vand.u32 4294901760, %v8205_v27  ;;  %v8231_v57 = vsub.f32 %v100_v6, %v8201_v55 }
 0x1a4   :  { %2934 = vmatpush.msrb.mxu1 %v7961_v60  ;;  %3044 = vmatpush.msrb.mxu3 %v7976_v2  ;;  %v8187_v60 = vand.u32 4294901760, %v104_v12  ;;  %v8214_v8 = vand.u32 4294901760, %v96_v3  ;;  %v188_v6 = vld [vmem:[#allocation5 + $0x3f0] sm:$0xff] }
 0x1a5   :  { %2907 = vmatmul.f32.vlgmr.msrb.gmra.mxu0 %v10575_v37  ;;  %3009 = vmatpush.msrb.mxu2 %v2842_v54  ;;  %v10314_v54 = vand.u32 4294901760, %v8180_v32  ;;  %v3124_v46 = vsub.f32 %v8205_v27, %v10310_v31  ;;  %v10307_v11 = vand.u32 4294901760, %v8231_v57  ;;  %v8311_v13 = vand.u32 4294901760, %v188_v6 }
 0x1a6   :  { %3057 = vmatpush.msra.mxu0 %v8142_v10  ;;  %2936 = vmatpush.msrb.mxu1 %v7976_v2  ;;  %v3100_v2 = vsub.f32 %v8159_v26, %v3099_v48  ;;  %v8218_v35 = vsub.f32 %v104_v12, %v8187_v60  ;;  %v8244_v14 = vsub.f32 %v96_v3, %v8214_v8 }
 0x1a7   :  { %3046 = vmatpush.msrb.mxu3 %v7994_v30  ;;  %3013 = vmatpush.msrb.mxu2 %v2848_v41  ;;  %v10312_v41 = vand.u32 4294901760, %v8191_v62  ;;  %v3112_v5 = vsub.f32 %v8180_v32, %v10314_v54  ;;  %v3125_v45 = vand.u32 4294901760, %v3124_v46  ;;  %v3136_v9 = vsub.f32 %v8231_v57, %v10307_v11 }
 0x1a8   :  { %3059 = vmatpush.msra.mxu0 %v8149_v7  ;;  %2938 = vmatpush.msrb.mxu1 %v7994_v30  ;;  %v3106_v30 = vsub.f32 %v8169_v49, %v10315_v39  ;;  %v3101_v59 = vand.u32 4294901760, %v3100_v2  ;;  %v10309_v16 = vand.u32 4294901760, %v8218_v35  ;;  %v10306_v24 = vand.u32 4294901760, %v8244_v14  ;;  %v64_v2 = vld [vmem:[#allocation5 + $0x10] sm:$0xff] }
 0x1a9   :  { %3048 = vmatpush.msrb.mxu3 %v8007_v18  ;;  %3015 = vmatmul.f32.vlgmr.msrb.gmra.mxu2 %v10560_v1  ;;  %v3118_v43 = vsub.f32 %v8191_v62, %v10312_v41  ;;  %v3113_v17 = vand.u32 4294901760, %v3112_v5  ;;  %v3148_v3 = vsub.f32 %v8249_v33, %v10304_v63  ;;  %v3137_v56 = vand.u32 4294901760, %v3136_v9  ;;  %v172_v63 = vld [vmem:[#allocation5 + $0x370] sm:$0xff] }
 0x1aa   :  { %3061 = vmatpush.msra.mxu0 %v8156_v47  ;;  %3200 = vmatpush.msra.mxu2 %v8159_v26  ;;  %v3107_v20 = vand.u32 4294901760, %v3106_v30  ;;  %v3130_v38 = vsub.f32 %v8218_v35, %v10309_v16  ;;  %v3142_v15 = vsub.f32 %v8244_v14, %v10306_v24  ;;  %v8300_v30 = vand.u32 4294901760, %v68_v53 }
 0x1ab   :  { %2940 = vmatpush.msrb.mxu1 %v8007_v18  ;;  %3050 = vmatpush.msrb.mxu3 %v8021_v29  ;;  %v8235_v18 = vand.u32 4294901760, %v88_v40  ;;  %v3119_v61 = vand.u32 4294901760, %v3118_v43  ;;  %v8318_v46 = vsub.f32 %v72_v42, %v8289_v4  ;;  %v8362_v11 = vand.u32 4294901760, %v172_v63 }
 0x1ac   :  { %3052 = vmatmul.f32.vlgmr.msrb.gmra.mxu3 %v10560_v1  ;;  %3063 = vmatpush.msra.mxu0 %v8166_v0  ;;  %v3131_v51 = vand.u32 4294901760, %v3130_v38  ;;  %v3143_v43 = vand.u32 4294901760, %v3142_v15  ;;  %v8328_v9 = vsub.f32 %v68_v53, %v8300_v30  ;;  %v10578_v26 = vand.u32 4294901760, %v8169_v49 }
 0x1ad   :  { %3203 = vmatpush.msra.mxu2 %v8169_v49  ;;  %3253 = vmatpush.msra.mxu3 %v8142_v10  ;;  %v8261_v21 = vsub.f32 %v88_v40, %v8235_v18  ;;  %v10302_v40 = vand.u32 4294901760, %v8280_v19  ;;  %v10311_v53 = vand.u32 4294901760, %v8318_v46  ;;  %v10580_v49 = vand.u32 4294901760, %v8180_v32 }
 0x1ae   :  { %2942 = vmatpush.msrb.mxu1 %v8021_v29  ;;  %3065 = vmatpush.msra.mxu0 %v8176_v58  ;;  %v80_v29 = vld [vmem:[#allocation5 + $0x90] sm:$0xff] }
 0x1af   :  { %2946 = vmatmul.f32.vlgmr.msrb.gmra.mxu1 %v10576_v25  ;;  %3206 = vmatpush.msra.mxu2 %v8180_v32  ;;  %v8267_v34 = vand.u32 4294901760, %v80_v29  ;;  %v10303_v28 = vand.u32 4294901760, %v8261_v21  ;;  %v3160_v38 = vsub.f32 %v8280_v19, %v10302_v40  ;;  %v10582_v32 = vand.u32 4294901760, %v8191_v62 }
 0x1b0   :  { %3102 = vmatpush.msra.mxu1 %v3101_v59  ;;  %3255 = vmatpush.msra.mxu3 %v8149_v7  ;;  %v8304_v59 = vsub.f32 %v76_v22, %v8277_v52  ;;  %v3149_v22 = vand.u32 4294901760, %v3148_v3  ;;  %v8335_v3 = vsub.f32 %v188_v6, %v8311_v13 }
 0x1b1   :  { %3067 = vmatpush.msra.mxu0 %v8187_v60  ;;  %3209 = vmatpush.msra.mxu2 %v8191_v62  ;;  %v8292_v12 = vsub.f32 %v80_v29, %v8267_v34  ;;  %v3154_v5 = vsub.f32 %v8261_v21, %v10303_v28  ;;  %v8314_v29 = vand.u32 4294901760, %v64_v2  ;;  %v10584_v62 = vand.u32 4294901760, %v8205_v27 }
 0x1b2   :  { %3108 = vmatpush.msra.mxu1 %v3107_v20  ;;  %3257 = vmatpush.msra.mxu3 %v8156_v47  ;;  %v184_v20 = vld [vmem:[#allocation5 + $0x3d0] sm:$0xff]  ;;  %v10316_v24 = vand.u32 4294901760, %v8335_v3 }
 0x1b3   :  { %3069 = vmatpush.msra.mxu0 %v8201_v55  ;;  %3212 = vmatpush.msra.mxu2 %v8205_v27  ;;  %v8330_v42 = vand.u32 4294901760, %v184_v20  ;;  %v3155_v15 = vand.u32 4294901760, %v3154_v5  ;;  %v8343_v40 = vsub.f32 %v64_v2, %v8314_v29  ;;  %v3161_v5 = vand.u32 4294901760, %v3160_v38 }
 0x1b4   :  { %3114 = vmatpush.msra.mxu1 %v3113_v17  ;;  %3259 = vmatpush.msra.mxu3 %v8166_v0  ;;  %v10305_v17 = vand.u32 4294901760, %v8292_v12  ;;  %v10313_v2 = vand.u32 4294901760, %v8328_v9  ;;  %v10586_v27 = vand.u32 4294901760, %v8218_v35 }
 0x1b5   :  { %3071 = vmatpush.msra.mxu0 %v8214_v8  ;;  %3215 = vmatpush.msra.mxu2 %v8218_v35  ;;  %v10587_v35 = vand.u32 4294901760, %v8231_v57 }
 0x1b6   :  { %3120 = vmatpush.msra.mxu1 %v3119_v61  ;;  %3261 = vmatpush.msra.mxu3 %v8176_v58  ;;  %v180_v61 = vld [vmem:[#allocation5 + $0x3b0] sm:$0xff] }
 0x1b7   :  { %3073 = vmatpush.msra.mxu0 %v8222_v36  ;;  %3218 = vmatpush.msra.mxu2 %v8231_v57  ;;  %v8345_v28 = vand.u32 4294901760, %v180_v61 }
 0x1b8   :  { %3126 = vmatpush.msra.mxu1 %v3125_v45  ;;  %3263 = vmatpush.msra.mxu3 %v8187_v60  ;;  %v10308_v45 = vand.u32 4294901760, %v8304_v59 }
 0x1b9   :  { %3075 = vmatpush.msra.mxu0 %v8235_v18  ;;  %3221 = vmatpush.msra.mxu2 %v8244_v14  ;;  %v8370_v16 = vsub.f32 %v180_v61, %v8345_v28 }
 0x1ba   :  { %3132 = vmatpush.msra.mxu1 %v3131_v51  ;;  %3265 = vmatpush.msra.mxu3 %v8201_v55  ;;  %v176_v51 = vld [vmem:[#allocation5 + $0x390] sm:$0xff] }
 0x1bb   :  { %3077 = vmatpush.msra.mxu0 %v8255_v44  ;;  %3224 = vmatpush.msra.mxu2 %v8249_v33  ;;  %v8349_v6 = vand.u32 4294901760, %v176_v51 }
 0x1bc   :  { %3138 = vmatpush.msra.mxu1 %v3137_v56  ;;  %3267 = vmatpush.msra.mxu3 %v8214_v8  ;;  %v3166_v56 = vsub.f32 %v8292_v12, %v10305_v17  ;;  %v8357_v17 = vsub.f32 %v184_v20, %v8330_v42  ;;  %v10317_v20 = vand.u32 4294901760, %v8343_v40 }
 0x1bd   :  { %3079 = vmatpush.msra.mxu0 %v8267_v34  ;;  %3227 = vmatpush.msra.mxu2 %v8261_v21  ;;  %v8375_v31 = vsub.f32 %v176_v51, %v8349_v6  ;;  %v3441_v51 = vsub.f32 %v8335_v3, %v10316_v24  ;;  %v156_v24 = vld [vmem:[#allocation5 + $0x2f0] sm:$0xff] }
 0x1be   :  { %3144 = vmatpush.msra.mxu1 %v3143_v43  ;;  %3269 = vmatpush.msra.mxu3 %v8222_v36  ;;  %v3172_v43 = vsub.f32 %v8304_v59, %v10308_v45  ;;  %v3167_v38 = vand.u32 4294901760, %v3166_v56  ;;  %v3178_v45 = vsub.f32 %v8318_v46, %v10311_v53  ;;  %v3184_v53 = vsub.f32 %v8328_v9, %v10313_v2 }
 0x1bf   :  { %3081 = vmatpush.msra.mxu0 %v8277_v52  ;;  %3230 = vmatpush.msra.mxu2 %v8280_v19  ;;  %v3190_v54 = vsub.f32 %v8343_v40, %v10317_v20  ;;  %v8423_v1 = vand.u32 4294901760, %v156_v24 }
 0x1c0   :  { %3150 = vmatpush.msra.mxu1 %v3149_v22  ;;  %3271 = vmatpush.msra.mxu3 %v8235_v18  ;;  %v168_v22 = vld [vmem:[#allocation5 + $0x350] sm:$0xff]  ;;  %v3173_v56 = vand.u32 4294901760, %v3172_v43  ;;  %v3179_v2 = vand.u32 4294901760, %v3178_v45  ;;  %v3185_v45 = vand.u32 4294901760, %v3184_v53 }
 0x1c1   :  { %3083 = vmatpush.msra.mxu0 %v8289_v4  ;;  %3233 = vmatpush.msra.mxu2 %v8292_v12  ;;  %v8382_v61 = vand.u32 4294901760, %v168_v22  ;;  %v160_v43 = vld [vmem:[#allocation5 + $0x310] sm:$0xff]  ;;  %v3191_v53 = vand.u32 4294901760, %v3190_v54 }
 0x1c2   :  { %3156 = vmatpush.msra.mxu1 %v3155_v15  ;;  %3273 = vmatpush.msra.mxu3 %v8255_v44  ;;  %v164_v15 = vld [vmem:[#allocation5 + $0x330] sm:$0xff]  ;;  %v8410_v25 = vand.u32 4294901760, %v160_v43 }
 0x1c3   :  { %3085 = vmatpush.msra.mxu0 %v8300_v30  ;;  %3236 = vmatpush.msra.mxu2 %v8304_v59  ;;  %v8397_v41 = vand.u32 4294901760, %v164_v15  ;;  %v8408_v39 = vsub.f32 %v168_v22, %v8382_v61 }
 0x1c4   :  { %3162 = vmatpush.msra.mxu1 %v3161_v5  ;;  %3275 = vmatpush.msra.mxu3 %v8267_v34  ;;  %v8390_v5 = vsub.f32 %v172_v63, %v8362_v11  ;;  %v152_v63 = vld [vmem:[#allocation5 + $0x2d0] sm:$0xff] }
 0x1c5   :  { %3087 = vmatpush.msra.mxu0 %v8314_v29  ;;  %3239 = vmatpush.msra.mxu2 %v8318_v46  ;;  %v8421_v37 = vsub.f32 %v164_v15, %v8397_v41  ;;  %v8434_v15 = vsub.f32 %v160_v43, %v8410_v25  ;;  %v8446_v43 = vsub.f32 %v156_v24, %v8423_v1 }
 0x1c6   :  { %3168 = vmatpush.msra.mxu1 %v3167_v38  ;;  %3277 = vmatpush.msra.mxu3 %v8277_v52  ;;  %v10577_v38 = vand.u32 4294901760, %v8357_v17 }
 0x1c7   :  { %3294 = vmatpush.msrb.mxu0 %v3099_v48  ;;  %3242 = vmatpush.msra.mxu2 %v8328_v9  ;;  %v3442_v48 = vand.u32 4294901760, %v3441_v51  ;;  %v10581_v51 = vand.u32 4294901760, %v8375_v31 }
 0x1c8   :  { %3174 = vmatpush.msra.mxu1 %v3173_v56  ;;  %3279 = vmatpush.msra.mxu3 %v8289_v4  ;;  %v3447_v20 = vsub.f32 %v8357_v17, %v10577_v38  ;;  %v10579_v38 = vand.u32 4294901760, %v8370_v16  ;;  %v8436_v56 = vand.u32 4294901760, %v152_v63 }
 0x1c9   :  { %3298 = vmatpush.msrb.mxu0 %v10578_v26  ;;  %3245 = vmatpush.msra.mxu2 %v8343_v40  ;;  %v148_v26 = vld [vmem:[#allocation5 + $0x2b0] sm:$0xff] }
 0x1ca   :  { %3180 = vmatpush.msra.mxu1 %v3179_v2  ;;  %3281 = vmatpush.msra.mxu3 %v8300_v30  ;;  %v3453_v22 = vsub.f32 %v8370_v16, %v10579_v38  ;;  %v3459_v2 = vsub.f32 %v8375_v31, %v10581_v51  ;;  %v3448_v54 = vand.u32 4294901760, %v3447_v20  ;;  %v10320_v38 = vand.u32 4294901760, %v8421_v37 }
 0x1cb   :  { %3302 = vmatpush.msrb.mxu0 %v10580_v49  ;;  %3398 = vmatpush.msrb.mxu2 %v8311_v13  ;;  %v10583_v49 = vand.u32 4294901760, %v8390_v5  ;;  %v8448_v50 = vand.u32 4294901760, %v148_v26  ;;  %v8459_v24 = vsub.f32 %v152_v63, %v8436_v56 }
 0x1cc   :  { %3186 = vmatpush.msra.mxu1 %v3185_v45  ;;  %3283 = vmatpush.msra.mxu3 %v8314_v29  ;;  %v144_v45 = vld [vmem:[#allocation5 + $0x290] sm:$0xff]  ;;  %v3454_v20 = vand.u32 4294901760, %v3453_v22  ;;  %v3482_v22 = vand.u32 4294901760, %v8434_v15 }
 0x1cd   :  { %3306 = vmatpush.msrb.mxu0 %v10582_v32  ;;  %3400 = vmatpush.msrb.mxu2 %v8330_v42  ;;  %v3465_v51 = vsub.f32 %v8390_v5, %v10583_v49  ;;  %v3460_v32 = vand.u32 4294901760, %v3459_v2  ;;  %v8461_v49 = vand.u32 4294901760, %v144_v45  ;;  %v3477_v2 = vsub.f32 %v8421_v37, %v10320_v38 }
 0x1ce   :  { %3443 = vmatpush.msrb.mxu3 %v3442_v48  ;;  %3192 = vmatpush.msra.mxu1 %v3191_v53  ;;  %v10585_v48 = vand.u32 4294901760, %v8408_v39  ;;  %v8472_v63 = vsub.f32 %v148_v26, %v8448_v50  ;;  %v10588_v38 = vand.u32 4294901760, %v8244_v14  ;;  %v10589_v14 = vand.u32 4294901760, %v8249_v33 }
 0x1cf   :  { %3310 = vmatpush.msrb.mxu0 %v10584_v62  ;;  %3402 = vmatpush.msrb.mxu2 %v8345_v28  ;;  %v8474_v62 = vand.u32 4294901760, %v140_v23  ;;  %v8485_v26 = vsub.f32 %v144_v45, %v8461_v49  ;;  %v3478_v57 = vand.u32 4294901760, %v3477_v2 }
 0x1d0   :  { %3361 = vmatpush.msrb.mxu1 %v8142_v10  ;;  %3449 = vmatpush.msrb.mxu3 %v3448_v54  ;;  %v3471_v53 = vsub.f32 %v8408_v39, %v10585_v48  ;;  %v3466_v10 = vand.u32 4294901760, %v3465_v51  ;;  %v3488_v54 = vand.u32 4294901760, %v8446_v43  ;;  %v136_v48 = vld [vmem:[#allocation5 + $0x250] sm:$0xff]  ;;  %v3483_v51 = vsub.f32 %v8434_v15, %v3482_v22 }
 0x1d1   :  { %3314 = vmatpush.msrb.mxu0 %v10586_v27  ;;  %3404 = vmatpush.msrb.mxu2 %v8349_v6  ;;  %v132_v27 = vld [vmem:[#allocation5 + $0x230] sm:$0xff]  ;;  %v8498_v45 = vsub.f32 %v140_v23, %v8474_v62  ;;  %v3506_v2 = vand.u32 4294901760, %v8485_v26  ;;  %v10590_v23 = vand.u32 4294901760, %v8261_v21  ;;  %v10591_v21 = vand.u32 4294901760, %v8280_v19 }
 0x1d2   :  { %3363 = vmatpush.msrb.mxu1 %v8149_v7  ;;  %3455 = vmatpush.msrb.mxu3 %v3454_v20  ;;  %v3472_v7 = vand.u32 4294901760, %v3471_v53  ;;  %v3494_v20 = vand.u32 4294901760, %v8459_v24  ;;  %v3500_v53 = vand.u32 4294901760, %v8472_v63 }
 0x1d3   :  { %3318 = vmatpush.msrb.mxu0 %v10587_v35  ;;  %3406 = vmatpush.msrb.mxu2 %v8362_v11  ;;  %v128_v35 = vld [vmem:[#allocation5 + $0x210] sm:$0xff] }
 0x1d4   :  { %3365 = vmatpush.msrb.mxu1 %v8156_v47  ;;  %3461 = vmatpush.msrb.mxu3 %v3460_v32  ;;  %v8490_v47 = vand.u32 4294901760, %v136_v48  ;;  %v3489_v32 = vsub.f32 %v8446_v43, %v3488_v54 }
 0x1d5   :  { %3322 = vmatpush.msrb.mxu0 %v10588_v38  ;;  %3408 = vmatpush.msrb.mxu2 %v8382_v61  ;;  %v3484_v38 = vand.u32 4294901760, %v3483_v51  ;;  %v3501_v51 = vsub.f32 %v8472_v63, %v3500_v53 }
 0x1d6   :  { %3367 = vmatpush.msrb.mxu1 %v8166_v0  ;;  %3467 = vmatpush.msrb.mxu3 %v3466_v10  ;;  %v8503_v0 = vand.u32 4294901760, %v132_v27  ;;  %v3495_v10 = vsub.f32 %v8459_v24, %v3494_v20  ;;  %v8514_v33 = vsub.f32 %v136_v48, %v8490_v47 }
 0x1d7   :  { %3326 = vmatpush.msrb.mxu0 %v10589_v14  ;;  %3410 = vmatpush.msrb.mxu2 %v8397_v41  ;;  %v3512_v14 = vand.u32 4294901760, %v8498_v45 }
 0x1d8   :  { %3369 = vmatpush.msrb.mxu1 %v8176_v58  ;;  %3473 = vmatpush.msrb.mxu3 %v3472_v7  ;;  %v8516_v58 = vand.u32 4294901760, %v128_v35  ;;  %v3490_v7 = vand.u32 4294901760, %v3489_v32  ;;  %v3496_v48 = vand.u32 4294901760, %v3495_v10  ;;  %v10592_v32 = vand.u32 4294901760, %v8292_v12 }
 0x1d9   :  { %3330 = vmatpush.msrb.mxu0 %v10590_v23  ;;  %3412 = vmatpush.msrb.mxu2 %v8410_v25  ;;  %v3518_v19 = vand.u32 4294901760, %v8514_v33  ;;  %v10593_v10 = vand.u32 4294901760, %v8304_v59 }
 0x1da   :  { %3371 = vmatpush.msrb.mxu1 %v8187_v60  ;;  %3479 = vmatpush.msrb.mxu3 %v3478_v57  ;;  %v8527_v60 = vsub.f32 %v132_v27, %v8503_v0  ;;  %v3507_v57 = vsub.f32 %v8485_v26, %v3506_v2  ;;  %v3502_v27 = vand.u32 4294901760, %v3501_v51 }
 0x1db   :  { %3334 = vmatpush.msrb.mxu0 %v10591_v21  ;;  %3414 = vmatpush.msrb.mxu2 %v8423_v1  ;;  %v3519_v23 = vsub.f32 %v8514_v33, %v3518_v19  ;;  %v10596_v21 = vand.u32 4294901760, %v8343_v40 }
 0x1dc   :  { %3373 = vmatpush.msrb.mxu1 %v8201_v55  ;;  %3485 = vmatpush.msrb.mxu3 %v3484_v38  ;;  %v8538_v55 = vsub.f32 %v128_v35, %v8516_v58  ;;  %v3513_v38 = vsub.f32 %v8498_v45, %v3512_v14  ;;  %v3508_v12 = vand.u32 4294901760, %v3507_v57  ;;  %v10594_v35 = vand.u32 4294901760, %v8318_v46  ;;  %v10597_v57 = vld [vmem:[#allocation17_spill] sm:$0xff] }
 0x1dd   :  { %3338 = vmatpush.msrb.mxu0 %v10592_v32  ;;  %3416 = vmatpush.msrb.mxu2 %v8436_v56 }
 0x1de   :  { %3375 = vmatpush.msrb.mxu1 %v8214_v8  ;;  %3491 = vmatpush.msrb.mxu3 %v3490_v7  ;;  %v3524_v8 = vand.u32 4294901760, %v8527_v60  ;;  %v3530_v59 = vand.u32 4294901760, %v8538_v55  ;;  %v10595_v7 = vand.u32 4294901760, %v8328_v9 }
 0x1df   :  { %3342 = vmatpush.msrb.mxu0 %v10593_v10  ;;  %3418 = vmatpush.msrb.mxu2 %v8448_v50 }
 0x1e0   :  { %3377 = vmatpush.msrb.mxu1 %v8222_v36  ;;  %3497 = vmatpush.msrb.mxu3 %v3496_v48  ;;  %v3514_v36 = vand.u32 4294901760, %v3513_v38  ;;  %v3525_v46 = vsub.f32 %v8527_v60, %v3524_v8  ;;  %v3520_v48 = vand.u32 4294901760, %v3519_v23  ;;  %v3531_v9 = vsub.f32 %v8538_v55, %v3530_v59  ;;  %v10598_v38 = vld [vmem:[#allocation14_spill] sm:$0xff]  ;;  %v10602_v23 = vld [vmem:[#allocation13_spill] sm:$0xff] }
 0x1e1   :  { %3346 = vmatpush.msrb.mxu0 %v10594_v35  ;;  %3420 = vmatpush.msrb.mxu2 %v8461_v49  ;;  %v10601_v35 = vand.u32 4294901760, %v8357_v17 }
 0x1e2   :  { %3379 = vmatpush.msrb.mxu1 %v8235_v18  ;;  %3503 = vmatpush.msrb.mxu3 %v3502_v27  ;;  %v6000_v18 = vld [vmem:[#allocation7] sm:$0xf]  ;;  %v3526_v32 = vand.u32 4294901760, %v3525_v46  ;;  %v1831_v27 = vpop.f32.mrf.mxu1  ;;  %v10608_v46 = vand.u32 4294901760, %v8408_v39 }
 0x1e3   :  { %3350 = vmatpush.msrb.mxu0 %v10595_v7  ;;  %3422 = vmatpush.msrb.mxu2 %v8474_v62  ;;  %v321_v51 = vperm.slane %v6000_v18, 1  ;;  %v10605_v7 = vld [vmem:[#allocation12_spill] sm:$0xff] }
 0x1e4   :  { %3381 = vmatpush.msrb.mxu1 %v8255_v44  ;;  %3509 = vmatpush.msrb.mxu3 %v3508_v12  ;;  %v1730_v44 = vpop.f32.mrf.mxu0  ;;  %v1885_v12 = vpop.f32.mrf.mxu2 }
 0x1e5   :  { %3354 = vmatpush.msrb.mxu0 %v10596_v21  ;;  %3424 = vmatpush.msrb.mxu2 %v8490_v47  ;;  %v1731_v40 = vadd.f32 %v1730_v44, %v321_v51 }
 0x1e6   :  { %3383 = vmatpush.msrb.mxu1 %v8267_v34  ;;  %3515 = vmatpush.msrb.mxu3 %v3514_v36  ;;  %v3532_v34 = vand.u32 4294901760, %v3531_v9  ;;  %v1924_v36 = vpop.f32.mrf.mxu3 }
 0x1e7   :  { %3093 = vmatmul.f32.vlgmr.msra.gmra.mxu0 %v10597_v57  ;;  %3426 = vmatpush.msrb.mxu2 %v8503_v0  ;;  %v1832_v10 = vadd.f32 %v1831_v27, %v1731_v40  ;;  %v220_v27 = vld [vmem:[#allocation5 + $0x4f0] sm:$0xff] }
 0x1e8   :  { %3385 = vmatpush.msrb.mxu1 %v8277_v52  ;;  %3541 = vmatpush.msra.mxu0 %v8335_v3  ;;  %v10599_v52 = vand.u32 4294901760, %v8335_v3 }
 0x1e9   :  { %3521 = vmatpush.msrb.mxu3 %v3520_v48  ;;  %3428 = vmatpush.msrb.mxu2 %v8516_v58  ;;  %v1886_v3 = vadd.f32 %v1885_v12, %v1832_v10 }
 0x1ea   :  { %3387 = vmatpush.msrb.mxu1 %v8289_v4  ;;  %3544 = vmatpush.msra.mxu0 %v8357_v17  ;;  %v10600_v4 = vld [vmem:[#allocation15_spill] sm:$0xff]  ;;  %v10604_v17 = vand.u32 4294901760, %v8375_v31  ;;  %v2030_v18 = vpop.f32.mrf.mxu1 }
 0x1eb   :  { %3527 = vmatpush.msrb.mxu3 %v3526_v32  ;;  %3248 = vmatmul.f32.vlgmr.msra.gmra.mxu2 %v10598_v38  ;;  %v224_v32 = vld [vmem:[#allocation5 + $0x510] sm:$0xff] }
 0x1ec   :  { %3547 = vmatpush.msra.mxu0 %v8370_v16  ;;  %3635 = vmatpush.msra.mxu2 %v10599_v52 }
 0x1ed   :  { %3389 = vmatpush.msrb.mxu1 %v8300_v30  ;;  %3533 = vmatpush.msrb.mxu3 %v3532_v34  ;;  %v10603_v30 = vand.u32 4294901760, %v8370_v16  ;;  %v1993_v16 = vpop.f32.mrf.mxu0 }
 0x1ee   :  { %3287 = vmatmul.f32.vlgmr.msra.gmra.mxu3 %v10600_v4  ;;  %3550 = vmatpush.msra.mxu0 %v8375_v31  ;;  %v10607_v31 = vld [vmem:[#allocation16_spill] sm:$0xff] }
 0x1ef   :  { %3639 = vmatpush.msra.mxu2 %v10601_v35  ;;  %3702 = vmatpush.msra.mxu3 %v8311_v13 }
 0x1f0   :  { %3391 = vmatpush.msrb.mxu1 %v8314_v29  ;;  %3553 = vmatpush.msra.mxu0 %v8390_v5  ;;  %v1925_v29 = vadd.f32 %v1924_v36, %v1886_v3  ;;  %v216_v3 = vld [vmem:[#allocation5 + $0x4d0] sm:$0xff] }
 0x1f1   :  { %3194 = vmatmul.f32.vlgmr.msra.gmra.mxu1 %v10602_v23  ;;  %3643 = vmatpush.msra.mxu2 %v10603_v30 }
 0x1f2   :  { %3594 = vmatpush.msra.mxu1 %v8311_v13  ;;  %3704 = vmatpush.msra.mxu3 %v8330_v42  ;;  %v10606_v13 = vand.u32 4294901760, %v8390_v5 }
 0x1f3   :  { %3556 = vmatpush.msra.mxu0 %v8408_v39  ;;  %3647 = vmatpush.msra.mxu2 %v10604_v17  ;;  %v2071_v39 = vpop.f32.mrf.mxu2 }
 0x1f4   :  { %3596 = vmatpush.msra.mxu1 %v8330_v42  ;;  %3706 = vmatpush.msra.mxu3 %v8345_v28  ;;  %v1994_v42 = vadd.f32 %v1993_v16, %v1925_v29  ;;  %v8720_v29 = vand.u32 4294901760, %v220_v27 }
 0x1f5   :  { %3434 = vmatmul.f32.vlgmr.msrb.gmra.mxu2 %v10605_v7  ;;  %3559 = vmatpush.msra.mxu0 %v8421_v37 }
 0x1f6   :  { %3598 = vmatpush.msra.mxu1 %v8345_v28  ;;  %3651 = vmatpush.msra.mxu2 %v10606_v13  ;;  %v10609_v28 = vand.u32 4294901760, %v8421_v37  ;;  %v2031_v5 = vadd.f32 %v2030_v18, %v1994_v42  ;;  %v212_v42 = vld [vmem:[#allocation5 + $0x4b0] sm:$0xff] }
 0x1f7   :  { %3708 = vmatpush.msra.mxu3 %v8349_v6  ;;  %3356 = vmatmul.f32.vlgmr.msrb.gmra.mxu0 %v10602_v23 }
 0x1f8   :  { %3535 = vmatmul.f32.vlgmr.msrb.gmra.mxu3 %v10607_v31  ;;  %3562 = vmatpush.msra.mxu0 %v8434_v15  ;;  %v2072_v37 = vadd.f32 %v2071_v39, %v2031_v5 }
 0x1f9   :  { %3600 = vmatpush.msra.mxu1 %v8349_v6  ;;  %3655 = vmatpush.msra.mxu2 %v10608_v46  ;;  %v248_v6 = vld [vmem:[#allocation5 + $0x5d0] sm:$0xff] }
 0x1fa   :  { %3710 = vmatpush.msra.mxu3 %v8362_v11  ;;  %3393 = vmatmul.f32.vlgmr.msrb.gmra.mxu1 %v10602_v23 }
 0x1fb   :  { %3565 = vmatpush.msra.mxu0 %v8446_v43  ;;  %3602 = vmatpush.msra.mxu1 %v8362_v11  ;;  %v252_v11 = vld [vmem:[#allocation5 + $0x5f0] sm:$0xff]  ;;  %v2226_v43 = vpop.f32.mrf.mxu0  ;;  %v2334_v48 = vpop.f32.mrf.mxu2 }
 0x1fc   :  { %3659 = vmatpush.msra.mxu2 %v10609_v28  ;;  %3712 = vmatpush.msra.mxu3 %v8382_v61  ;;  %v8634_v15 = vand.u32 4294901760, %v252_v11  ;;  %v8733_v28 = vand.u32 4294901760, %v216_v3 }
 0x1fd   :  { %3568 = vmatpush.msra.mxu0 %v8459_v24  ;;  %3604 = vmatpush.msra.mxu1 %v8382_v61  ;;  %v2172_v61 = vpop.f32.mrf.mxu3  ;;  %v240_v24 = vld [vmem:[#allocation5 + $0x590] sm:$0xff] }
 0x1fe   :  { %3663 = vmatpush.msra.mxu2 %v3482_v22  ;;  %3714 = vmatpush.msra.mxu3 %v8397_v41  ;;  %v2173_v22 = vadd.f32 %v2172_v61, %v2072_v37  ;;  %v208_v37 = vld [vmem:[#allocation5 + $0x490] sm:$0xff] }
 0x1ff   :  { %3571 = vmatpush.msra.mxu0 %v8472_v63  ;;  %3606 = vmatpush.msra.mxu1 %v8397_v41  ;;  %v244_v41 = vld [vmem:[#allocation5 + $0x5b0] sm:$0xff]  ;;  %v8651_v63 = vsub.f32 %v252_v11, %v8634_v15  ;;  %v10611_v11 = vld [vmem:[#allocation19_spill] sm:$0xff] }
 0x200   :  { %3667 = vmatpush.msra.mxu2 %v3488_v54  ;;  %3716 = vmatpush.msra.mxu3 %v8410_v25  ;;  %v2265_v54 = vpop.f32.mrf.mxu1 }
 0x201   :  { %3574 = vmatpush.msra.mxu0 %v8485_v26  ;;  %3608 = vmatpush.msra.mxu1 %v8410_v25  ;;  %v8641_v25 = vand.u32 4294901760, %v248_v6 }
 0x202   :  { %3671 = vmatpush.msra.mxu2 %v3494_v20  ;;  %3718 = vmatpush.msra.mxu3 %v8423_v1  ;;  %v236_v20 = vld [vmem:[#allocation5 + $0x570] sm:$0xff] }
 0x203   :  { %3577 = vmatpush.msra.mxu0 %v8498_v45  ;;  %3610 = vmatpush.msra.mxu1 %v8423_v1  ;;  %v8648_v1 = vand.u32 4294901760, %v244_v41  ;;  %v8661_v26 = vsub.f32 %v248_v6, %v8641_v25  ;;  %v8665_v21 = vand.u32 4294901760, %v236_v20  ;;  %v2412_v52 = vpop.f32.mrf.mxu0  ;;  %v2567_v6 = vpop.f32.mrf.mxu2 }
 0x204   :  { %3675 = vmatpush.msra.mxu2 %v3500_v53  ;;  %3720 = vmatpush.msra.mxu3 %v8436_v56  ;;  %v2227_v53 = vadd.f32 %v2226_v43, %v2173_v22  ;;  %v8748_v22 = vsub.f32 %v220_v27, %v8720_v29 }
 0x205   :  { %3580 = vmatpush.msra.mxu0 %v8514_v33  ;;  %3612 = vmatpush.msra.mxu1 %v8436_v56  ;;  %v8658_v56 = vand.u32 4294901760, %v240_v24  ;;  %v8672_v45 = vsub.f32 %v244_v41, %v8648_v1  ;;  %v10332_v33 = vand.u32 4294901760, %v8661_v26  ;;  %v2371_v40 = vpop.f32.mrf.mxu3  ;;  %v8744_v41 = vand.u32 4294901760, %v212_v42 }
 0x206   :  { %3679 = vmatpush.msra.mxu2 %v3506_v2  ;;  %3722 = vmatpush.msra.mxu3 %v8448_v50  ;;  %v232_v2 = vld [vmem:[#allocation5 + $0x550] sm:$0xff]  ;;  %v2266_v51 = vadd.f32 %v2265_v54, %v2227_v53  ;;  %v8756_v53 = vand.u32 4294901760, %v208_v37  ;;  %v10322_v27 = vand.u32 4294901760, %v8748_v22 }
 0x207   :  { %3583 = vmatpush.msra.mxu0 %v8527_v60  ;;  %3614 = vmatpush.msra.mxu1 %v8448_v50  ;;  %v10333_v50 = vand.u32 4294901760, %v8651_v63  ;;  %v8676_v9 = vand.u32 4294901760, %v232_v2  ;;  %v10331_v34 = vand.u32 4294901760, %v8672_v45  ;;  %v204_v54 = vld [vmem:[#allocation5 + $0x470] sm:$0xff] }
 0x208   :  { %3683 = vmatpush.msra.mxu2 %v3512_v14  ;;  %3724 = vmatpush.msra.mxu3 %v8461_v49  ;;  %v10610_v14 = vld [vmem:[#allocation18_spill] sm:$0xff]  ;;  %v2335_v44 = vadd.f32 %v2334_v48, %v2266_v51  ;;  %v2513_v30 = vpop.f32.mrf.mxu1  ;;  %v8760_v51 = vsub.f32 %v216_v3, %v8733_v28 }
 0x209   :  { %3586 = vmatpush.msra.mxu0 %v8538_v55  ;;  %3616 = vmatpush.msra.mxu1 %v8461_v49  ;;  %v228_v49 = vld [vmem:[#allocation5 + $0x530] sm:$0xff]  ;;  %v3782_v60 = vsub.f32 %v8651_v63, %v10333_v50  ;;  %v3788_v55 = vsub.f32 %v8661_v26, %v10332_v33  ;;  %v3794_v17 = vsub.f32 %v8672_v45, %v10331_v34 }
 0x20a   :  { %3687 = vmatpush.msra.mxu2 %v3518_v19  ;;  %3726 = vmatpush.msra.mxu3 %v8474_v62  ;;  %v8683_v19 = vsub.f32 %v240_v24, %v8658_v56  ;;  %v2372_v12 = vadd.f32 %v2371_v40, %v2335_v44  ;;  %v200_v44 = vld [vmem:[#allocation5 + $0x450] sm:$0xff] }
 0x20b   :  { %3589 = vmatmul.f32.vlgmr.msra.gmra.mxu0 %v10610_v14  ;;  %3618 = vmatpush.msra.mxu1 %v8474_v62  ;;  %v8688_v62 = vsub.f32 %v236_v20, %v8665_v21  ;;  %v3783_v36 = vand.u32 4294901760, %v3782_v60  ;;  %v3789_v46 = vand.u32 4294901760, %v3788_v55  ;;  %v3795_v61 = vand.u32 4294901760, %v3794_v17 }
 0x20c   :  { %3739 = vmatpush.msrb.mxu0 %v8634_v15  ;;  %3691 = vmatpush.msra.mxu2 %v3524_v8  ;;  %v8696_v8 = vand.u32 4294901760, %v228_v49  ;;  %v10329_v10 = vand.u32 4294901760, %v8683_v19  ;;  %v8768_v60 = vand.u32 4294901760, %v204_v54  ;;  %v8784_v17 = vsub.f32 %v208_v37, %v8756_v53 }
 0x20d   :  { %3728 = vmatpush.msra.mxu3 %v8490_v47  ;;  %3620 = vmatpush.msra.mxu1 %v8490_v47  ;;  %v8702_v47 = vsub.f32 %v232_v2, %v8676_v9  ;;  %v10328_v35 = vand.u32 4294901760, %v8688_v62 }
 0x20e   :  { %3741 = vmatpush.msrb.mxu0 %v8641_v25  ;;  %3695 = vmatpush.msra.mxu2 %v3530_v59  ;;  %v8709_v59 = vand.u32 4294901760, %v224_v32  ;;  %v8723_v16 = vsub.f32 %v228_v49, %v8696_v8  ;;  %v3800_v18 = vsub.f32 %v8683_v19, %v10329_v10  ;;  %v8794_v37 = vsub.f32 %v204_v54, %v8768_v60 }
 0x20f   :  { %3730 = vmatpush.msra.mxu3 %v8503_v0  ;;  %3697 = vmatmul.f32.vlgmr.msra.gmra.mxu2 %v10607_v31  ;;  %v10326_v13 = vand.u32 4294901760, %v8702_v47  ;;  %v10327_v54 = vand.u32 4294901760, %v8784_v17 }
 0x210   :  { %3743 = vmatpush.msrb.mxu0 %v8648_v1  ;;  %3882 = vmatpush.msrb.mxu2 %v8651_v63  ;;  %v8736_v5 = vsub.f32 %v224_v32, %v8709_v59  ;;  %v10325_v43 = vand.u32 4294901760, %v8723_v16  ;;  %v3801_v20 = vand.u32 4294901760, %v3800_v18  ;;  %v2606_v32 = vpop.f32.mrf.mxu3 }
 0x211   :  { %3622 = vmatpush.msra.mxu1 %v8503_v0  ;;  %3732 = vmatpush.msra.mxu3 %v8516_v58  ;;  %v2413_v0 = vadd.f32 %v2412_v52, %v2372_v12  ;;  %v3812_v24 = vsub.f32 %v8702_v47, %v10326_v13  ;;  %v8772_v52 = vsub.f32 %v212_v42, %v8744_v41  ;;  %v2675_v12 = vpop.f32.mrf.mxu0 }
 0x212   :  { %3734 = vmatmul.f32.vlgmr.msra.gmra.mxu3 %v10607_v31  ;;  %3745 = vmatpush.msrb.mxu0 %v8658_v56  ;;  %v10324_v2 = vand.u32 4294901760, %v8736_v5  ;;  %v3818_v40 = vsub.f32 %v8723_v16, %v10325_v43  ;;  %v304_v43 = vld [vmem:[#allocation5 + $0x790] sm:$0xff]  ;;  %v10616_v31 = vld [vmem:[#allocation23_spill] sm:$0xff] }
 0x213   :  { %3885 = vmatpush.msrb.mxu2 %v8661_v26  ;;  %3935 = vmatpush.msrb.mxu3 %v8634_v15  ;;  %v2514_v39 = vadd.f32 %v2513_v30, %v2413_v0  ;;  %v3813_v55 = vand.u32 4294901760, %v3812_v24  ;;  %v8780_v30 = vand.u32 4294901760, %v200_v44  ;;  %v196_v0 = vld [vmem:[#allocation5 + $0x430] sm:$0xff] }
 0x214   :  { %3624 = vmatpush.msra.mxu1 %v8516_v58  ;;  %3747 = vmatpush.msrb.mxu0 %v8665_v21  ;;  %v3806_v58 = vsub.f32 %v8688_v62, %v10328_v35  ;;  %v3824_v3 = vsub.f32 %v8736_v5, %v10324_v2  ;;  %v3819_v18 = vand.u32 4294901760, %v3818_v40  ;;  %v8798_v24 = vand.u32 4294901760, %v196_v0 }
 0x215   :  { %3628 = vmatmul.f32.vlgmr.msra.gmra.mxu1 %v10611_v11  ;;  %3888 = vmatpush.msrb.mxu2 %v8672_v45  ;;  %v2568_v48 = vadd.f32 %v2567_v6, %v2514_v39  ;;  %v3830_v39 = vsub.f32 %v8748_v22, %v10322_v27  ;;  %v316_v6 = vld [vmem:[#allocation5 + $0x7f0] sm:$0xff] }
 0x216   :  { %3784 = vmatpush.msrb.mxu1 %v3783_v36  ;;  %3937 = vmatpush.msrb.mxu3 %v8641_v25  ;;  %v3807_v49 = vand.u32 4294901760, %v3806_v58  ;;  %v10321_v36 = vand.u32 4294901760, %v8760_v51  ;;  %v10323_v58 = vand.u32 4294901760, %v8772_v52 }
 0x217   :  { %3749 = vmatpush.msrb.mxu0 %v8676_v9  ;;  %3891 = vmatpush.msrb.mxu2 %v8683_v19  ;;  %v2607_v42 = vadd.f32 %v2606_v32, %v2568_v48  ;;  %v3825_v48 = vand.u32 4294901760, %v3824_v3  ;;  %v8806_v32 = vsub.f32 %v200_v44, %v8780_v30  ;;  %v3831_v3 = vand.u32 4294901760, %v3830_v39 }
 0x218   :  { %3790 = vmatpush.msrb.mxu1 %v3789_v46  ;;  %3939 = vmatpush.msrb.mxu3 %v8648_v1  ;;  %v2712_v46 = vpop.f32.mrf.mxu1  ;;  %v10330_v44 = vand.u32 4294901760, %v8794_v37  ;;  %v3848_v39 = vsub.f32 %v8784_v17, %v10327_v54 }
 0x219   :  { %3751 = vmatpush.msrb.mxu0 %v8696_v8  ;;  %3894 = vmatpush.msrb.mxu2 %v8688_v62 }
 0x21a   :  { %3796 = vmatpush.msrb.mxu1 %v3795_v61  ;;  %3941 = vmatpush.msrb.mxu3 %v8658_v56  ;;  %v2676_v61 = vadd.f32 %v2675_v12, %v2607_v42  ;;  %v8810_v12 = vand.u32 4294901760, %v316_v6  ;;  %v2753_v42 = vpop.f32.mrf.mxu2  ;;  %v3854_v54 = vsub.f32 %v8794_v37, %v10330_v44 }
 0x21b   :  { %3753 = vmatpush.msrb.mxu0 %v8709_v59  ;;  %3897 = vmatpush.msrb.mxu2 %v8702_v47 }
 0x21c   :  { %3802 = vmatpush.msrb.mxu1 %v3801_v20  ;;  %3943 = vmatpush.msrb.mxu3 %v8665_v21  ;;  %v192_v20 = vld [vmem:[#allocation5 + $0x410] sm:$0xff]  ;;  %v2713_v40 = vadd.f32 %v2712_v46, %v2676_v61  ;;  %v8822_v46 = vsub.f32 %v196_v0, %v8798_v24  ;;  %v8834_v0 = vsub.f32 %v316_v6, %v8810_v12 }
 0x21d   :  { %3755 = vmatpush.msrb.mxu0 %v8720_v29  ;;  %3900 = vmatpush.msrb.mxu2 %v8723_v16  ;;  %v8816_v27 = vand.u32 4294901760, %v192_v20  ;;  %v308_v61 = vld [vmem:[#allocation5 + $0x7b0] sm:$0xff] }
 0x21e   :  { %3808 = vmatpush.msrb.mxu1 %v3807_v49  ;;  %3945 = vmatpush.msrb.mxu3 %v8676_v9  ;;  %v3836_v49 = vsub.f32 %v8760_v51, %v10321_v36  ;;  %v3842_v36 = vsub.f32 %v8772_v52, %v10323_v58  ;;  %v10334_v58 = vand.u32 4294901760, %v8806_v32  ;;  %v2754_v13 = vadd.f32 %v2753_v42, %v2713_v40  ;;  %v300_v42 = vld [vmem:[#allocation5 + $0x770] sm:$0xff] }
 0x21f   :  { %3757 = vmatpush.msrb.mxu0 %v8733_v28  ;;  %3903 = vmatpush.msrb.mxu2 %v8736_v5  ;;  %v8841_v35 = vsub.f32 %v192_v20, %v8816_v27  ;;  %v8843_v40 = vand.u32 4294901760, %v308_v61  ;;  %v8860_v50 = vand.u32 4294901760, %v300_v42 }
 0x220   :  { %3814 = vmatpush.msrb.mxu1 %v3813_v55  ;;  %3947 = vmatpush.msrb.mxu3 %v8696_v8  ;;  %v312_v55 = vld [vmem:[#allocation5 + $0x7d0] sm:$0xff]  ;;  %v3860_v20 = vsub.f32 %v8806_v32, %v10334_v58 }
 0x221   :  { %3759 = vmatpush.msrb.mxu0 %v8744_v41  ;;  %3906 = vmatpush.msrb.mxu2 %v8748_v22  ;;  %v8829_v2 = vand.u32 4294901760, %v312_v55  ;;  %10613 = vst [vmem:[#allocation33_spill] sm:$0xff] %v8843_v40  ;;  %v8865_v58 = vsub.f32 %v308_v61, %v8843_v40  ;;  %v10619_v61 = vand.u32 4294901760, %v8841_v35 }
 0x222   :  { %3820 = vmatpush.msrb.mxu1 %v3819_v18  ;;  %3949 = vmatpush.msrb.mxu3 %v8709_v59  ;;  %v3837_v18 = vand.u32 4294901760, %v3836_v49  ;;  %v3843_v49 = vand.u32 4294901760, %v3842_v36  ;;  %v3849_v36 = vand.u32 4294901760, %v3848_v39  ;;  %v2908_v10 = vpop.f32.mrf.mxu0  ;;  %v3855_v39 = vand.u32 4294901760, %v3854_v54 }
 0x223   :  { %3761 = vmatpush.msrb.mxu0 %v8756_v53  ;;  %3909 = vmatpush.msrb.mxu2 %v8760_v51  ;;  %10612 = vst [vmem:[#allocation28_spill] sm:$0xff] %v8829_v2  ;;  %v8855_v44 = vsub.f32 %v312_v55, %v8829_v2  ;;  %v10615_v55 = vand.u32 4294901760, %v8822_v46  ;;  %v3861_v54 = vand.u32 4294901760, %v3860_v20  ;;  %v10618_v20 = vand.u32 4294901760, %v8651_v63  ;;  %v284_v63 = vld [vmem:[#allocation5 + $0x6f0] sm:$0xff] }
 0x224   :  { %3826 = vmatpush.msrb.mxu1 %v3825_v48  ;;  %3951 = vmatpush.msrb.mxu3 %v8720_v29  ;;  %v2854_v48 = vpop.f32.mrf.mxu3  ;;  %v3872_v7 = vsub.f32 %v8841_v35, %v10619_v61 }
 0x225   :  { %3763 = vmatpush.msrb.mxu0 %v8768_v60  ;;  %3912 = vmatpush.msrb.mxu2 %v8772_v52  ;;  %v2855_v34 = vadd.f32 %v2854_v48, %v2754_v13  ;;  %v3866_v48 = vsub.f32 %v8822_v46, %v10615_v55  ;;  %v288_v55 = vld [vmem:[#allocation5 + $0x710] sm:$0xff]  ;;  %v10621_v61 = vand.u32 4294901760, %v8855_v44 }
 0x226   :  { %3832 = vmatpush.msrb.mxu1 %v3831_v3  ;;  %3953 = vmatpush.msrb.mxu3 %v8733_v28  ;;  %v8848_v3 = vand.u32 4294901760, %v304_v43  ;;  %v8906_v4 = vand.u32 4294901760, %v288_v55 }
 0x227   :  { %3765 = vmatpush.msrb.mxu0 %v8780_v30  ;;  %3915 = vmatpush.msrb.mxu2 %v8784_v17  ;;  %v2909_v13 = vadd.f32 %v2908_v10, %v2855_v34  ;;  %v10617_v34 = vand.u32 4294901760, %v8834_v0 }
 0x228   :  { %10614 = vst [vmem:[#allocation29_spill] sm:$0xff] %v8848_v3  ;;  %3838 = vmatpush.msrb.mxu1 %v3837_v18  ;;  %3955 = vmatpush.msrb.mxu3 %v8744_v41  ;;  %v296_v18 = vld [vmem:[#allocation5 + $0x750] sm:$0xff]  ;;  %v8873_v33 = vsub.f32 %v304_v43, %v8848_v3 }
 0x229   :  { %3767 = vmatpush.msrb.mxu0 %v8798_v24  ;;  %3918 = vmatpush.msrb.mxu2 %v8794_v37  ;;  %v8877_v14 = vand.u32 4294901760, %v296_v18  ;;  %v4123_v10 = vsub.f32 %v8834_v0, %v10617_v34 }
 0x22a   :  { %3844 = vmatpush.msrb.mxu1 %v3843_v49  ;;  %3957 = vmatpush.msrb.mxu3 %v8756_v53  ;;  %v292_v49 = vld [vmem:[#allocation5 + $0x730] sm:$0xff] }
 0x22b   :  { %3769 = vmatpush.msrb.mxu0 %v8816_v27  ;;  %3921 = vmatpush.msrb.mxu2 %v8806_v32  ;;  %v8893_v23 = vand.u32 4294901760, %v292_v49 }
 0x22c   :  { %3850 = vmatpush.msrb.mxu1 %v3849_v36  ;;  %3959 = vmatpush.msrb.mxu3 %v8768_v60  ;;  %v2947_v6 = vpop.f32.mrf.mxu1  ;;  %v3016_v11 = vpop.f32.mrf.mxu2  ;;  %v8885_v36 = vsub.f32 %v300_v42, %v8860_v50 }
 0x22d   :  { %3775 = vmatmul.f32.vlgmr.msrb.gmra.mxu0 %v10616_v31  ;;  %3924 = vmatpush.msrb.mxu2 %v8822_v46  ;;  %v2948_v43 = vadd.f32 %v2947_v6, %v2909_v13  ;;  %v3867_v6 = vand.u32 4294901760, %v3866_v48  ;;  %v8904_v31 = vsub.f32 %v296_v18, %v8877_v14  ;;  %v4124_v48 = vand.u32 4294901760, %v4123_v10 }
 0x22e   :  { %3976 = vmatpush.msra.mxu0 %v10618_v20  ;;  %3856 = vmatpush.msrb.mxu1 %v3855_v39  ;;  %v10620_v39 = vand.u32 4294901760, %v8661_v26  ;;  %v4129_v20 = vsub.f32 %v8855_v44, %v10621_v61  ;;  %v3873_v61 = vand.u32 4294901760, %v3872_v7  ;;  %v10625_v18 = vand.u32 4294901760, %v8865_v58  ;;  %v276_v7 = vld [vmem:[#allocation5 + $0x6b0] sm:$0xff] }
 0x22f   :  { %3961 = vmatpush.msrb.mxu3 %v8780_v30  ;;  %3927 = vmatpush.msrb.mxu2 %v8841_v35  ;;  %v3017_v42 = vadd.f32 %v3016_v11, %v2948_v43  ;;  %v3053_v34 = vpop.f32.mrf.mxu3  ;;  %v10622_v11 = vld [vmem:[#allocation21_spill] sm:$0xff]  ;;  %v8920_v38 = vsub.f32 %v292_v49, %v8893_v23  ;;  %v10627_v10 = vand.u32 4294901760, %v8873_v33  ;;  %v10631_v57 = vand.u32 4294901760, %v8885_v36 }
 0x230   :  { %3980 = vmatpush.msra.mxu0 %v10620_v39  ;;  %3862 = vmatpush.msrb.mxu1 %v3861_v54  ;;  %v280_v39 = vld [vmem:[#allocation5 + $0x6d0] sm:$0xff]  ;;  %v10624_v54 = vand.u32 4294901760, %v8672_v45  ;;  %v4135_v13 = vsub.f32 %v8865_v58, %v10625_v18  ;;  %v4130_v49 = vand.u32 4294901760, %v4129_v20  ;;  %v10632_v20 = vand.u32 4294901760, %v8688_v62 }
 0x231   :  { %3963 = vmatpush.msrb.mxu3 %v8798_v24  ;;  %3930 = vmatmul.f32.vlgmr.msrb.gmra.mxu2 %v10622_v11  ;;  %v8910_v43 = vadd.f32 %v3053_v34, %v3017_v42  ;;  %10626 = vst [vmem:[#allocation30_spill] sm:$0xff] %v8920_v38  ;;  %v8922_v11 = vand.u32 4294901760, %v284_v63  ;;  %v4141_v45 = vsub.f32 %v8873_v33, %v10627_v10  ;;  %v10629_v34 = vld [vmem:[#allocation22_spill] sm:$0xff]  ;;  %v8938_v26 = vand.u32 4294901760, %v280_v39 }
 0x232   :  { %3984 = vmatpush.msra.mxu0 %v10624_v54  ;;  %4080 = vmatpush.msra.mxu2 %v8810_v12  ;;  %v10630_v54 = vand.u32 4294901760, %v8683_v19  ;;  %v272_v19 = vld [vmem:[#allocation5 + $0x690] sm:$0xff]  ;;  %v10634_v62 = vand.u32 4294901760, %v8904_v31 }
 0x233   :  { %10623 = vst [vmem:[#allocation32_spill] sm:$0xff] %v8910_v43  ;;  %3868 = vmatpush.msrb.mxu1 %v3867_v6  ;;  %3965 = vmatpush.msrb.mxu3 %v8816_v27  ;;  %v8929_v42 = vmul.f32 0.70710677, %v8910_v43  ;;  %v8936_v6 = vsub.f32 %v288_v55, %v8906_v4  ;;  %v8950_v18 = vsub.f32 %v284_v63, %v8922_v11  ;;  %v8952_v43 = vand.u32 4294901760, %v276_v7 }
 0x234   :  { %3969 = vmatmul.f32.vlgmr.msrb.gmra.mxu3 %v10629_v34  ;;  %3988 = vmatpush.msra.mxu0 %v10630_v54  ;;  %v4147_v34 = vsub.f32 %v8885_v36, %v10631_v57  ;;  %v4136_v54 = vand.u32 4294901760, %v4135_v13  ;;  %v268_v57 = vld [vmem:[#allocation5 + $0x670] sm:$0xff]  ;;  %v4153_v13 = vsub.f32 %v8904_v31, %v10634_v62  ;;  %v10635_v55 = vand.u32 4294901760, %v8702_v47 }
 0x235   :  { %10628 = vst [vmem:[#allocation31_spill] sm:$0xff] %v8929_v42  ;;  %4082 = vmatpush.msra.mxu2 %v8829_v2  ;;  %4125 = vmatpush.msra.mxu3 %v4124_v48  ;;  %v5832_v10 = vmul.f32 %v8929_v42, %v8929_v42  ;;  %v10633_v48 = vld [vmem:[#allocation20_spill] sm:$0xff]  ;;  %v4142_v42 = vand.u32 4294901760, %v4141_v45  ;;  %v8979_v63 = vsub.f32 %v276_v7, %v8952_v43  ;;  %v8981_v47 = vand.u32 4294901760, %v268_v57 }
 0x236   :  { %3874 = vmatpush.msrb.mxu1 %v3873_v61  ;;  %3992 = vmatpush.msra.mxu0 %v10632_v20  ;;  %v8964_v61 = vsub.f32 %v280_v39, %v8938_v26  ;;  %v8966_v20 = vand.u32 4294901760, %v272_v19 }
 0x237   :  { %3876 = vmatmul.f32.vlgmr.msrb.gmra.mxu1 %v10633_v48  ;;  %4084 = vmatpush.msra.mxu2 %v8843_v40  ;;  %v8956_v2 = vmin.f32 %v5832_v10, 16.0  ;;  %v10636_v10 = vand.u32 4294901760, %v8920_v38  ;;  %v260_v40 = vld [vmem:[#allocation5 + $0x630] sm:$0xff] }
 0x238   :  { %4043 = vmatpush.msra.mxu1 %v8634_v15  ;;  %4131 = vmatpush.msra.mxu3 %v4130_v49  ;;  %v4148_v49 = vand.u32 4294901760, %v4147_v34  ;;  %v4176_v7 = vand.u32 4294901760, %v8964_v61 }
 0x239   :  { %3996 = vmatpush.msra.mxu0 %v10635_v55  ;;  %4086 = vmatpush.msra.mxu2 %v8848_v3  ;;  %v5834_v45 = vmul.f32 2.1237322e-06, %v8956_v2  ;;  %v5845_v15 = vmul.f32 3.8918573e-05, %v8956_v2  ;;  %v4159_v39 = vsub.f32 %v8920_v38, %v10636_v10  ;;  %v264_v55 = vld [vmem:[#allocation5 + $0x650] sm:$0xff]  ;;  %v10637_v3 = vand.u32 4294901760, %v8723_v16 }
 0x23a   :  { %4045 = vmatpush.msra.mxu1 %v8641_v25  ;;  %4137 = vmatpush.msra.mxu3 %v4136_v54  ;;  %v4154_v54 = vand.u32 4294901760, %v4153_v13  ;;  %v10638_v10 = vand.u32 4294901760, %v8936_v6  ;;  %v8992_v38 = vsub.f32 %v272_v19, %v8966_v20  ;;  %v10640_v13 = vand.u32 4294901760, %v8950_v18 }
 0x23b   :  { %4000 = vmatpush.msra.mxu0 %v10637_v3  ;;  %4088 = vmatpush.msra.mxu2 %v8860_v50  ;;  %v5835_v34 = vadd.f32 0.00028619796, %v5834_v45  ;;  %v5846_v25 = vadd.f32 0.001143296, %v5845_v15  ;;  %v10639_v45 = vand.u32 4294901760, %v8736_v5  ;;  %v4182_v15 = vand.u32 4294901760, %v8979_v63 }
 0x23c   :  { %4047 = vmatpush.msra.mxu1 %v8648_v1  ;;  %4143 = vmatpush.msra.mxu3 %v4142_v42  ;;  %v4165_v62 = vsub.f32 %v8936_v6, %v10638_v10  ;;  %v8999_v1 = vand.u32 4294901760, %v264_v55  ;;  %v4160_v42 = vand.u32 4294901760, %v4159_v39  ;;  %v4171_v19 = vsub.f32 %v8950_v18, %v10640_v13 }
 0x23d   :  { %v5836_v16 = vmul.f32 %v5835_v34, %v8956_v2  ;;  %v5847_v3 = vmul.f32 %v5846_v25, %v8956_v2  ;;  %4004 = vmatpush.msra.mxu0 %v10639_v45  ;;  %4090 = vmatpush.msra.mxu2 %v8877_v14  ;;  %v9007_v34 = vsub.f32 %v268_v57, %v8981_v47  ;;  %v256_v25 = vld [vmem:[#allocation5 + $0x610] sm:$0xff]  ;;  %v10641_v10 = vand.u32 4294901760, %v8748_v22 }
 0x23e   :  { %4049 = vmatpush.msra.mxu1 %v8658_v56  ;;  %4149 = vmatpush.msra.mxu3 %v4148_v49  ;;  %v9012_v45 = vand.u32 4294901760, %v260_v40  ;;  %v4166_v49 = vand.u32 4294901760, %v4165_v62  ;;  %v4177_v39 = vsub.f32 %v8964_v61, %v4176_v7  ;;  %v4188_v57 = vand.u32 4294901760, %v8992_v38 }
 0x23f   :  { %v5848_v5 = vadd.f32 0.014752088, %v5847_v3  ;;  %4008 = vmatpush.msra.mxu0 %v10641_v10  ;;  %4092 = vmatpush.msra.mxu2 %v8893_v23  ;;  %v5837_v56 = vadd.f32 0.0036580483, %v5836_v16  ;;  %v10642_v22 = vand.u32 4294901760, %v8760_v51  ;;  %v9024_v13 = vsub.f32 %v264_v55, %v8999_v1 }
 0x240   :  { %4051 = vmatpush.msra.mxu1 %v8665_v21  ;;  %4155 = vmatpush.msra.mxu3 %v4154_v54  ;;  %v9026_v16 = vand.u32 4294901760, %v256_v25  ;;  %v4172_v21 = vand.u32 4294901760, %v4171_v19  ;;  %v4183_v62 = vsub.f32 %v8979_v63, %v4182_v15  ;;  %v4194_v54 = vand.u32 4294901760, %v9007_v34 }
 0x241   :  { %v5849_v3 = vmul.f32 %v5848_v5, %v8956_v2  ;;  %4012 = vmatpush.msra.mxu0 %v10642_v22  ;;  %4094 = vmatpush.msra.mxu2 %v8906_v4  ;;  %v10643_v51 = vand.u32 4294901760, %v8772_v52  ;;  %v9037_v55 = vsub.f32 %v260_v40, %v9012_v45  ;;  %v5838_v10 = vmul.f32 %v5837_v56, %v8956_v2 }
 0x242   :  { %4053 = vmatpush.msra.mxu1 %v8676_v9  ;;  %4161 = vmatpush.msra.mxu3 %v4160_v42  ;;  %v4178_v9 = vand.u32 4294901760, %v4177_v39  ;;  %v4189_v42 = vsub.f32 %v8992_v38, %v4188_v57  ;;  %v10644_v52 = vand.u32 4294901760, %v8784_v17  ;;  %v4200_v40 = vand.u32 4294901760, %v9024_v13 }
 0x243   :  { %v5850_v5 = vadd.f32 0.112945676, %v5849_v3  ;;  %4016 = vmatpush.msra.mxu0 %v10643_v51  ;;  %4096 = vmatpush.msra.mxu2 %v8922_v11  ;;  %v9050_v3 = vsub.f32 %v256_v25, %v9026_v16  ;;  %v4195_v56 = vsub.f32 %v9007_v34, %v4194_v54  ;;  %v10645_v39 = vand.u32 4294901760, %v8794_v37 }
 0x244   :  { %4055 = vmatpush.msra.mxu1 %v8696_v8  ;;  %4167 = vmatpush.msra.mxu3 %v4166_v49  ;;  %v4184_v8 = vand.u32 4294901760, %v4183_v62  ;;  %v4206_v17 = vand.u32 4294901760, %v9037_v55  ;;  %v5839_v22 = vadd.f32 0.05243302, %v5838_v10  ;;  %v4190_v25 = vand.u32 4294901760, %v4189_v42 }
 0x245   :  { %v5851_v19 = vmul.f32 %v5850_v5, %v8956_v2  ;;  %4020 = vmatpush.msra.mxu0 %v10644_v52  ;;  %4098 = vmatpush.msra.mxu2 %v8938_v26  ;;  %v4201_v37 = vsub.f32 %v9024_v13, %v4200_v40  ;;  %v4212_v62 = vand.u32 4294901760, %v9050_v3  ;;  %v4196_v5 = vand.u32 4294901760, %v4195_v56 }
 0x246   :  { %4057 = vmatpush.msra.mxu1 %v8709_v59  ;;  %4173 = vmatpush.msra.mxu3 %v4172_v21  ;;  %v10646_v21 = vand.u32 4294901760, %v8806_v32  ;;  %v10647_v51 = vand.u32 4294901760, %v8822_v46  ;;  %v4207_v32 = vsub.f32 %v9037_v55, %v4206_v17  ;;  %v5840_v10 = vmul.f32 %v5839_v22, %v8956_v2 }
 0x247   :  { %v5852_v49 = vadd.f32 0.4994258, %v5851_v19  ;;  %4024 = vmatpush.msra.mxu0 %v10645_v39  ;;  %4100 = vmatpush.msra.mxu2 %v8952_v43  ;;  %v4213_v46 = vsub.f32 %v9050_v3, %v4212_v62  ;;  %v10649_v19 = vld [vmem:[#allocation27_spill] sm:$0xff]  ;;  %v10650_v56 = vand.u32 4294901760, %v8834_v0  ;;  %v10652_v39 = vand.u32 4294901760, %v8855_v44 }
 0x248   :  { %4059 = vmatpush.msra.mxu1 %v8720_v29  ;;  %4179 = vmatpush.msra.mxu3 %v4178_v9  ;;  %v4202_v9 = vand.u32 4294901760, %v4201_v37  ;;  %v5841_v42 = vadd.f32 0.18741608, %v5840_v10  ;;  %v10660_v10 = vld [vmem:[#allocation29_spill] sm:$0xff] }
 0x249   :  { %v5853_v59 = vmul.f32 %v5852_v49, %v8956_v2  ;;  %4028 = vmatpush.msra.mxu0 %v10646_v21  ;;  %4102 = vmatpush.msra.mxu2 %v8966_v20  ;;  %v10651_v49 = vld [vmem:[#allocation24_spill] sm:$0xff]  ;;  %v10655_v21 = vand.u32 4294901760, %v8873_v33 }
 0x24a   :  { %4061 = vmatpush.msra.mxu1 %v8733_v28  ;;  %4185 = vmatpush.msra.mxu3 %v4184_v8  ;;  %v10648_v28 = vand.u32 4294901760, %v8841_v35  ;;  %v4214_v35 = vand.u32 4294901760, %v4213_v46  ;;  %v5842_v52 = vmul.f32 %v5841_v42, %v8956_v2 }
 0x24b   :  { %v5854_v29 = vadd.f32 1.0, %v5853_v59  ;;  %4032 = vmatpush.msra.mxu0 %v10647_v51  ;;  %4104 = vmatpush.msra.mxu2 %v8981_v47  ;;  %v10658_v51 = vld [vmem:[#allocation30_spill] sm:$0xff] }
 0x24c   :  { %4063 = vmatpush.msra.mxu1 %v8744_v41  ;;  %4191 = vmatpush.msra.mxu3 %v4190_v25  ;;  %v4208_v41 = vand.u32 4294901760, %v4207_v32  ;;  %v5843_v2 = vadd.f32 1.1283791, %v5842_v52 }
 0x24d   :  { %5994 = vrcp.f32 %v5854_v29  ;;  %4036 = vmatpush.msra.mxu0 %v10648_v28  ;;  %4106 = vmatpush.msra.mxu2 %v8999_v1  ;;  %v5864_v25 = vand.u32 2147483647, %v5854_v29  ;;  %vm5860_vm5 = vweird.f32 %v5854_v29 }
 0x24e   :  { %4065 = vmatpush.msra.mxu1 %v8756_v53  ;;  %4197 = vmatpush.msra.mxu3 %v4196_v5 }
 0x24f   :  { %4038 = vmatmul.f32.vlgmr.msra.gmra.mxu0 %v10633_v48  ;;  %4108 = vmatpush.msra.mxu2 %v9012_v45  ;;  %vm5865_vm7 = vcmp.eq.f32.partialorder %v5864_v25, 8.507059e+37 }
 0x250   :  { %4223 = vmatpush.msrb.mxu0 %v8834_v0  ;;  %4067 = vmatpush.msra.mxu1 %v8768_v60 }
 0x251   :  { %4203 = vmatpush.msra.mxu3 %v4202_v9  ;;  %4110 = vmatpush.msra.mxu2 %v9026_v16  ;;  %v10663_v9 = vld [vmem:[#allocation32_spill] sm:$0xff] }
 0x252   :  { %4226 = vmatpush.msrb.mxu0 %v8855_v44  ;;  %4069 = vmatpush.msra.mxu1 %v8780_v30  ;;  %v5866_v30 = vand.u32 2147483648, %v5854_v29  ;;  %v10654_v44 = vld [vmem:[#allocation28_spill] sm:$0xff]  ;;  %v5785_v46 = vmul.f32 0.5, %v10663_v9 }
 0x253   :  { %v5995_v53 = vpop.eup %5994  ;;  %4209 = vmatpush.msra.mxu3 %v4208_v41  ;;  %4116 = vmatmul.f32.vlgmr.msra.gmra.mxu2 %v10649_v19 }
 0x254   :  { %v5856_v8 = vmul.f32 %v5995_v53, %v5854_v29  ;;  %4229 = vmatpush.msrb.mxu0 %v8865_v58  ;;  %4317 = vmatpush.msrb.mxu2 %v10650_v56  ;;  %vm5861_vm4 = vweird.f32 %v5995_v53  ;;  %v5867_v59 = vor.u32 1.1754944e-38, %v5866_v30 }
 0x255   :  { %4071 = vmatpush.msra.mxu1 %v8798_v24  ;;  %4215 = vmatpush.msra.mxu3 %v4214_v35  ;;  %v10653_v24 = vand.u32 4294901760, %v8865_v58  ;;  %vm5862_vm6 = vmor %vm5860_vm5, %vm5861_vm4  ;;  %v10657_v58 = vld [vmem:[#allocation33_spill] sm:$0xff]  ;;  %v10665_v35 = vand.u32 4294901760, %v8950_v18 }
 0x256   :  { %v5857_v60 = vsub.f32 1.0, %v5856_v8  ;;  %4217 = vmatmul.f32.vlgmr.msra.gmra.mxu3 %v10651_v49  ;;  %4232 = vmatpush.msrb.mxu0 %v8873_v33  ;;  %v10661_v33 = vand.u32 4294901760, %v8904_v31  ;;  %v93_v8 = vld [vmem:[#allocation5 + $0xf8] sm:$0xff] }
 0x257   :  { %4321 = vmatpush.msrb.mxu2 %v10652_v39  ;;  %4384 = vmatpush.msrb.mxu3 %v8810_v12  ;;  %v9227_v30 = vand.u32 4294901760, %v93_v8 }
 0x258   :  { %v5858_v22 = vmul.f32 %v5995_v53, %v5857_v60  ;;  %4073 = vmatpush.msra.mxu1 %v8816_v27  ;;  %4235 = vmatpush.msrb.mxu0 %v8885_v36  ;;  %v10656_v27 = vld [vmem:[#allocation31_spill] sm:$0xff] }
 0x259   :  { %4075 = vmatmul.f32.vlgmr.msra.gmra.mxu1 %v10633_v48  ;;  %4325 = vmatpush.msrb.mxu2 %v10653_v24  ;;  %v5844_v37 = vmul.f32 %v5843_v2, %v10656_v27  ;;  %v89_v60 = vld [vmem:[#allocation5 + $0xd8] sm:$0xff] }
 0x25a   :  { %v5859_v0 = vadd.f32 %v5995_v53, %v5858_v22  ;;  %4276 = vmatpush.msrb.mxu1 %v8810_v12  ;;  %4386 = vmatpush.msrb.mxu3 %v10654_v44  ;;  %v10659_v12 = vand.u32 4294901760, %v8885_v36  ;;  %v10662_v36 = vand.u32 4294901760, %v10658_v51  ;;  %v85_v24 = vld [vmem:[#allocation5 + $0xb8] sm:$0xff] }
 0x25b   :  { %4238 = vmatpush.msrb.mxu0 %v8904_v31  ;;  %4329 = vmatpush.msrb.mxu2 %v10655_v21  ;;  %v10664_v31 = vand.u32 4294901760, %v8936_v6  ;;  %v10667_v27 = vld [vmem:[#allocation26_spill] sm:$0xff] }
 0x25c   :  { %v5863_v5 = vsel %vm5862_vm6, %v5995_v53, %v5859_v0  ;;  %4278 = vmatpush.msrb.mxu1 %v10654_v44  ;;  %4388 = vmatpush.msrb.mxu3 %v10657_v58  ;;  %v125_v53 = vld [vmem:[#allocation5 + $0x1f8] sm:$0xff] }
 0x25d   :  { %v5868_v29 = vsel %vm5865_vm7, %v5867_v59, %v5863_v5  ;;  %4241 = vmatpush.msrb.mxu0 %v10658_v51  ;;  %4333 = vmatpush.msrb.mxu2 %v10659_v12  ;;  %v141_v48 = vld [vmem:[#allocation5 + $0x278] sm:$0xff] }
 0x25e   :  { %v5869_v32 = vmul.f32 %v5868_v29, %v5844_v37  ;;  %4280 = vmatpush.msrb.mxu1 %v10657_v58  ;;  %4390 = vmatpush.msrb.mxu3 %v10660_v10  ;;  %v9254_v37 = vsub.f32 %v93_v8, %v9227_v30  ;;  %v9260_v29 = vand.u32 4294901760, %v85_v24 }
 0x25f   :  { %4244 = vmatpush.msrb.mxu0 %v8936_v6  ;;  %4337 = vmatpush.msrb.mxu2 %v10661_v33 }
 0x260   :  { %v5983_v28 = vclamps-f32 %v5869_v32, 1.0  ;;  %4282 = vmatpush.msrb.mxu1 %v10660_v10  ;;  %4392 = vmatpush.msrb.mxu3 %v8860_v50  ;;  %v77_v32 = vld [vmem:[#allocation5 + $0x78] sm:$0xff]  ;;  %v10349_v9 = vand.u32 4294901760, %v9254_v37 }
 0x261   :  { %4247 = vmatpush.msrb.mxu0 %v8950_v18  ;;  %4341 = vmatpush.msrb.mxu2 %v10662_v36 }
 0x262   :  { %v5953_v41 = vadd.f32 1.0, %v5983_v28  ;;  %4284 = vmatpush.msrb.mxu1 %v8860_v50  ;;  %4394 = vmatpush.msrb.mxu3 %v8877_v14  ;;  %v121_v50 = vld [vmem:[#allocation5 + $0x1d8] sm:$0xff] }
 0x263   :  { %4250 = vmatpush.msrb.mxu0 %v8964_v61  ;;  %4345 = vmatpush.msrb.mxu2 %v10664_v31  ;;  %v9154_v18 = vand.u32 4294901760, %v121_v50  ;;  %v105_v61 = vld [vmem:[#allocation5 + $0x158] sm:$0xff] }
 0x264   :  { %v5957_v42 = vmul.f32 %v5953_v41, %v5785_v46  ;;  %4286 = vmatpush.msrb.mxu1 %v8877_v14  ;;  %4396 = vmatpush.msrb.mxu3 %v8893_v23  ;;  %v9147_v14 = vand.u32 4294901760, %v125_v53  ;;  %v73_v46 = vld [vmem:[#allocation5 + $0x58] sm:$0xff] }
 0x265   :  { %4253 = vmatpush.msrb.mxu0 %v8979_v63  ;;  %4349 = vmatpush.msrb.mxu2 %v10665_v35  ;;  %v9285_v35 = vsub.f32 %v85_v24, %v9260_v29 }
 0x266   :  { %5961 = vst [vmem:[#allocation8 + $0x8] sm:$0xff] %v5957_v42  ;;  %4288 = vmatpush.msrb.mxu1 %v8893_v23  ;;  %4398 = vmatpush.msrb.mxu3 %v8906_v4  ;;  %v117_v23 = vld [vmem:[#allocation5 + $0x1b8] sm:$0xff]  ;;  %v9164_v63 = vsub.f32 %v125_v53, %v9147_v14  ;;  %v9282_v42 = vand.u32 4294901760, %v77_v32 }
 0x267   :  { %4256 = vmatpush.msrb.mxu0 %v8992_v38  ;;  %4353 = vmatpush.msrb.mxu2 %v4176_v7  ;;  %v9161_v6 = vand.u32 4294901760, %v117_v23 }
 0x268   :  { %4290 = vmatpush.msrb.mxu1 %v8906_v4  ;;  %4400 = vmatpush.msrb.mxu3 %v8922_v11  ;;  %v113_v4 = vld [vmem:[#allocation5 + $0x198] sm:$0xff] }
 0x269   :  { %4259 = vmatpush.msrb.mxu0 %v9007_v34  ;;  %4357 = vmatpush.msrb.mxu2 %v4182_v15  ;;  %v9171_v38 = vand.u32 4294901760, %v113_v4  ;;  %v9185_v15 = vsub.f32 %v117_v23, %v9161_v6  ;;  %v10666_v34 = vld [vmem:[#allocation25_spill] sm:$0xff] }
 0x26a   :  { %4292 = vmatpush.msrb.mxu1 %v8922_v11  ;;  %4402 = vmatpush.msrb.mxu3 %v8938_v26  ;;  %v109_v11 = vld [vmem:[#allocation5 + $0x178] sm:$0xff] }
 0x26b   :  { %4262 = vmatpush.msrb.mxu0 %v9024_v13  ;;  %4361 = vmatpush.msrb.mxu2 %v4188_v57  ;;  %v9181_v7 = vand.u32 4294901760, %v109_v11  ;;  %v101_v57 = vld [vmem:[#allocation5 + $0x138] sm:$0xff] }
 0x26c   :  { %4294 = vmatpush.msrb.mxu1 %v8938_v26  ;;  %4404 = vmatpush.msrb.mxu3 %v8952_v43  ;;  %v9174_v26 = vsub.f32 %v121_v50, %v9154_v18  ;;  %v69_v50 = vld [vmem:[#allocation5 + $0x38] sm:$0xff] }
 0x26d   :  { %4265 = vmatpush.msrb.mxu0 %v9037_v55  ;;  %4365 = vmatpush.msrb.mxu2 %v4194_v54  ;;  %v9196_v54 = vsub.f32 %v113_v4, %v9171_v38  ;;  %v9206_v55 = vand.u32 4294901760, %v101_v57  ;;  %v9210_v52 = vsub.f32 %v109_v11, %v9181_v7  ;;  %v9294_v11 = vand.u32 4294901760, %v73_v46 }
 0x26e   :  { %4296 = vmatpush.msrb.mxu1 %v8952_v43  ;;  %4406 = vmatpush.msrb.mxu3 %v8966_v20  ;;  %v4463_v43 = vand.u32 4294901760, %v9164_v63  ;;  %v10360_v13 = vand.u32 4294901760, %v9174_v26 }
 0x26f   :  { %4268 = vmatpush.msrb.mxu0 %v9050_v3  ;;  %4369 = vmatpush.msrb.mxu2 %v4200_v40  ;;  %v97_v40 = vld [vmem:[#allocation5 + $0x118] sm:$0xff]  ;;  %v10355_v22 = vand.u32 4294901760, %v9210_v52  ;;  %v9236_v25 = vsub.f32 %v101_v57, %v9206_v55 }
 0x270   :  { %4298 = vmatpush.msrb.mxu1 %v8966_v20  ;;  %4408 = vmatpush.msrb.mxu3 %v8981_v47  ;;  %v9192_v20 = vand.u32 4294901760, %v105_v61  ;;  %v9219_v3 = vand.u32 4294901760, %v97_v40  ;;  %v189_v57 = vld [vmem:[#allocation5 + $0x3f8] sm:$0xff] }
 0x271   :  { %4271 = vmatmul.f32.vlgmr.msrb.gmra.mxu0 %v10666_v34  ;;  %4373 = vmatpush.msrb.mxu2 %v4206_v17  ;;  %v10359_v17 = vand.u32 4294901760, %v9185_v15  ;;  %v4488_v58 = vsub.f32 %v9210_v52, %v10355_v22  ;;  %v10352_v51 = vand.u32 4294901760, %v9236_v25  ;;  %v9316_v24 = vand.u32 4294901760, %v189_v57 }
 0x272   :  { %4421 = vmatpush.msra.mxu0 %v9147_v14  ;;  %4300 = vmatpush.msrb.mxu1 %v8981_v47  ;;  %v4464_v47 = vsub.f32 %v9164_v63, %v4463_v43  ;;  %v9223_v56 = vsub.f32 %v105_v61, %v9192_v20  ;;  %v9249_v21 = vsub.f32 %v97_v40, %v9219_v3 }
 0x273   :  { %4410 = vmatpush.msrb.mxu3 %v8999_v1  ;;  %4377 = vmatpush.msrb.mxu2 %v4212_v62  ;;  %v10357_v62 = vand.u32 4294901760, %v9196_v54  ;;  %v4476_v2 = vsub.f32 %v9185_v15, %v10359_v17  ;;  %v4489_v41 = vand.u32 4294901760, %v4488_v58  ;;  %v4500_v31 = vsub.f32 %v9236_v25, %v10352_v51 }
 0x274   :  { %4423 = vmatpush.msra.mxu0 %v9154_v18  ;;  %4302 = vmatpush.msrb.mxu1 %v8999_v1  ;;  %v4470_v1 = vsub.f32 %v9174_v26, %v10360_v13  ;;  %v4465_v39 = vand.u32 4294901760, %v4464_v47  ;;  %v10354_v59 = vand.u32 4294901760, %v9223_v56  ;;  %v10351_v36 = vand.u32 4294901760, %v9249_v21  ;;  %v65_v47 = vld [vmem:[#allocation5 + $0x18] sm:$0xff] }
 0x275   :  { %4412 = vmatpush.msrb.mxu3 %v9012_v45  ;;  %4379 = vmatmul.f32.vlgmr.msrb.gmra.mxu2 %v10651_v49  ;;  %v4482_v44 = vsub.f32 %v9196_v54, %v10357_v62  ;;  %v4477_v5 = vand.u32 4294901760, %v4476_v2  ;;  %v4512_v40 = vsub.f32 %v9254_v37, %v10349_v9  ;;  %v4501_v8 = vand.u32 4294901760, %v4500_v31  ;;  %v173_v9 = vld [vmem:[#allocation5 + $0x378] sm:$0xff] }
 0x276   :  { %4425 = vmatpush.msra.mxu0 %v9161_v6  ;;  %4564 = vmatpush.msra.mxu2 %v9164_v63  ;;  %v4471_v0 = vand.u32 4294901760, %v4470_v1  ;;  %v4494_v33 = vsub.f32 %v9223_v56, %v10354_v59  ;;  %v4506_v4 = vsub.f32 %v9249_v21, %v10351_v36  ;;  %v9305_v1 = vand.u32 4294901760, %v69_v50 }
 0x277   :  { %4304 = vmatpush.msrb.mxu1 %v9012_v45  ;;  %4414 = vmatpush.msrb.mxu3 %v9026_v16  ;;  %v9240_v45 = vand.u32 4294901760, %v89_v60  ;;  %v4483_v10 = vand.u32 4294901760, %v4482_v44  ;;  %v9323_v58 = vsub.f32 %v73_v46, %v9294_v11  ;;  %v9367_v51 = vand.u32 4294901760, %v173_v9 }
 0x278   :  { %4416 = vmatmul.f32.vlgmr.msrb.gmra.mxu3 %v10651_v49  ;;  %4427 = vmatpush.msra.mxu0 %v9171_v38  ;;  %v4495_v23 = vand.u32 4294901760, %v4494_v33  ;;  %v4507_v44 = vand.u32 4294901760, %v4506_v4  ;;  %v9333_v31 = vsub.f32 %v69_v50, %v9305_v1  ;;  %v10669_v63 = vand.u32 4294901760, %v9174_v26 }
 0x279   :  { %4567 = vmatpush.msra.mxu2 %v9174_v26  ;;  %4617 = vmatpush.msra.mxu3 %v9147_v14  ;;  %v9266_v12 = vsub.f32 %v89_v60, %v9240_v45  ;;  %v10347_v60 = vand.u32 4294901760, %v9285_v35  ;;  %v10356_v50 = vand.u32 4294901760, %v9323_v58  ;;  %v10671_v26 = vand.u32 4294901760, %v9185_v15 }
 0x27a   :  { %4306 = vmatpush.msrb.mxu1 %v9026_v16  ;;  %4429 = vmatpush.msra.mxu0 %v9181_v7  ;;  %v81_v16 = vld [vmem:[#allocation5 + $0x98] sm:$0xff] }
 0x27b   :  { %4310 = vmatmul.f32.vlgmr.msrb.gmra.mxu1 %v10667_v27  ;;  %4570 = vmatpush.msra.mxu2 %v9185_v15  ;;  %v9272_v28 = vand.u32 4294901760, %v81_v16  ;;  %v10348_v53 = vand.u32 4294901760, %v9266_v12  ;;  %v4524_v33 = vsub.f32 %v9285_v35, %v10347_v60  ;;  %v10673_v15 = vand.u32 4294901760, %v9196_v54 }
 0x27c   :  { %4466 = vmatpush.msra.mxu1 %v4465_v39  ;;  %4619 = vmatpush.msra.mxu3 %v9154_v18  ;;  %v9309_v39 = vsub.f32 %v77_v32, %v9282_v42  ;;  %v4513_v32 = vand.u32 4294901760, %v4512_v40  ;;  %v9340_v40 = vsub.f32 %v189_v57, %v9316_v24 }
 0x27d   :  { %4431 = vmatpush.msra.mxu0 %v9192_v20  ;;  %4573 = vmatpush.msra.mxu2 %v9196_v54  ;;  %v9297_v61 = vsub.f32 %v81_v16, %v9272_v28  ;;  %v4518_v2 = vsub.f32 %v9266_v12, %v10348_v53  ;;  %v9319_v16 = vand.u32 4294901760, %v65_v47  ;;  %v10675_v54 = vand.u32 4294901760, %v9210_v52 }
 0x27e   :  { %4472 = vmatpush.msra.mxu1 %v4471_v0  ;;  %4621 = vmatpush.msra.mxu3 %v9161_v6  ;;  %v185_v0 = vld [vmem:[#allocation5 + $0x3d8] sm:$0xff]  ;;  %v10361_v36 = vand.u32 4294901760, %v9340_v40 }
 0x27f   :  { %4433 = vmatpush.msra.mxu0 %v9206_v55  ;;  %4576 = vmatpush.msra.mxu2 %v9210_v52  ;;  %v9335_v46 = vand.u32 4294901760, %v185_v0  ;;  %v4519_v4 = vand.u32 4294901760, %v4518_v2  ;;  %v9348_v60 = vsub.f32 %v65_v47, %v9319_v16  ;;  %v4525_v2 = vand.u32 4294901760, %v4524_v33 }
 0x280   :  { %4478 = vmatpush.msra.mxu1 %v4477_v5  ;;  %4623 = vmatpush.msra.mxu3 %v9171_v38  ;;  %v10350_v5 = vand.u32 4294901760, %v9297_v61  ;;  %v10358_v47 = vand.u32 4294901760, %v9333_v31  ;;  %v10677_v52 = vand.u32 4294901760, %v9223_v56 }
 0x281   :  { %4435 = vmatpush.msra.mxu0 %v9219_v3  ;;  %4579 = vmatpush.msra.mxu2 %v9223_v56  ;;  %v10678_v56 = vand.u32 4294901760, %v9236_v25 }
 0x282   :  { %4484 = vmatpush.msra.mxu1 %v4483_v10  ;;  %4625 = vmatpush.msra.mxu3 %v9181_v7  ;;  %v181_v10 = vld [vmem:[#allocation5 + $0x3b8] sm:$0xff] }
 0x283   :  { %4437 = vmatpush.msra.mxu0 %v9227_v30  ;;  %4582 = vmatpush.msra.mxu2 %v9236_v25  ;;  %v9350_v53 = vand.u32 4294901760, %v181_v10 }
 0x284   :  { %4490 = vmatpush.msra.mxu1 %v4489_v41  ;;  %4627 = vmatpush.msra.mxu3 %v9192_v20  ;;  %v10353_v41 = vand.u32 4294901760, %v9309_v39 }
 0x285   :  { %4439 = vmatpush.msra.mxu0 %v9240_v45  ;;  %4585 = vmatpush.msra.mxu2 %v9249_v21  ;;  %v9375_v59 = vsub.f32 %v181_v10, %v9350_v53 }
 0x286   :  { %4496 = vmatpush.msra.mxu1 %v4495_v23  ;;  %4629 = vmatpush.msra.mxu3 %v9206_v55  ;;  %v177_v23 = vld [vmem:[#allocation5 + $0x398] sm:$0xff] }
 0x287   :  { %4441 = vmatpush.msra.mxu0 %v9260_v29  ;;  %4588 = vmatpush.msra.mxu2 %v9254_v37  ;;  %v9354_v57 = vand.u32 4294901760, %v177_v23 }
 0x288   :  { %4502 = vmatpush.msra.mxu1 %v4501_v8  ;;  %4631 = vmatpush.msra.mxu3 %v9219_v3  ;;  %v4530_v8 = vsub.f32 %v9297_v61, %v10350_v5  ;;  %v9362_v5 = vsub.f32 %v185_v0, %v9335_v46  ;;  %v10362_v0 = vand.u32 4294901760, %v9348_v60 }
 0x289   :  { %4443 = vmatpush.msra.mxu0 %v9272_v28  ;;  %4591 = vmatpush.msra.mxu2 %v9266_v12  ;;  %v9380_v22 = vsub.f32 %v177_v23, %v9354_v57  ;;  %v4805_v23 = vsub.f32 %v9340_v40, %v10361_v36  ;;  %v157_v36 = vld [vmem:[#allocation5 + $0x2f8] sm:$0xff] }
 0x28a   :  { %4508 = vmatpush.msra.mxu1 %v4507_v44  ;;  %4633 = vmatpush.msra.mxu3 %v9227_v30  ;;  %v4536_v44 = vsub.f32 %v9309_v39, %v10353_v41  ;;  %v4531_v33 = vand.u32 4294901760, %v4530_v8  ;;  %v4542_v41 = vsub.f32 %v9323_v58, %v10356_v50  ;;  %v4548_v50 = vsub.f32 %v9333_v31, %v10358_v47 }
 0x28b   :  { %4445 = vmatpush.msra.mxu0 %v9282_v42  ;;  %4594 = vmatpush.msra.mxu2 %v9285_v35  ;;  %v4554_v17 = vsub.f32 %v9348_v60, %v10362_v0  ;;  %v9428_v49 = vand.u32 4294901760, %v157_v36 }
 0x28c   :  { %4514 = vmatpush.msra.mxu1 %v4513_v32  ;;  %4635 = vmatpush.msra.mxu3 %v9240_v45  ;;  %v169_v32 = vld [vmem:[#allocation5 + $0x358] sm:$0xff]  ;;  %v4537_v8 = vand.u32 4294901760, %v4536_v44  ;;  %v4543_v47 = vand.u32 4294901760, %v4542_v41  ;;  %v4549_v41 = vand.u32 4294901760, %v4548_v50 }
 0x28d   :  { %4447 = vmatpush.msra.mxu0 %v9294_v11  ;;  %4597 = vmatpush.msra.mxu2 %v9297_v61  ;;  %v9387_v10 = vand.u32 4294901760, %v169_v32  ;;  %v161_v44 = vld [vmem:[#allocation5 + $0x318] sm:$0xff]  ;;  %v4555_v50 = vand.u32 4294901760, %v4554_v17 }
 0x28e   :  { %4520 = vmatpush.msra.mxu1 %v4519_v4  ;;  %4637 = vmatpush.msra.mxu3 %v9260_v29  ;;  %v165_v4 = vld [vmem:[#allocation5 + $0x338] sm:$0xff]  ;;  %v9415_v27 = vand.u32 4294901760, %v161_v44 }
 0x28f   :  { %4449 = vmatpush.msra.mxu0 %v9305_v1  ;;  %4600 = vmatpush.msra.mxu2 %v9309_v39  ;;  %v9402_v62 = vand.u32 4294901760, %v165_v4  ;;  %v9413_v13 = vsub.f32 %v169_v32, %v9387_v10 }
 0x290   :  { %4526 = vmatpush.msra.mxu1 %v4525_v2  ;;  %4639 = vmatpush.msra.mxu3 %v9272_v28  ;;  %v9395_v2 = vsub.f32 %v173_v9, %v9367_v51  ;;  %v153_v9 = vld [vmem:[#allocation5 + $0x2d8] sm:$0xff] }
 0x291   :  { %4451 = vmatpush.msra.mxu0 %v9319_v16  ;;  %4603 = vmatpush.msra.mxu2 %v9323_v58  ;;  %v9426_v34 = vsub.f32 %v165_v4, %v9402_v62  ;;  %v9439_v4 = vsub.f32 %v161_v44, %v9415_v27  ;;  %v9451_v44 = vsub.f32 %v157_v36, %v9428_v49 }
 0x292   :  { %4532 = vmatpush.msra.mxu1 %v4531_v33  ;;  %4641 = vmatpush.msra.mxu3 %v9282_v42  ;;  %v10668_v33 = vand.u32 4294901760, %v9362_v5 }
 0x293   :  { %4658 = vmatpush.msrb.mxu0 %v4463_v43  ;;  %4606 = vmatpush.msra.mxu2 %v9333_v31  ;;  %v4806_v43 = vand.u32 4294901760, %v4805_v23  ;;  %v10672_v23 = vand.u32 4294901760, %v9380_v22 }
 0x294   :  { %4538 = vmatpush.msra.mxu1 %v4537_v8  ;;  %4643 = vmatpush.msra.mxu3 %v9294_v11  ;;  %v4811_v0 = vsub.f32 %v9362_v5, %v10668_v33  ;;  %v10670_v33 = vand.u32 4294901760, %v9375_v59  ;;  %v9441_v8 = vand.u32 4294901760, %v153_v9 }
 0x295   :  { %4662 = vmatpush.msrb.mxu0 %v10669_v63  ;;  %4609 = vmatpush.msra.mxu2 %v9348_v60  ;;  %v149_v63 = vld [vmem:[#allocation5 + $0x2b8] sm:$0xff] }
 0x296   :  { %4544 = vmatpush.msra.mxu1 %v4543_v47  ;;  %4645 = vmatpush.msra.mxu3 %v9305_v1  ;;  %v4817_v32 = vsub.f32 %v9375_v59, %v10670_v33  ;;  %v4823_v47 = vsub.f32 %v9380_v22, %v10672_v23  ;;  %v4812_v17 = vand.u32 4294901760, %v4811_v0  ;;  %v10365_v33 = vand.u32 4294901760, %v9426_v34 }
 0x297   :  { %4666 = vmatpush.msrb.mxu0 %v10671_v26  ;;  %4762 = vmatpush.msrb.mxu2 %v9316_v24  ;;  %v10674_v26 = vand.u32 4294901760, %v9395_v2  ;;  %v9453_v19 = vand.u32 4294901760, %v149_v63  ;;  %v9464_v36 = vsub.f32 %v153_v9, %v9441_v8 }
 0x298   :  { %4550 = vmatpush.msra.mxu1 %v4549_v41  ;;  %4647 = vmatpush.msra.mxu3 %v9319_v16  ;;  %v145_v41 = vld [vmem:[#allocation5 + $0x298] sm:$0xff]  ;;  %v4818_v0 = vand.u32 4294901760, %v4817_v32  ;;  %v4846_v32 = vand.u32 4294901760, %v9439_v4 }
 0x299   :  { %4670 = vmatpush.msrb.mxu0 %v10673_v15  ;;  %4764 = vmatpush.msrb.mxu2 %v9335_v46  ;;  %v4829_v23 = vsub.f32 %v9395_v2, %v10674_v26  ;;  %v4824_v15 = vand.u32 4294901760, %v4823_v47  ;;  %v9466_v26 = vand.u32 4294901760, %v145_v41  ;;  %v4841_v47 = vsub.f32 %v9426_v34, %v10365_v33 }
 0x29a   :  { %4807 = vmatpush.msrb.mxu3 %v4806_v43  ;;  %4556 = vmatpush.msra.mxu1 %v4555_v50  ;;  %v10676_v43 = vand.u32 4294901760, %v9413_v13  ;;  %v9477_v9 = vsub.f32 %v149_v63, %v9453_v19  ;;  %v10679_v33 = vand.u32 4294901760, %v9249_v21  ;;  %v10680_v21 = vand.u32 4294901760, %v9254_v37 }
 0x29b   :  { %4674 = vmatpush.msrb.mxu0 %v10675_v54  ;;  %4766 = vmatpush.msrb.mxu2 %v9350_v53  ;;  %v9479_v54 = vand.u32 4294901760, %v141_v48  ;;  %v9490_v63 = vsub.f32 %v145_v41, %v9466_v26  ;;  %v4842_v25 = vand.u32 4294901760, %v4841_v47 }
 0x29c   :  { %4725 = vmatpush.msrb.mxu1 %v9147_v14  ;;  %4813 = vmatpush.msrb.mxu3 %v4812_v17  ;;  %v4835_v50 = vsub.f32 %v9413_v13, %v10676_v43  ;;  %v4830_v14 = vand.u32 4294901760, %v4829_v23  ;;  %v4852_v17 = vand.u32 4294901760, %v9451_v44  ;;  %v137_v43 = vld [vmem:[#allocation5 + $0x258] sm:$0xff]  ;;  %v4847_v23 = vsub.f32 %v9439_v4, %v4846_v32 }
 0x29d   :  { %4678 = vmatpush.msrb.mxu0 %v10677_v52  ;;  %4768 = vmatpush.msrb.mxu2 %v9354_v57  ;;  %v133_v52 = vld [vmem:[#allocation5 + $0x238] sm:$0xff]  ;;  %v9503_v41 = vsub.f32 %v141_v48, %v9479_v54  ;;  %v4870_v47 = vand.u32 4294901760, %v9490_v63  ;;  %v10681_v48 = vand.u32 4294901760, %v9266_v12  ;;  %v10682_v12 = vand.u32 4294901760, %v9285_v35 }
 0x29e   :  { %4727 = vmatpush.msrb.mxu1 %v9154_v18  ;;  %4819 = vmatpush.msrb.mxu3 %v4818_v0  ;;  %v4836_v18 = vand.u32 4294901760, %v4835_v50  ;;  %v4858_v0 = vand.u32 4294901760, %v9464_v36  ;;  %v4864_v50 = vand.u32 4294901760, %v9477_v9 }
 0x29f   :  { %4682 = vmatpush.msrb.mxu0 %v10678_v56  ;;  %4770 = vmatpush.msrb.mxu2 %v9367_v51  ;;  %v129_v56 = vld [vmem:[#allocation5 + $0x218] sm:$0xff] }
 0x2a0   :  { %4729 = vmatpush.msrb.mxu1 %v9161_v6  ;;  %4825 = vmatpush.msrb.mxu3 %v4824_v15  ;;  %v9495_v6 = vand.u32 4294901760, %v137_v43  ;;  %v4853_v15 = vsub.f32 %v9451_v44, %v4852_v17 }
 0x2a1   :  { %4686 = vmatpush.msrb.mxu0 %v10679_v33  ;;  %4772 = vmatpush.msrb.mxu2 %v9387_v10  ;;  %v4848_v33 = vand.u32 4294901760, %v4847_v23  ;;  %v4865_v23 = vsub.f32 %v9477_v9, %v4864_v50 }
 0x2a2   :  { %4731 = vmatpush.msrb.mxu1 %v9171_v38  ;;  %4831 = vmatpush.msrb.mxu3 %v4830_v14  ;;  %v9508_v38 = vand.u32 4294901760, %v133_v52  ;;  %v4859_v14 = vsub.f32 %v9464_v36, %v4858_v0  ;;  %v9519_v37 = vsub.f32 %v137_v43, %v9495_v6 }
 0x2a3   :  { %4690 = vmatpush.msrb.mxu0 %v10680_v21  ;;  %4774 = vmatpush.msrb.mxu2 %v9402_v62  ;;  %v4876_v21 = vand.u32 4294901760, %v9503_v41 }
 0x2a4   :  { %4733 = vmatpush.msrb.mxu1 %v9181_v7  ;;  %4837 = vmatpush.msrb.mxu3 %v4836_v18  ;;  %v9521_v7 = vand.u32 4294901760, %v129_v56  ;;  %v4854_v18 = vand.u32 4294901760, %v4853_v15  ;;  %v4860_v43 = vand.u32 4294901760, %v4859_v14  ;;  %v10683_v15 = vand.u32 4294901760, %v9297_v61 }
 0x2a5   :  { %4694 = vmatpush.msrb.mxu0 %v10681_v48  ;;  %4776 = vmatpush.msrb.mxu2 %v9415_v27  ;;  %v4882_v35 = vand.u32 4294901760, %v9519_v37  ;;  %v10684_v14 = vand.u32 4294901760, %v9309_v39 }
 0x2a6   :  { %4735 = vmatpush.msrb.mxu1 %v9192_v20  ;;  %4843 = vmatpush.msrb.mxu3 %v4842_v25  ;;  %v9532_v20 = vsub.f32 %v133_v52, %v9508_v38  ;;  %v4871_v25 = vsub.f32 %v9490_v63, %v4870_v47  ;;  %v4866_v52 = vand.u32 4294901760, %v4865_v23 }
 0x2a7   :  { %4698 = vmatpush.msrb.mxu0 %v10682_v12  ;;  %4778 = vmatpush.msrb.mxu2 %v9428_v49  ;;  %v4883_v48 = vsub.f32 %v9519_v37, %v4882_v35  ;;  %v10687_v12 = vand.u32 4294901760, %v9348_v60 }
 0x2a8   :  { %4737 = vmatpush.msrb.mxu1 %v9206_v55  ;;  %4849 = vmatpush.msrb.mxu3 %v4848_v33  ;;  %v9543_v55 = vsub.f32 %v129_v56, %v9521_v7  ;;  %v4877_v33 = vsub.f32 %v9503_v41, %v4876_v21  ;;  %v4872_v61 = vand.u32 4294901760, %v4871_v25  ;;  %v10685_v56 = vand.u32 4294901760, %v9323_v58  ;;  %v10688_v25 = vld [vmem:[#allocation17_spill] sm:$0xff] }
 0x2a9   :  { %4702 = vmatpush.msrb.mxu0 %v10683_v15  ;;  %4780 = vmatpush.msrb.mxu2 %v9441_v8 }
 0x2aa   :  { %4739 = vmatpush.msrb.mxu1 %v9219_v3  ;;  %4855 = vmatpush.msrb.mxu3 %v4854_v18  ;;  %v4888_v3 = vand.u32 4294901760, %v9532_v20  ;;  %v4894_v39 = vand.u32 4294901760, %v9543_v55  ;;  %v10686_v18 = vand.u32 4294901760, %v9333_v31 }
 0x2ab   :  { %4706 = vmatpush.msrb.mxu0 %v10684_v14  ;;  %4782 = vmatpush.msrb.mxu2 %v9453_v19 }
 0x2ac   :  { %4741 = vmatpush.msrb.mxu1 %v9227_v30  ;;  %4861 = vmatpush.msrb.mxu3 %v4860_v43  ;;  %v4878_v30 = vand.u32 4294901760, %v4877_v33  ;;  %v4889_v58 = vsub.f32 %v9532_v20, %v4888_v3  ;;  %v4884_v43 = vand.u32 4294901760, %v4883_v48  ;;  %v4895_v31 = vsub.f32 %v9543_v55, %v4894_v39  ;;  %v10689_v33 = vld [vmem:[#allocation14_spill] sm:$0xff]  ;;  %v10693_v48 = vld [vmem:[#allocation13_spill] sm:$0xff] }
 0x2ad   :  { %4710 = vmatpush.msrb.mxu0 %v10685_v56  ;;  %4784 = vmatpush.msrb.mxu2 %v9466_v26  ;;  %v10692_v56 = vand.u32 4294901760, %v9362_v5 }
 0x2ae   :  { %4743 = vmatpush.msrb.mxu1 %v9240_v45  ;;  %4867 = vmatpush.msrb.mxu3 %v4866_v52  ;;  %v6001_v45 = vld [vmem:[#allocation7] sm:$0xf]  ;;  %v4890_v15 = vand.u32 4294901760, %v4889_v58  ;;  %v3195_v52 = vpop.f32.mrf.mxu1  ;;  %v10699_v58 = vand.u32 4294901760, %v9413_v13 }
 0x2af   :  { %4714 = vmatpush.msrb.mxu0 %v10686_v18  ;;  %4786 = vmatpush.msrb.mxu2 %v9479_v54  ;;  %v322_v23 = vperm.slane %v6001_v45, 2  ;;  %v10696_v18 = vld [vmem:[#allocation12_spill] sm:$0xff] }
 0x2b0   :  { %4745 = vmatpush.msrb.mxu1 %v9260_v29  ;;  %4873 = vmatpush.msrb.mxu3 %v4872_v61  ;;  %v3094_v29 = vpop.f32.mrf.mxu0  ;;  %v3249_v61 = vpop.f32.mrf.mxu2 }
 0x2b1   :  { %4718 = vmatpush.msrb.mxu0 %v10687_v12  ;;  %4788 = vmatpush.msrb.mxu2 %v9495_v6  ;;  %v3095_v60 = vadd.f32 %v3094_v29, %v322_v23 }
 0x2b2   :  { %4747 = vmatpush.msrb.mxu1 %v9272_v28  ;;  %4879 = vmatpush.msrb.mxu3 %v4878_v30  ;;  %v4896_v28 = vand.u32 4294901760, %v4895_v31  ;;  %v3288_v30 = vpop.f32.mrf.mxu3 }
 0x2b3   :  { %4457 = vmatmul.f32.vlgmr.msra.gmra.mxu0 %v10688_v25  ;;  %4790 = vmatpush.msrb.mxu2 %v9508_v38  ;;  %v3196_v14 = vadd.f32 %v3195_v52, %v3095_v60  ;;  %v225_v25 = vld [vmem:[#allocation5 + $0x518] sm:$0xff] }
 0x2b4   :  { %4749 = vmatpush.msrb.mxu1 %v9282_v42  ;;  %4905 = vmatpush.msra.mxu0 %v9340_v40  ;;  %v10690_v42 = vand.u32 4294901760, %v9340_v40 }
 0x2b5   :  { %4885 = vmatpush.msrb.mxu3 %v4884_v43  ;;  %4792 = vmatpush.msrb.mxu2 %v9521_v7  ;;  %v3250_v40 = vadd.f32 %v3249_v61, %v3196_v14  ;;  %v217_v61 = vld [vmem:[#allocation5 + $0x4d8] sm:$0xff] }
 0x2b6   :  { %4751 = vmatpush.msrb.mxu1 %v9294_v11  ;;  %4908 = vmatpush.msra.mxu0 %v9362_v5  ;;  %v10691_v11 = vld [vmem:[#allocation15_spill] sm:$0xff]  ;;  %v10695_v5 = vand.u32 4294901760, %v9380_v22  ;;  %v3394_v45 = vpop.f32.mrf.mxu1 }
 0x2b7   :  { %4891 = vmatpush.msrb.mxu3 %v4890_v15  ;;  %4612 = vmatmul.f32.vlgmr.msra.gmra.mxu2 %v10689_v33 }
 0x2b8   :  { %4911 = vmatpush.msra.mxu0 %v9375_v59  ;;  %4999 = vmatpush.msra.mxu2 %v10690_v42 }
 0x2b9   :  { %4753 = vmatpush.msrb.mxu1 %v9305_v1  ;;  %4897 = vmatpush.msrb.mxu3 %v4896_v28  ;;  %v10694_v1 = vand.u32 4294901760, %v9375_v59  ;;  %v3357_v59 = vpop.f32.mrf.mxu0  ;;  %v221_v28 = vld [vmem:[#allocation5 + $0x4f8] sm:$0xff] }
 0x2ba   :  { %4651 = vmatmul.f32.vlgmr.msra.gmra.mxu3 %v10691_v11  ;;  %4914 = vmatpush.msra.mxu0 %v9380_v22  ;;  %v10698_v22 = vld [vmem:[#allocation16_spill] sm:$0xff] }
 0x2bb   :  { %5003 = vmatpush.msra.mxu2 %v10692_v56  ;;  %5066 = vmatpush.msra.mxu3 %v9316_v24 }
 0x2bc   :  { %4755 = vmatpush.msrb.mxu1 %v9319_v16  ;;  %4917 = vmatpush.msra.mxu0 %v9395_v2  ;;  %v3289_v16 = vadd.f32 %v3288_v30, %v3250_v40 }
 0x2bd   :  { %4558 = vmatmul.f32.vlgmr.msra.gmra.mxu1 %v10693_v48  ;;  %5007 = vmatpush.msra.mxu2 %v10694_v1 }
 0x2be   :  { %4958 = vmatpush.msra.mxu1 %v9316_v24  ;;  %5068 = vmatpush.msra.mxu3 %v9335_v46  ;;  %v10697_v24 = vand.u32 4294901760, %v9395_v2 }
 0x2bf   :  { %4920 = vmatpush.msra.mxu0 %v9413_v13  ;;  %5011 = vmatpush.msra.mxu2 %v10695_v5  ;;  %v3435_v13 = vpop.f32.mrf.mxu2  ;;  %v213_v5 = vld [vmem:[#allocation5 + $0x4b8] sm:$0xff] }
 0x2c0   :  { %4960 = vmatpush.msra.mxu1 %v9335_v46  ;;  %5070 = vmatpush.msra.mxu3 %v9350_v53  ;;  %v3358_v46 = vadd.f32 %v3357_v59, %v3289_v16  ;;  %v9738_v59 = vand.u32 4294901760, %v217_v61 }
 0x2c1   :  { %4798 = vmatmul.f32.vlgmr.msrb.gmra.mxu2 %v10696_v18  ;;  %4923 = vmatpush.msra.mxu0 %v9426_v34 }
 0x2c2   :  { %4962 = vmatpush.msra.mxu1 %v9350_v53  ;;  %5015 = vmatpush.msra.mxu2 %v10697_v24  ;;  %v10700_v53 = vand.u32 4294901760, %v9426_v34  ;;  %v3395_v2 = vadd.f32 %v3394_v45, %v3358_v46  ;;  %v10702_v46 = vld [vmem:[#allocation19_spill] sm:$0xff] }
 0x2c3   :  { %5072 = vmatpush.msra.mxu3 %v9354_v57  ;;  %4720 = vmatmul.f32.vlgmr.msrb.gmra.mxu0 %v10693_v48 }
 0x2c4   :  { %4899 = vmatmul.f32.vlgmr.msrb.gmra.mxu3 %v10698_v22  ;;  %4926 = vmatpush.msra.mxu0 %v9439_v4  ;;  %v3436_v34 = vadd.f32 %v3435_v13, %v3395_v2  ;;  %v9749_v2 = vand.u32 4294901760, %v213_v5 }
 0x2c5   :  { %4964 = vmatpush.msra.mxu1 %v9354_v57  ;;  %5019 = vmatpush.msra.mxu2 %v10699_v58  ;;  %v249_v57 = vld [vmem:[#allocation5 + $0x5d8] sm:$0xff] }
 0x2c6   :  { %5074 = vmatpush.msra.mxu3 %v9367_v51  ;;  %4757 = vmatmul.f32.vlgmr.msrb.gmra.mxu1 %v10693_v48  ;;  %v9725_v48 = vand.u32 4294901760, %v221_v28  ;;  %v209_v58 = vld [vmem:[#allocation5 + $0x498] sm:$0xff] }
 0x2c7   :  { %4929 = vmatpush.msra.mxu0 %v9451_v44  ;;  %4966 = vmatpush.msra.mxu1 %v9367_v51  ;;  %v253_v51 = vld [vmem:[#allocation5 + $0x5f8] sm:$0xff]  ;;  %v3590_v44 = vpop.f32.mrf.mxu0  ;;  %v3698_v43 = vpop.f32.mrf.mxu2 }
 0x2c8   :  { %5023 = vmatpush.msra.mxu2 %v10700_v53  ;;  %5076 = vmatpush.msra.mxu3 %v9387_v10  ;;  %v9639_v4 = vand.u32 4294901760, %v253_v51 }
 0x2c9   :  { %4932 = vmatpush.msra.mxu0 %v9464_v36  ;;  %4968 = vmatpush.msra.mxu1 %v9387_v10  ;;  %v3536_v10 = vpop.f32.mrf.mxu3  ;;  %v241_v36 = vld [vmem:[#allocation5 + $0x598] sm:$0xff] }
 0x2ca   :  { %5027 = vmatpush.msra.mxu2 %v4846_v32  ;;  %5078 = vmatpush.msra.mxu3 %v9402_v62  ;;  %v3537_v32 = vadd.f32 %v3536_v10, %v3436_v34 }
 0x2cb   :  { %4935 = vmatpush.msra.mxu0 %v9477_v9  ;;  %4970 = vmatpush.msra.mxu1 %v9402_v62  ;;  %v245_v62 = vld [vmem:[#allocation5 + $0x5b8] sm:$0xff]  ;;  %v9656_v9 = vsub.f32 %v253_v51, %v9639_v4  ;;  %v9753_v51 = vsub.f32 %v221_v28, %v9725_v48 }
 0x2cc   :  { %5031 = vmatpush.msra.mxu2 %v4852_v17  ;;  %5080 = vmatpush.msra.mxu3 %v9415_v27  ;;  %v3629_v17 = vpop.f32.mrf.mxu1 }
 0x2cd   :  { %4938 = vmatpush.msra.mxu0 %v9490_v63  ;;  %4972 = vmatpush.msra.mxu1 %v9415_v27  ;;  %v9646_v27 = vand.u32 4294901760, %v249_v57 }
 0x2ce   :  { %5035 = vmatpush.msra.mxu2 %v4858_v0  ;;  %5082 = vmatpush.msra.mxu3 %v9428_v49  ;;  %v237_v0 = vld [vmem:[#allocation5 + $0x578] sm:$0xff] }
 0x2cf   :  { %4941 = vmatpush.msra.mxu0 %v9503_v41  ;;  %4974 = vmatpush.msra.mxu1 %v9428_v49  ;;  %v9653_v49 = vand.u32 4294901760, %v245_v62  ;;  %v9666_v63 = vsub.f32 %v249_v57, %v9646_v27  ;;  %v9670_v12 = vand.u32 4294901760, %v237_v0  ;;  %v3776_v52 = vpop.f32.mrf.mxu0  ;;  %v3931_v45 = vpop.f32.mrf.mxu2  ;;  %v205_v57 = vld [vmem:[#allocation5 + $0x478] sm:$0xff] }
 0x2d0   :  { %5039 = vmatpush.msra.mxu2 %v4864_v50  ;;  %5084 = vmatpush.msra.mxu3 %v9441_v8  ;;  %v3591_v50 = vadd.f32 %v3590_v44, %v3537_v32  ;;  %v9765_v32 = vsub.f32 %v217_v61, %v9738_v59 }
 0x2d1   :  { %4944 = vmatpush.msra.mxu0 %v9519_v37  ;;  %4976 = vmatpush.msra.mxu1 %v9441_v8  ;;  %v9663_v8 = vand.u32 4294901760, %v241_v36  ;;  %v9677_v41 = vsub.f32 %v245_v62, %v9653_v49  ;;  %v5151_v37 = vand.u32 4294901760, %v9666_v63  ;;  %v3735_v15 = vpop.f32.mrf.mxu3  ;;  %v9761_v62 = vand.u32 4294901760, %v209_v58 }
 0x2d2   :  { %5043 = vmatpush.msra.mxu2 %v4870_v47  ;;  %5086 = vmatpush.msra.mxu3 %v9453_v19  ;;  %v233_v47 = vld [vmem:[#allocation5 + $0x558] sm:$0xff]  ;;  %v3630_v23 = vadd.f32 %v3629_v17, %v3591_v50 }
 0x2d3   :  { %4947 = vmatpush.msra.mxu0 %v9532_v20  ;;  %4978 = vmatpush.msra.mxu1 %v9453_v19  ;;  %v5145_v19 = vand.u32 4294901760, %v9656_v9  ;;  %v9681_v31 = vand.u32 4294901760, %v233_v47  ;;  %v5157_v60 = vand.u32 4294901760, %v9677_v41  ;;  %v9789_v28 = vsub.f32 %v209_v58, %v9761_v62 }
 0x2d4   :  { %5047 = vmatpush.msra.mxu2 %v4876_v21  ;;  %5088 = vmatpush.msra.mxu3 %v9466_v26  ;;  %v10701_v21 = vld [vmem:[#allocation18_spill] sm:$0xff]  ;;  %v3699_v29 = vadd.f32 %v3698_v43, %v3630_v23  ;;  %v3877_v11 = vpop.f32.mrf.mxu1  ;;  %v9773_v23 = vand.u32 4294901760, %v205_v57  ;;  %v10370_v43 = vand.u32 4294901760, %v9753_v51 }
 0x2d5   :  { %4950 = vmatpush.msra.mxu0 %v9543_v55  ;;  %4980 = vmatpush.msra.mxu1 %v9466_v26  ;;  %v229_v26 = vld [vmem:[#allocation5 + $0x538] sm:$0xff]  ;;  %v5146_v20 = vsub.f32 %v9656_v9, %v5145_v19  ;;  %v5152_v55 = vsub.f32 %v9666_v63, %v5151_v37  ;;  %v5158_v40 = vsub.f32 %v9677_v41, %v5157_v60 }
 0x2d6   :  { %5051 = vmatpush.msra.mxu2 %v4882_v35  ;;  %5090 = vmatpush.msra.mxu3 %v9479_v54  ;;  %v9688_v35 = vsub.f32 %v241_v36, %v9663_v8  ;;  %v3736_v42 = vadd.f32 %v3735_v15, %v3699_v29 }
 0x2d7   :  { %4953 = vmatmul.f32.vlgmr.msra.gmra.mxu0 %v10701_v21  ;;  %4982 = vmatpush.msra.mxu1 %v9479_v54  ;;  %v9693_v54 = vsub.f32 %v237_v0, %v9670_v12  ;;  %v5147_v56 = vand.u32 4294901760, %v5146_v20  ;;  %v5153_v16 = vand.u32 4294901760, %v5152_v55  ;;  %v5159_v53 = vand.u32 4294901760, %v5158_v40  ;;  %v201_v0 = vld [vmem:[#allocation5 + $0x458] sm:$0xff]  ;;  %v4039_v29 = vpop.f32.mrf.mxu0 }
 0x2d8   :  { %5103 = vmatpush.msrb.mxu0 %v9639_v4  ;;  %5055 = vmatpush.msra.mxu2 %v4888_v3  ;;  %v9701_v3 = vand.u32 4294901760, %v229_v26  ;;  %v10376_v33 = vand.u32 4294901760, %v9688_v35  ;;  %v9777_v21 = vsub.f32 %v213_v5, %v9749_v2  ;;  %v9785_v15 = vand.u32 4294901760, %v201_v0 }
 0x2d9   :  { %5092 = vmatpush.msra.mxu3 %v9495_v6  ;;  %4984 = vmatpush.msra.mxu1 %v9495_v6  ;;  %v9707_v6 = vsub.f32 %v233_v47, %v9681_v31  ;;  %v10375_v14 = vand.u32 4294901760, %v9693_v54  ;;  %v3970_v50 = vpop.f32.mrf.mxu3  ;;  %v10369_v20 = vand.u32 4294901760, %v9765_v32  ;;  %v9799_v40 = vsub.f32 %v205_v57, %v9773_v23  ;;  %v4117_v57 = vpop.f32.mrf.mxu2 }
 0x2da   :  { %5105 = vmatpush.msrb.mxu0 %v9646_v27  ;;  %5059 = vmatpush.msra.mxu2 %v4894_v39  ;;  %v9714_v39 = vand.u32 4294901760, %v225_v25  ;;  %v9728_v1 = vsub.f32 %v229_v26, %v9701_v3  ;;  %v5164_v18 = vsub.f32 %v9688_v35, %v10376_v33  ;;  %v9811_v58 = vsub.f32 %v201_v0, %v9785_v15  ;;  %v10706_v33 = vld [vmem:[#allocation23_spill] sm:$0xff] }
 0x2db   :  { %5094 = vmatpush.msra.mxu3 %v9508_v38  ;;  %5061 = vmatmul.f32.vlgmr.msra.gmra.mxu2 %v10698_v22  ;;  %v10374_v30 = vand.u32 4294901760, %v9707_v6  ;;  %v10367_v0 = vand.u32 4294901760, %v9799_v40 }
 0x2dc   :  { %5107 = vmatpush.msrb.mxu0 %v9653_v49  ;;  %5246 = vmatpush.msrb.mxu2 %v9656_v9  ;;  %v9741_v24 = vsub.f32 %v225_v25, %v9714_v39  ;;  %v10373_v13 = vand.u32 4294901760, %v9728_v1  ;;  %v5165_v10 = vand.u32 4294901760, %v5164_v18  ;;  %v193_v18 = vld [vmem:[#allocation5 + $0x418] sm:$0xff] }
 0x2dd   :  { %4986 = vmatpush.msra.mxu1 %v9508_v38  ;;  %5096 = vmatpush.msra.mxu3 %v9521_v7  ;;  %v3777_v38 = vadd.f32 %v3776_v52, %v3736_v42  ;;  %v5176_v34 = vsub.f32 %v9707_v6, %v10374_v30  ;;  %v197_v52 = vld [vmem:[#allocation5 + $0x438] sm:$0xff]  ;;  %v4076_v42 = vpop.f32.mrf.mxu1 }
 0x2de   :  { %5098 = vmatmul.f32.vlgmr.msra.gmra.mxu3 %v10698_v22  ;;  %5109 = vmatpush.msrb.mxu0 %v9663_v8  ;;  %v10371_v44 = vand.u32 4294901760, %v9741_v24  ;;  %v5182_v47 = vsub.f32 %v9728_v1, %v10373_v13  ;;  %v285_v9 = vld [vmem:[#allocation5 + $0x6f8] sm:$0xff] }
 0x2df   :  { %5249 = vmatpush.msrb.mxu2 %v9666_v63  ;;  %5299 = vmatpush.msrb.mxu3 %v9639_v4  ;;  %v3878_v22 = vadd.f32 %v3877_v11, %v3777_v38  ;;  %v5177_v26 = vand.u32 4294901760, %v5176_v34  ;;  %v5194_v11 = vsub.f32 %v9753_v51, %v10370_v43  ;;  %v317_v38 = vld [vmem:[#allocation5 + $0x7f8] sm:$0xff] }
 0x2e0   :  { %4988 = vmatpush.msra.mxu1 %v9521_v7  ;;  %5111 = vmatpush.msrb.mxu0 %v9670_v12  ;;  %v5170_v7 = vsub.f32 %v9693_v54, %v10375_v14  ;;  %v5188_v25 = vsub.f32 %v9741_v24, %v10371_v44  ;;  %v5183_v61 = vand.u32 4294901760, %v5182_v47  ;;  %v313_v34 = vld [vmem:[#allocation5 + $0x7d8] sm:$0xff] }
 0x2e1   :  { %4992 = vmatmul.f32.vlgmr.msra.gmra.mxu1 %v10702_v46  ;;  %5252 = vmatpush.msrb.mxu2 %v9677_v41  ;;  %v3932_v36 = vadd.f32 %v3931_v45, %v3878_v22  ;;  %v5200_v46 = vsub.f32 %v9765_v32, %v10369_v20  ;;  %v309_v47 = vld [vmem:[#allocation5 + $0x7b8] sm:$0xff] }
 0x2e2   :  { %5148 = vmatpush.msrb.mxu1 %v5147_v56  ;;  %5301 = vmatpush.msrb.mxu3 %v9646_v27  ;;  %v5171_v17 = vand.u32 4294901760, %v5170_v7  ;;  %v10368_v56 = vand.u32 4294901760, %v9777_v21  ;;  %v5189_v22 = vand.u32 4294901760, %v5188_v25  ;;  %v10366_v7 = vand.u32 4294901760, %v9789_v28 }
 0x2e3   :  { %5113 = vmatpush.msrb.mxu0 %v9681_v31  ;;  %5255 = vmatpush.msrb.mxu2 %v9688_v35  ;;  %v3971_v55 = vadd.f32 %v3970_v50, %v3932_v36  ;;  %v10372_v25 = vand.u32 4294901760, %v9811_v58 }
 0x2e4   :  { %5154 = vmatpush.msrb.mxu1 %v5153_v16  ;;  %5303 = vmatpush.msrb.mxu3 %v9653_v49  ;;  %v9803_v16 = vand.u32 4294901760, %v197_v52  ;;  %v5206_v36 = vsub.f32 %v9777_v21, %v10368_v56 }
 0x2e5   :  { %5115 = vmatpush.msrb.mxu0 %v9701_v3  ;;  %5258 = vmatpush.msrb.mxu2 %v9693_v54  ;;  %v4040_v5 = vadd.f32 %v4039_v29, %v3971_v55  ;;  %v5212_v29 = vsub.f32 %v9789_v28, %v10366_v7  ;;  %v9834_v55 = vand.u32 4294901760, %v313_v34 }
 0x2e6   :  { %5160 = vmatpush.msrb.mxu1 %v5159_v53  ;;  %5305 = vmatpush.msrb.mxu3 %v9663_v8  ;;  %v9815_v53 = vand.u32 4294901760, %v317_v38  ;;  %v9827_v50 = vsub.f32 %v197_v52, %v9803_v16 }
 0x2e7   :  { %5117 = vmatpush.msrb.mxu0 %v9714_v39  ;;  %5261 = vmatpush.msrb.mxu2 %v9707_v6  ;;  %v4077_v45 = vadd.f32 %v4076_v42, %v4040_v5  ;;  %10703 = vst [vmem:[#allocation28_spill] sm:$0xff] %v9834_v55  ;;  %v305_v42 = vld [vmem:[#allocation5 + $0x798] sm:$0xff]  ;;  %v5207_v5 = vand.u32 4294901760, %v5206_v36  ;;  %v5213_v36 = vand.u32 4294901760, %v5212_v29 }
 0x2e8   :  { %5166 = vmatpush.msrb.mxu1 %v5165_v10  ;;  %5307 = vmatpush.msrb.mxu3 %v9670_v12  ;;  %v5195_v10 = vand.u32 4294901760, %v5194_v11  ;;  %v9839_v52 = vsub.f32 %v317_v38, %v9815_v53  ;;  %v4218_v11 = vpop.f32.mrf.mxu3  ;;  %v10377_v38 = vand.u32 4294901760, %v9827_v50 }
 0x2e9   :  { %5119 = vmatpush.msrb.mxu0 %v9725_v48  ;;  %5264 = vmatpush.msrb.mxu2 %v9728_v1 }
 0x2ea   :  { %5172 = vmatpush.msrb.mxu1 %v5171_v17  ;;  %5309 = vmatpush.msrb.mxu3 %v9681_v31  ;;  %v9821_v17 = vand.u32 4294901760, %v193_v18  ;;  %v10378_v20 = vand.u32 4294901760, %v9839_v52 }
 0x2eb   :  { %5121 = vmatpush.msrb.mxu0 %v9738_v59  ;;  %5267 = vmatpush.msrb.mxu2 %v9741_v24 }
 0x2ec   :  { %5178 = vmatpush.msrb.mxu1 %v5177_v26  ;;  %5311 = vmatpush.msrb.mxu3 %v9701_v3  ;;  %v5201_v26 = vand.u32 4294901760, %v5200_v46  ;;  %v9846_v46 = vsub.f32 %v193_v18, %v9821_v17  ;;  %v5224_v18 = vsub.f32 %v9811_v58, %v10372_v25 }
 0x2ed   :  { %5123 = vmatpush.msrb.mxu0 %v9749_v2  ;;  %5270 = vmatpush.msrb.mxu2 %v9753_v51 }
 0x2ee   :  { %5184 = vmatpush.msrb.mxu1 %v5183_v61  ;;  %5313 = vmatpush.msrb.mxu3 %v9714_v39  ;;  %v4118_v61 = vadd.f32 %v4117_v57, %v4077_v45  ;;  %v9848_v45 = vand.u32 4294901760, %v309_v47  ;;  %v301_v57 = vld [vmem:[#allocation5 + $0x778] sm:$0xff]  ;;  %v4272_v7 = vpop.f32.mrf.mxu0  ;;  %v10379_v44 = vand.u32 4294901760, %v9846_v46 }
 0x2ef   :  { %5125 = vmatpush.msrb.mxu0 %v9761_v62  ;;  %5273 = vmatpush.msrb.mxu2 %v9765_v32  ;;  %v9865_v43 = vand.u32 4294901760, %v301_v57 }
 0x2f0   :  { %5190 = vmatpush.msrb.mxu1 %v5189_v22  ;;  %5315 = vmatpush.msrb.mxu3 %v9725_v48  ;;  %v5218_v22 = vsub.f32 %v9799_v40, %v10367_v0  ;;  %10704 = vst [vmem:[#allocation31_spill] sm:$0xff] %v9848_v45  ;;  %v9860_v0 = vsub.f32 %v313_v34, %v9834_v55 }
 0x2f1   :  { %5127 = vmatpush.msrb.mxu0 %v9773_v23  ;;  %5276 = vmatpush.msrb.mxu2 %v9777_v21  ;;  %v4219_v56 = vadd.f32 %v4218_v11, %v4118_v61  ;;  %v9870_v25 = vsub.f32 %v309_v47, %v9848_v45  ;;  %v5230_v61 = vsub.f32 %v9827_v50, %v10377_v38 }
 0x2f2   :  { %5196 = vmatpush.msrb.mxu1 %v5195_v10  ;;  %5317 = vmatpush.msrb.mxu3 %v9738_v59  ;;  %v9853_v10 = vand.u32 4294901760, %v305_v42  ;;  %v5219_v29 = vand.u32 4294901760, %v5218_v22  ;;  %v5225_v22 = vand.u32 4294901760, %v5224_v18  ;;  %v10380_v47 = vand.u32 4294901760, %v9860_v0 }
 0x2f3   :  { %5129 = vmatpush.msrb.mxu0 %v9785_v15  ;;  %5279 = vmatpush.msrb.mxu2 %v9789_v28  ;;  %v4273_v34 = vadd.f32 %v4272_v7, %v4219_v56  ;;  %v5487_v56 = vsub.f32 %v9839_v52, %v10378_v20  ;;  %v5236_v18 = vsub.f32 %v9846_v46, %v10379_v44 }
 0x2f4   :  { %10705 = vst [vmem:[#allocation33_spill] sm:$0xff] %v9853_v10  ;;  %5202 = vmatpush.msrb.mxu1 %v5201_v26  ;;  %5319 = vmatpush.msrb.mxu3 %v9749_v2  ;;  %v297_v26 = vld [vmem:[#allocation5 + $0x758] sm:$0xff]  ;;  %v9878_v11 = vsub.f32 %v305_v42, %v9853_v10  ;;  %v9890_v42 = vsub.f32 %v301_v57, %v9865_v43 }
 0x2f5   :  { %5131 = vmatpush.msrb.mxu0 %v9803_v16  ;;  %5282 = vmatpush.msrb.mxu2 %v9799_v40  ;;  %v9882_v14 = vand.u32 4294901760, %v297_v26 }
 0x2f6   :  { %5208 = vmatpush.msrb.mxu1 %v5207_v5  ;;  %5321 = vmatpush.msrb.mxu3 %v9761_v62  ;;  %v293_v5 = vld [vmem:[#allocation5 + $0x738] sm:$0xff]  ;;  %v10387_v63 = vand.u32 4294901760, %v9890_v42 }
 0x2f7   :  { %5133 = vmatpush.msrb.mxu0 %v9821_v17  ;;  %5285 = vmatpush.msrb.mxu2 %v9811_v58  ;;  %v9898_v38 = vand.u32 4294901760, %v293_v5 }
 0x2f8   :  { %5214 = vmatpush.msrb.mxu1 %v5213_v36  ;;  %5323 = vmatpush.msrb.mxu3 %v9773_v23  ;;  %v4311_v13 = vpop.f32.mrf.mxu1  ;;  %v4380_v30 = vpop.f32.mrf.mxu2  ;;  %v289_v36 = vld [vmem:[#allocation5 + $0x718] sm:$0xff] }
 0x2f9   :  { %5139 = vmatmul.f32.vlgmr.msrb.gmra.mxu0 %v10706_v33  ;;  %5288 = vmatpush.msrb.mxu2 %v9827_v50  ;;  %v4312_v7 = vadd.f32 %v4311_v13, %v4273_v34  ;;  %v10381_v33 = vand.u32 4294901760, %v9870_v25  ;;  %v5231_v13 = vand.u32 4294901760, %v5230_v61  ;;  %v10382_v34 = vand.u32 4294901760, %v9878_v11 }
 0x2fa   :  { %5340 = vmatpush.msra.mxu0 %v5145_v19  ;;  %5220 = vmatpush.msrb.mxu1 %v5219_v29  ;;  %v5493_v19 = vsub.f32 %v9860_v0, %v10380_v47  ;;  %v9909_v29 = vsub.f32 %v297_v26, %v9882_v14  ;;  %v9911_v44 = vand.u32 4294901760, %v289_v36  ;;  %v5488_v61 = vand.u32 4294901760, %v5487_v56  ;;  %v10711_v56 = vld [vmem:[#allocation22_spill] sm:$0xff] }
 0x2fb   :  { %5325 = vmatpush.msrb.mxu3 %v9785_v15  ;;  %5291 = vmatpush.msrb.mxu2 %v9846_v46  ;;  %v4381_v57 = vadd.f32 %v4380_v30, %v4312_v7  ;;  %v4417_v20 = vpop.f32.mrf.mxu3  ;;  %v10707_v30 = vld [vmem:[#allocation21_spill] sm:$0xff]  ;;  %v5499_v26 = vsub.f32 %v9870_v25, %v10381_v33  ;;  %v9925_v47 = vsub.f32 %v293_v5, %v9898_v38 }
 0x2fc   :  { %5344 = vmatpush.msra.mxu0 %v5151_v37  ;;  %5226 = vmatpush.msrb.mxu1 %v5225_v22  ;;  %v281_v37 = vld [vmem:[#allocation5 + $0x6d8] sm:$0xff]  ;;  %v5237_v22 = vand.u32 4294901760, %v5236_v18  ;;  %v5505_v41 = vsub.f32 %v9878_v11, %v10382_v34  ;;  %v10712_v18 = vand.u32 4294901760, %v9688_v35  ;;  %v5494_v5 = vand.u32 4294901760, %v5493_v19 }
 0x2fd   :  { %5327 = vmatpush.msrb.mxu3 %v9803_v16  ;;  %5294 = vmatmul.f32.vlgmr.msrb.gmra.mxu2 %v10707_v30  ;;  %v9915_v7 = vadd.f32 %v4417_v20, %v4381_v57  ;;  %10709 = vst [vmem:[#allocation29_spill] sm:$0xff] %v9925_v47  ;;  %v9927_v30 = vand.u32 4294901760, %v285_v9  ;;  %v277_v20 = vld [vmem:[#allocation5 + $0x6b8] sm:$0xff]  ;;  %v9943_v33 = vand.u32 4294901760, %v281_v37  ;;  %v10713_v19 = vand.u32 4294901760, %v9693_v54 }
 0x2fe   :  { %5348 = vmatpush.msra.mxu0 %v5157_v60  ;;  %5444 = vmatpush.msra.mxu2 %v9815_v53  ;;  %v273_v35 = vld [vmem:[#allocation5 + $0x698] sm:$0xff]  ;;  %v10715_v54 = vand.u32 4294901760, %v9909_v29 }
 0x2ff   :  { %10708 = vst [vmem:[#allocation30_spill] sm:$0xff] %v9915_v7  ;;  %5232 = vmatpush.msrb.mxu1 %v5231_v13  ;;  %5329 = vmatpush.msrb.mxu3 %v9821_v17  ;;  %v9934_v60 = vmul.f32 0.70710677, %v9915_v7  ;;  %v9941_v13 = vsub.f32 %v289_v36, %v9911_v44  ;;  %v9955_v57 = vsub.f32 %v285_v9, %v9927_v30  ;;  %v9957_v7 = vand.u32 4294901760, %v277_v20 }
 0x300   :  { %5333 = vmatmul.f32.vlgmr.msrb.gmra.mxu3 %v10711_v56  ;;  %5352 = vmatpush.msra.mxu0 %v10712_v18  ;;  %v5511_v56 = vsub.f32 %v9890_v42, %v10387_v63  ;;  %v5500_v18 = vand.u32 4294901760, %v5499_v26  ;;  %v269_v63 = vld [vmem:[#allocation5 + $0x678] sm:$0xff]  ;;  %v9969_v26 = vsub.f32 %v281_v37, %v9943_v33  ;;  %v10716_v36 = vand.u32 4294901760, %v9707_v6 }
 0x301   :  { %10710 = vst [vmem:[#allocation32_spill] sm:$0xff] %v9934_v60  ;;  %5446 = vmatpush.msra.mxu2 %v9834_v55  ;;  %5489 = vmatpush.msra.mxu3 %v5488_v61  ;;  %v5872_v34 = vmul.f32 %v9934_v60, %v9934_v60  ;;  %v10714_v61 = vld [vmem:[#allocation20_spill] sm:$0xff]  ;;  %v5506_v60 = vand.u32 4294901760, %v5505_v41  ;;  %v9984_v9 = vsub.f32 %v277_v20, %v9957_v7  ;;  %v9986_v6 = vand.u32 4294901760, %v269_v63 }
 0x302   :  { %5238 = vmatpush.msrb.mxu1 %v5237_v22  ;;  %5356 = vmatpush.msra.mxu0 %v10713_v19  ;;  %v5517_v22 = vsub.f32 %v9909_v29, %v10715_v54  ;;  %v9971_v19 = vand.u32 4294901760, %v273_v35  ;;  %v5512_v41 = vand.u32 4294901760, %v5511_v56  ;;  %v5540_v20 = vand.u32 4294901760, %v9969_v26 }
 0x303   :  { %5240 = vmatmul.f32.vlgmr.msrb.gmra.mxu1 %v10714_v61  ;;  %5448 = vmatpush.msra.mxu2 %v9848_v45  ;;  %v9961_v55 = vmin.f32 %v5872_v34, 16.0  ;;  %v261_v45 = vld [vmem:[#allocation5 + $0x638] sm:$0xff] }
 0x304   :  { %5407 = vmatpush.msra.mxu1 %v9639_v4  ;;  %5495 = vmatpush.msra.mxu3 %v5494_v5  ;;  %v10717_v5 = vand.u32 4294901760, %v9925_v47 }
 0x305   :  { %5360 = vmatpush.msra.mxu0 %v10716_v36  ;;  %5450 = vmatpush.msra.mxu2 %v9853_v10  ;;  %v5874_v34 = vmul.f32 2.1237322e-06, %v9961_v55  ;;  %v5885_v4 = vmul.f32 3.8918573e-05, %v9961_v55  ;;  %v265_v36 = vld [vmem:[#allocation5 + $0x658] sm:$0xff]  ;;  %v10718_v10 = vand.u32 4294901760, %v9728_v1 }
 0x306   :  { %5409 = vmatpush.msra.mxu1 %v9646_v27  ;;  %5501 = vmatpush.msra.mxu3 %v5500_v18  ;;  %v5523_v37 = vsub.f32 %v9925_v47, %v10717_v5  ;;  %v5518_v18 = vand.u32 4294901760, %v5517_v22  ;;  %v10719_v5 = vand.u32 4294901760, %v9941_v13  ;;  %v9997_v47 = vsub.f32 %v273_v35, %v9971_v19 }
 0x307   :  { %5364 = vmatpush.msra.mxu0 %v10718_v10  ;;  %5452 = vmatpush.msra.mxu2 %v9865_v43  ;;  %v5875_v56 = vadd.f32 0.00028619796, %v5874_v34  ;;  %v5886_v27 = vadd.f32 0.001143296, %v5885_v4  ;;  %v10720_v34 = vand.u32 4294901760, %v9741_v24  ;;  %v10721_v22 = vand.u32 4294901760, %v9955_v57 }
 0x308   :  { %5411 = vmatpush.msra.mxu1 %v9653_v49  ;;  %5507 = vmatpush.msra.mxu3 %v5506_v60  ;;  %v5529_v54 = vsub.f32 %v9941_v13, %v10719_v5  ;;  %v10004_v49 = vand.u32 4294901760, %v265_v36  ;;  %v5524_v60 = vand.u32 4294901760, %v5523_v37  ;;  %v5546_v4 = vand.u32 4294901760, %v9984_v9 }
 0x309   :  { %v5876_v1 = vmul.f32 %v5875_v56, %v9961_v55  ;;  %v5887_v10 = vmul.f32 %v5886_v27, %v9961_v55  ;;  %5368 = vmatpush.msra.mxu0 %v10720_v34  ;;  %5454 = vmatpush.msra.mxu2 %v9882_v14  ;;  %v5535_v35 = vsub.f32 %v9955_v57, %v10721_v22  ;;  %v257_v27 = vld [vmem:[#allocation5 + $0x618] sm:$0xff]  ;;  %v10722_v5 = vand.u32 4294901760, %v9753_v51 }
 0x30a   :  { %5413 = vmatpush.msra.mxu1 %v9663_v8  ;;  %5513 = vmatpush.msra.mxu3 %v5512_v41  ;;  %v10012_v56 = vsub.f32 %v269_v63, %v9986_v6  ;;  %v10017_v34 = vand.u32 4294901760, %v261_v45  ;;  %v5530_v41 = vand.u32 4294901760, %v5529_v54  ;;  %v5541_v37 = vsub.f32 %v9969_v26, %v5540_v20 }
 0x30b   :  { %v5888_v24 = vadd.f32 0.014752088, %v5887_v10  ;;  %5372 = vmatpush.msra.mxu0 %v10722_v5  ;;  %5456 = vmatpush.msra.mxu2 %v9898_v38  ;;  %v5877_v8 = vadd.f32 0.0036580483, %v5876_v1  ;;  %v5552_v63 = vand.u32 4294901760, %v9997_v47  ;;  %v10723_v51 = vand.u32 4294901760, %v9765_v32 }
 0x30c   :  { %5415 = vmatpush.msra.mxu1 %v9670_v12  ;;  %5519 = vmatpush.msra.mxu3 %v5518_v18  ;;  %v10029_v22 = vsub.f32 %v265_v36, %v10004_v49  ;;  %v10031_v1 = vand.u32 4294901760, %v257_v27  ;;  %v5536_v12 = vand.u32 4294901760, %v5535_v35  ;;  %v5547_v54 = vsub.f32 %v9984_v9, %v5546_v4 }
 0x30d   :  { %v5889_v10 = vmul.f32 %v5888_v24, %v9961_v55  ;;  %5376 = vmatpush.msra.mxu0 %v10723_v51  ;;  %5458 = vmatpush.msra.mxu2 %v9911_v44  ;;  %v5558_v18 = vand.u32 4294901760, %v10012_v56  ;;  %v10724_v32 = vand.u32 4294901760, %v9777_v21  ;;  %v10042_v36 = vsub.f32 %v261_v45, %v10017_v34 }
 0x30e   :  { %5417 = vmatpush.msra.mxu1 %v9681_v31  ;;  %5525 = vmatpush.msra.mxu3 %v5524_v60  ;;  %v5878_v5 = vmul.f32 %v5877_v8, %v9961_v55  ;;  %v5542_v31 = vand.u32 4294901760, %v5541_v37  ;;  %v5553_v60 = vsub.f32 %v9997_v47, %v5552_v63  ;;  %v10725_v21 = vand.u32 4294901760, %v9789_v28 }
 0x30f   :  { %v5890_v24 = vadd.f32 0.112945676, %v5889_v10  ;;  %5380 = vmatpush.msra.mxu0 %v10724_v32  ;;  %5460 = vmatpush.msra.mxu2 %v9927_v30  ;;  %v5564_v45 = vand.u32 4294901760, %v10029_v22  ;;  %v10055_v10 = vsub.f32 %v257_v27, %v10031_v1  ;;  %v5559_v8 = vsub.f32 %v10012_v56, %v5558_v18 }
 0x310   :  { %5419 = vmatpush.msra.mxu1 %v9701_v3  ;;  %5531 = vmatpush.msra.mxu3 %v5530_v41  ;;  %v5548_v3 = vand.u32 4294901760, %v5547_v54  ;;  %v10726_v37 = vand.u32 4294901760, %v9799_v40  ;;  %v5570_v28 = vand.u32 4294901760, %v10042_v36  ;;  %v5879_v51 = vadd.f32 0.05243302, %v5878_v5 }
 0x311   :  { %v5891_v35 = vmul.f32 %v5890_v24, %v9961_v55  ;;  %5384 = vmatpush.msra.mxu0 %v10725_v21  ;;  %5462 = vmatpush.msra.mxu2 %v9943_v33  ;;  %v5554_v27 = vand.u32 4294901760, %v5553_v60  ;;  %v5565_v40 = vsub.f32 %v10029_v22, %v5564_v45  ;;  %v5576_v54 = vand.u32 4294901760, %v10055_v10 }
 0x312   :  { %5421 = vmatpush.msra.mxu1 %v9714_v39  ;;  %5537 = vmatpush.msra.mxu3 %v5536_v12  ;;  %v10727_v12 = vand.u32 4294901760, %v9811_v58  ;;  %v5560_v24 = vand.u32 4294901760, %v5559_v8  ;;  %v10728_v32 = vand.u32 4294901760, %v9827_v50  ;;  %v5571_v58 = vsub.f32 %v10042_v36, %v5570_v28 }
 0x313   :  { %v5892_v41 = vadd.f32 0.4994258, %v5891_v35  ;;  %5388 = vmatpush.msra.mxu0 %v10726_v37  ;;  %5464 = vmatpush.msra.mxu2 %v9957_v7  ;;  %v5880_v5 = vmul.f32 %v5879_v51, %v9961_v55  ;;  %v5577_v50 = vsub.f32 %v10055_v10, %v5576_v54  ;;  %v10730_v35 = vld [vmem:[#allocation27_spill] sm:$0xff]  ;;  %v10731_v8 = vand.u32 4294901760, %v9839_v52 }
 0x314   :  { %5423 = vmatpush.msra.mxu1 %v9725_v48  ;;  %5543 = vmatpush.msra.mxu3 %v5542_v31  ;;  %v5566_v31 = vand.u32 4294901760, %v5565_v40  ;;  %v10733_v37 = vand.u32 4294901760, %v9860_v0 }
 0x315   :  { %v5893_v39 = vmul.f32 %v5892_v41, %v9961_v55  ;;  %5392 = vmatpush.msra.mxu0 %v10727_v12  ;;  %5466 = vmatpush.msra.mxu2 %v9971_v19  ;;  %v5881_v60 = vadd.f32 0.18741608, %v5880_v5  ;;  %v10732_v41 = vld [vmem:[#allocation24_spill] sm:$0xff]  ;;  %v10736_v12 = vand.u32 4294901760, %v9878_v11 }
 0x316   :  { %5425 = vmatpush.msra.mxu1 %v9738_v59  ;;  %5549 = vmatpush.msra.mxu3 %v5548_v3  ;;  %v10729_v59 = vand.u32 4294901760, %v9846_v46  ;;  %v5578_v46 = vand.u32 4294901760, %v5577_v50 }
 0x317   :  { %v5894_v48 = vadd.f32 1.0, %v5893_v39  ;;  %5396 = vmatpush.msra.mxu0 %v10728_v32  ;;  %5468 = vmatpush.msra.mxu2 %v9986_v6  ;;  %v5882_v21 = vmul.f32 %v5881_v60, %v9961_v55  ;;  %v10746_v60 = vand.u32 4294901760, %v9955_v57 }
 0x318   :  { %5427 = vmatpush.msra.mxu1 %v9749_v2  ;;  %5555 = vmatpush.msra.mxu3 %v5554_v27  ;;  %v5572_v2 = vand.u32 4294901760, %v5571_v58  ;;  %v10741_v58 = vld [vmem:[#allocation33_spill] sm:$0xff] }
 0x319   :  { %5996 = vrcp.f32 %v5894_v48  ;;  %5400 = vmatpush.msra.mxu0 %v10729_v59  ;;  %5470 = vmatpush.msra.mxu2 %v10004_v49  ;;  %v5883_v55 = vadd.f32 1.1283791, %v5882_v21  ;;  %v5904_v27 = vand.u32 2147483647, %v5894_v48  ;;  %vm5900_vm9 = vweird.f32 %v5894_v48  ;;  %v10744_v59 = vld [vmem:[#allocation30_spill] sm:$0xff] }
 0x31a   :  { %5429 = vmatpush.msra.mxu1 %v9761_v62  ;;  %5561 = vmatpush.msra.mxu3 %v5560_v24 }
 0x31b   :  { %5402 = vmatmul.f32.vlgmr.msra.gmra.mxu0 %v10714_v61  ;;  %5472 = vmatpush.msra.mxu2 %v10017_v34  ;;  %vm5905_vm11 = vcmp.eq.f32.partialorder %v5904_v27, 8.507059e+37 }
 0x31c   :  { %5587 = vmatpush.msrb.mxu0 %v9839_v52  ;;  %5431 = vmatpush.msra.mxu1 %v9773_v23 }
 0x31d   :  { %5567 = vmatpush.msra.mxu3 %v5566_v31  ;;  %5474 = vmatpush.msra.mxu2 %v10031_v1  ;;  %v5786_v31 = vmul.f32 0.5, %v10744_v59 }
 0x31e   :  { %5590 = vmatpush.msrb.mxu0 %v9860_v0  ;;  %5433 = vmatpush.msra.mxu1 %v9785_v15  ;;  %v5906_v15 = vand.u32 2147483648, %v5894_v48  ;;  %v10735_v0 = vld [vmem:[#allocation28_spill] sm:$0xff] }
 0x31f   :  { %v5997_v62 = vpop.eup %5996  ;;  %5573 = vmatpush.msra.mxu3 %v5572_v2  ;;  %5480 = vmatmul.f32.vlgmr.msra.gmra.mxu2 %v10730_v35 }
 0x320   :  { %v5896_v3 = vmul.f32 %v5997_v62, %v5894_v48  ;;  %5593 = vmatpush.msrb.mxu0 %v9870_v25  ;;  %5681 = vmatpush.msrb.mxu2 %v10731_v8  ;;  %vm5901_vm8 = vweird.f32 %v5997_v62  ;;  %v5907_v39 = vor.u32 1.1754944e-38, %v5906_v15  ;;  %v10739_v48 = vld [vmem:[#allocation29_spill] sm:$0xff] }
 0x321   :  { %5435 = vmatpush.msra.mxu1 %v9803_v16  ;;  %5579 = vmatpush.msra.mxu3 %v5578_v46  ;;  %v10734_v16 = vand.u32 4294901760, %v9870_v25  ;;  %vm5902_vm10 = vmor %vm5900_vm9, %vm5901_vm8  ;;  %v10738_v25 = vld [vmem:[#allocation31_spill] sm:$0xff] }
 0x322   :  { %v5897_v23 = vsub.f32 1.0, %v5896_v3  ;;  %5581 = vmatmul.f32.vlgmr.msra.gmra.mxu3 %v10732_v41  ;;  %5596 = vmatpush.msrb.mxu0 %v9878_v11  ;;  %v10742_v11 = vand.u32 4294901760, %v9909_v29 }
 0x323   :  { %5685 = vmatpush.msrb.mxu2 %v10733_v37  ;;  %5748 = vmatpush.msrb.mxu3 %v9815_v53 }
 0x324   :  { %v5898_v51 = vmul.f32 %v5997_v62, %v5897_v23  ;;  %5437 = vmatpush.msra.mxu1 %v9821_v17  ;;  %5599 = vmatpush.msrb.mxu0 %v9890_v42  ;;  %v10737_v17 = vld [vmem:[#allocation32_spill] sm:$0xff] }
 0x325   :  { %5439 = vmatmul.f32.vlgmr.msra.gmra.mxu1 %v10714_v61  ;;  %5689 = vmatpush.msrb.mxu2 %v10734_v16  ;;  %v5884_v40 = vmul.f32 %v5883_v55, %v10737_v17 }
 0x326   :  { %v5899_v52 = vadd.f32 %v5997_v62, %v5898_v51  ;;  %5640 = vmatpush.msrb.mxu1 %v9815_v53  ;;  %5750 = vmatpush.msrb.mxu3 %v10735_v0  ;;  %v10740_v53 = vand.u32 4294901760, %v9890_v42  ;;  %v10743_v42 = vand.u32 4294901760, %v10739_v48 }
 0x327   :  { %5602 = vmatpush.msrb.mxu0 %v9909_v29  ;;  %5693 = vmatpush.msrb.mxu2 %v10736_v12  ;;  %v10745_v29 = vand.u32 4294901760, %v9941_v13 }
 0x328   :  { %v5903_v24 = vsel %vm5902_vm10, %v5997_v62, %v5899_v52  ;;  %5642 = vmatpush.msrb.mxu1 %v10735_v0  ;;  %5752 = vmatpush.msrb.mxu3 %v10738_v25 }
 0x329   :  { %v5908_v61 = vsel %vm5905_vm11, %v5907_v39, %v5903_v24  ;;  %5605 = vmatpush.msrb.mxu0 %v10739_v48  ;;  %5697 = vmatpush.msrb.mxu2 %v10740_v53 }
 0x32a   :  { %v5909_v32 = vmul.f32 %v5908_v61, %v5884_v40  ;;  %5644 = vmatpush.msrb.mxu1 %v10738_v25  ;;  %5754 = vmatpush.msrb.mxu3 %v10741_v58 }
 0x32b   :  { %5608 = vmatpush.msrb.mxu0 %v9941_v13  ;;  %5701 = vmatpush.msrb.mxu2 %v10742_v11 }
 0x32c   :  { %v5984_v5 = vclamps-f32 %v5909_v32, 1.0  ;;  %5646 = vmatpush.msrb.mxu1 %v10741_v58  ;;  %5756 = vmatpush.msrb.mxu3 %v9865_v43 }
 0x32d   :  { %5611 = vmatpush.msrb.mxu0 %v9955_v57  ;;  %5705 = vmatpush.msrb.mxu2 %v10743_v42 }
 0x32e   :  { %v5954_v50 = vadd.f32 1.0, %v5984_v5  ;;  %5648 = vmatpush.msrb.mxu1 %v9865_v43  ;;  %5758 = vmatpush.msrb.mxu3 %v9882_v14  ;;  %v6002_v43 = vld [vmem:[#allocation7] sm:$0xf] }
 0x32f   :  { %5614 = vmatpush.msrb.mxu0 %v9969_v26  ;;  %5709 = vmatpush.msrb.mxu2 %v10745_v29 }
 0x330   :  { %v5958_v2 = vmul.f32 %v5954_v50, %v5786_v31  ;;  %5650 = vmatpush.msrb.mxu1 %v9882_v14  ;;  %5760 = vmatpush.msrb.mxu3 %v9898_v38  ;;  %v10747_v14 = vld [vmem:[#allocation25_spill] sm:$0xff] }
 0x331   :  { %5617 = vmatpush.msrb.mxu0 %v9984_v9  ;;  %5713 = vmatpush.msrb.mxu2 %v10746_v60 }
 0x332   :  { %5962 = vst [vmem:[#allocation8 + $0x10] sm:$0xff] %v5958_v2  ;;  %5652 = vmatpush.msrb.mxu1 %v9898_v38  ;;  %5762 = vmatpush.msrb.mxu3 %v9911_v44  ;;  %v323_v38 = vperm.slane %v6002_v43, 3 }
 0x333   :  { %5620 = vmatpush.msrb.mxu0 %v9997_v47  ;;  %5717 = vmatpush.msrb.mxu2 %v5540_v20  ;;  %v4458_v47 = vpop.f32.mrf.mxu0 }
 0x334   :  { %5654 = vmatpush.msrb.mxu1 %v9911_v44  ;;  %5764 = vmatpush.msrb.mxu3 %v9927_v30  ;;  %v10748_v44 = vld [vmem:[#allocation26_spill] sm:$0xff] }
 0x335   :  { %5623 = vmatpush.msrb.mxu0 %v10012_v56  ;;  %5721 = vmatpush.msrb.mxu2 %v5546_v4 }
 0x336   :  { %5656 = vmatpush.msrb.mxu1 %v9927_v30  ;;  %5766 = vmatpush.msrb.mxu3 %v9943_v33 }
 0x337   :  { %5626 = vmatpush.msrb.mxu0 %v10029_v22  ;;  %5725 = vmatpush.msrb.mxu2 %v5552_v63 }
 0x338   :  { %5658 = vmatpush.msrb.mxu1 %v9943_v33  ;;  %5768 = vmatpush.msrb.mxu3 %v9957_v7  ;;  %v4459_v33 = vadd.f32 %v4458_v47, %v323_v38 }
 0x339   :  { %5629 = vmatpush.msrb.mxu0 %v10042_v36  ;;  %5729 = vmatpush.msrb.mxu2 %v5558_v18 }
 0x33a   :  { %5660 = vmatpush.msrb.mxu1 %v9957_v7  ;;  %5770 = vmatpush.msrb.mxu3 %v9971_v19  ;;  %v4559_v7 = vpop.f32.mrf.mxu1  ;;  %v4613_v57 = vpop.f32.mrf.mxu2 }
 0x33b   :  { %5632 = vmatpush.msrb.mxu0 %v10055_v10  ;;  %5733 = vmatpush.msrb.mxu2 %v5564_v45  ;;  %v4560_v30 = vadd.f32 %v4559_v7, %v4459_v33 }
 0x33c   :  { %5662 = vmatpush.msrb.mxu1 %v9971_v19  ;;  %5772 = vmatpush.msrb.mxu3 %v9986_v6 }
 0x33d   :  { %5635 = vmatmul.f32.vlgmr.msrb.gmra.mxu0 %v10747_v14  ;;  %5737 = vmatpush.msrb.mxu2 %v5570_v28  ;;  %v4614_v13 = vadd.f32 %v4613_v57, %v4560_v30  ;;  %v4652_v9 = vpop.f32.mrf.mxu3 }
 0x33e   :  { %5664 = vmatpush.msrb.mxu1 %v9986_v6  ;;  %5774 = vmatpush.msrb.mxu3 %v10004_v49 }
 0x33f   :  { %5741 = vmatpush.msrb.mxu2 %v5576_v54  ;;  %v4653_v26 = vadd.f32 %v4652_v9, %v4614_v13 }
 0x340   :  { %5666 = vmatpush.msrb.mxu1 %v10004_v49  ;;  %5776 = vmatpush.msrb.mxu3 %v10017_v34  ;;  %v4721_v19 = vpop.f32.mrf.mxu0 }
 0x341   :  { %5743 = vmatmul.f32.vlgmr.msrb.gmra.mxu2 %v10732_v41  ;;  %v4722_v6 = vadd.f32 %v4721_v19, %v4653_v26 }
 0x342   :  { %5668 = vmatpush.msrb.mxu1 %v10017_v34  ;;  %5778 = vmatpush.msrb.mxu3 %v10031_v1 }
 0x343   :  { %5780 = vmatmul.f32.vlgmr.msrb.gmra.mxu3 %v10732_v41  ;;  %v4758_v20 = vpop.f32.mrf.mxu1 }
 0x344   :  { %5670 = vmatpush.msrb.mxu1 %v10031_v1  ;;  %v4759_v49 = vadd.f32 %v4758_v20, %v4722_v6  ;;  %v4799_v4 = vpop.f32.mrf.mxu2 }
 0x345   :  { %5674 = vmatmul.f32.vlgmr.msrb.gmra.mxu1 %v10748_v44 }
 0x346   :  { %v4800_v56 = vadd.f32 %v4799_v4, %v4759_v49 }
 0x347   :  { %v4900_v34 = vpop.f32.mrf.mxu3 }
 0x348   :  { %v4901_v22 = vadd.f32 %v4900_v34, %v4800_v56 }
 0x354   :  { %v4954_v63 = vpop.f32.mrf.mxu0 }
 0x355   :  { %v4955_v18 = vadd.f32 %v4954_v63, %v4901_v22 }
 0x35e   :  { %v4993_v1 = vpop.f32.mrf.mxu1  ;;  %v5062_v45 = vpop.f32.mrf.mxu2 }
 0x35f   :  { %v4994_v36 = vadd.f32 %v4993_v1, %v4955_v18 }
 0x361   :  { %v5063_v10 = vadd.f32 %v5062_v45, %v4994_v36  ;;  %v5099_v28 = vpop.f32.mrf.mxu3 }
 0x363   :  { %v5100_v46 = vadd.f32 %v5099_v28, %v5063_v10 }
 0x376   :  { %v5140_v54 = vpop.f32.mrf.mxu0 }
 0x377   :  { %v5141_v35 = vadd.f32 %v5140_v54, %v5100_v46 }
 0x380   :  { %v5241_v62 = vpop.f32.mrf.mxu1  ;;  %v5295_v3 = vpop.f32.mrf.mxu2 }
 0x381   :  { %v5242_v21 = vadd.f32 %v5241_v62, %v5141_v35 }
 0x383   :  { %v5296_v8 = vadd.f32 %v5295_v3, %v5242_v21  ;;  %v5334_v23 = vpop.f32.mrf.mxu3 }
 0x385   :  { %v5335_v15 = vadd.f32 %v5334_v23, %v5296_v8 }
 0x398   :  { %v5403_v41 = vpop.f32.mrf.mxu0 }
 0x399   :  { %v5404_v55 = vadd.f32 %v5403_v41, %v5335_v15 }
 0x3a2   :  { %v5440_v37 = vpop.f32.mrf.mxu1  ;;  %v5481_v27 = vpop.f32.mrf.mxu2 }
 0x3a3   :  { %v5441_v51 = vadd.f32 %v5440_v37, %v5404_v55 }
 0x3a5   :  { %v5482_v16 = vadd.f32 %v5481_v27, %v5441_v51  ;;  %v5582_v52 = vpop.f32.mrf.mxu3 }
 0x3a7   :  { %v5583_v39 = vadd.f32 %v5582_v52, %v5482_v16 }
 0x3ba   :  { %v5636_v0 = vpop.f32.mrf.mxu0 }
 0x3bb   :  { %v5637_v12 = vadd.f32 %v5636_v0, %v5583_v39 }
 0x3c2   :  { %v5675_v17 = vpop.f32.mrf.mxu1 }
 0x3c3   :  { %v5676_v40 = vadd.f32 %v5675_v17, %v5637_v12 }
 0x3c4   :  { %v5744_v24 = vpop.f32.mrf.mxu2 }
 0x3c5   :  { %v5745_v25 = vadd.f32 %v5744_v24, %v5676_v40 }
 0x3c6   :  { %v5781_v61 = vpop.f32.mrf.mxu3 }
 0x3c7   :  { %v5782_v48 = vadd.f32 %v5781_v61, %v5745_v25 }
 0x3c9   :  { %v5791_v53 = vmul.f32 0.70710677, %v5782_v48  ;;  %v5787_v45 = vmul.f32 0.5, %v5782_v48 }
 0x3cb   :  { %v5912_v32 = vmul.f32 %v5791_v53, %v5791_v53 }
 0x3cd   :  { %v5913_v58 = vmin.f32 %v5912_v32, 16.0 }
 0x3cf   :  { %v5914_v11 = vmul.f32 2.1237322e-06, %v5913_v58  ;;  %v5925_v5 = vmul.f32 3.8918573e-05, %v5913_v58 }
 0x3d1   :  { %v5915_v42 = vadd.f32 0.00028619796, %v5914_v11  ;;  %v5926_v59 = vadd.f32 0.001143296, %v5925_v5 }
 0x3d3   :  { %v5916_v31 = vmul.f32 %v5915_v42, %v5913_v58  ;;  %v5927_v50 = vmul.f32 %v5926_v59, %v5913_v58 }
 0x3d5   :  { %v5928_v29 = vadd.f32 0.014752088, %v5927_v50  ;;  %v5917_v2 = vadd.f32 0.0036580483, %v5916_v31 }
 0x3d7   :  { %v5929_v60 = vmul.f32 %v5928_v29, %v5913_v58  ;;  %v5918_v44 = vmul.f32 %v5917_v2, %v5913_v58 }
 0x3d9   :  { %v5930_v14 = vadd.f32 0.112945676, %v5929_v60  ;;  %v5919_v47 = vadd.f32 0.05243302, %v5918_v44 }
 0x3db   :  { %v5931_v43 = vmul.f32 %v5930_v14, %v5913_v58  ;;  %v5920_v30 = vmul.f32 %v5919_v47, %v5913_v58 }
 0x3dd   :  { %v5932_v38 = vadd.f32 0.4994258, %v5931_v43  ;;  %v5921_v57 = vadd.f32 0.18741608, %v5920_v30 }
 0x3df   :  { %v5933_v33 = vmul.f32 %v5932_v38, %v5913_v58  ;;  %v5922_v9 = vmul.f32 %v5921_v57, %v5913_v58 }
 0x3e1   :  { %v5934_v7 = vadd.f32 1.0, %v5933_v33  ;;  %v5923_v20 = vadd.f32 1.1283791, %v5922_v9 }
 0x3e3   :  { %5998 = vrcp.f32 %v5934_v7  ;;  %v5946_v6 = vand.u32 2147483648, %v5934_v7  ;;  %v5944_v4 = vand.u32 2147483647, %v5934_v7  ;;  %vm5940_vm13 = vweird.f32 %v5934_v7 }
 0x3e4   :  { %v5924_v63 = vmul.f32 %v5923_v20, %v5791_v53 }
 0x3e5   :  { %v5947_v34 = vor.u32 1.1754944e-38, %v5946_v6  ;;  %vm5945_vm15 = vcmp.eq.f32.partialorder %v5944_v4, 8.507059e+37 }
 0x3e9   :  { %v5999_v13 = vpop.eup %5998 }
 0x3ea   :  { %v5936_v26 = vmul.f32 %v5999_v13, %v5934_v7  ;;  %vm5941_vm12 = vweird.f32 %v5999_v13 }
 0x3eb   :  { %vm5942_vm14 = vmor %vm5940_vm13, %vm5941_vm12 }
 0x3ec   :  { %v5937_v19 = vsub.f32 1.0, %v5936_v26 }
 0x3ee   :  { %v5938_v49 = vmul.f32 %v5999_v13, %v5937_v19 }
 0x3f0   :  { %v5939_v56 = vadd.f32 %v5999_v13, %v5938_v49 }
 0x3f2   :  { %v5943_v22 = vsel %vm5942_vm14, %v5999_v13, %v5939_v56 }
 0x3f3   :  { %v5948_v1 = vsel %vm5945_vm15, %v5947_v34, %v5943_v22 }
 0x3f4   :  { %v5949_v18 = vmul.f32 %v5948_v1, %v5924_v63 }
 0x3f6   :  { %v5985_v36 = vclamps-f32 %v5949_v18, 1.0 }
 0x3f8   :  { %v5955_v10 = vadd.f32 1.0, %v5985_v36 }
 0x3fa   :  { %v5959_v28 = vmul.f32 %v5955_v10, %v5787_v45 }
 0x3fc   :  { %5963 = vst [vmem:[#allocation8 + $0x18] sm:$0xff] %v5959_v28 }
 0x3fd   :  { %5974 = dma.vmem_to_hbm [thread:$0]  %s5970_s2, 512, %s5972_s30, [#allocation4]  }
 0x3fe   :  { %6103 = dma.done.wait [#allocation4], 512  }
 0x3ff   :  { %6104 = vsyncadd [#allocation4], 4294966784 }
 0x400   :  { %5979 = vsyncpa [#allocation3], 1 }
 0x401   :  { %5980 = vsyncpa [#allocation6], 1 }
 0x402   :  { %5981 = vsyncpa [#allocation4], 1 }

</bundles_post_ra>
